<compile_context>
chip_gen: v6e
topology: v6e:2x2x1
jax: 0.10.0
libtpu: 0.0.40
codegen_flags: <defaults>
</compile_context>

<pallas_src>
import numpy as np
import jax
import jax.numpy as jnp
from jax import lax
from jax.experimental import pallas as pl
from jax.experimental.pallas import tpu as pltpu

HIDDEN = 32
INPUT = 1
LAYERS = 3
OUTPUT = 1
UNROLL = 8  # bounded unroll of the timestep loop


def lstm_kernel(x_ref,                       # (B_BLOCK, T)  batch-major, lane-dense
                wih0_ref, wih1_ref, wih2_ref,  # (1,4H) / (H,4H) / (H,4H), gate-scaled
                whh_all_ref,                 # (3H, 12H) block-diag, gate-scaled
                b0_ref, b1_ref, b2_ref,      # (1, 4H), gate-scaled
                fcw_ref, fcb_ref,            # (H, O), (1, O)
                out_ref,                     # (B_BLOCK, O)
                gih0_ref):                   # VMEM scratch (T, B_BLOCK, 4H)
    B, T = x_ref.shape
    H = HIDDEN
    G = 4 * H

    # Load weights once; the (partially) unrolled loop reuses the same values.
    wih0 = wih0_ref[...]
    wih1 = wih1_ref[...]
    wih2 = wih2_ref[...]
    whh_all = whh_all_ref[...]
    b0 = b0_ref[...]

    # Precompute layer-0 input projections (+ layer-0 bias) for every timestep.
    # input_size == 1 -> one (B,1)*(1,4H) lane-broadcast FMA per timestep,
    # pure VPU work done up front, off the serialized recurrent chain.
    xv = x_ref[...]                          # (B, T) f32
    for t in range(T):                       # T is static; trivial per-step work
        gih0_ref[t] = xv[:, t:t + 1] * wih0 + b0

    # Hoisted bias broadcasts (JAX does not CSE broadcast_in_dim inside loops).
    b1 = jnp.broadcast_to(b1_ref[...], (B, G))
    b2 = jnp.broadcast_to(b2_ref[...], (B, G))

    half = jnp.float32(0.5)

    def act(gates, c):
        # i/f/o gate columns were pre-halved at pack time, so
        # sigmoid(z) = 0.5 + 0.5*tanh(z/2): a single full-tile tanh per cell
        # (plus tanh(c_new)) instead of sigmoid+tanh over the whole (B,4H) tile.
        # Gate order is PyTorch's (i, f, g, o).
        th = jnp.tanh(gates)
        i = half + half * th[:, 0 * H:1 * H]
        f = half + half * th[:, 1 * H:2 * H]
        g = th[:, 2 * H:3 * H]
        o = half + half * th[:, 3 * H:4 * H]
        c_new = f * c + i * g
        h_new = o * jnp.tanh(c_new)
        return h_new, c_new

    zeros = jnp.zeros((B, H), jnp.float32)
    init = (zeros,) * (2 * LAYERS)           # (h0, c0, h1, c1, h2, c2)

    def body(t, carry):
        h0, c0, h1, c1, h2, c2 = carry
        # Fused block-diagonal recurrent projection for all three layers:
        # depends only on the t-1 carry, so it issues ahead of the gate chain.
        h_all = jnp.concatenate([h0, h1, h2], axis=1)                     # (B, 3H)
        ghh = jnp.dot(h_all, whh_all, preferred_element_type=jnp.float32)  # (B, 12H)

        h0, c0 = act(gih0_ref[t] + ghh[:, 0 * G:1 * G], c0)
        h1, c1 = act(jnp.dot(h0, wih1, preferred_element_type=jnp.float32)
                     + ghh[:, 1 * G:2 * G] + b1, c1)
        h2, c2 = act(jnp.dot(h1, wih2, preferred_element_type=jnp.float32)
                     + ghh[:, 2 * G:3 * G] + b2, c2)
        return (h0, c0, h1, c1, h2, c2)

    carry = lax.fori_loop(0, T, body, init, unroll=min(T, UNROLL))
    h_top = carry[4]

    # fc(out[:, -1, :])
    out = jnp.dot(h_top, fcw_ref[...], preferred_element_type=jnp.float32) + fcb_ref[...]
    out_ref[...] = out.astype(out_ref.dtype)


def init_params(key):
    """Deterministic params matching nn.LSTM / nn.Linear shapes, pre-transposed."""
    k = 1.0 / np.sqrt(HIDDEN)
    params = {}
    keys = jax.random.split(key, 4 * LAYERS + 2)
    ki = 0
    for l in range(LAYERS):
        in_feat = INPUT if l == 0 else HIDDEN
        w_ih = jax.random.uniform(keys[ki], (4 * HIDDEN, in_feat), jnp.float32, -k, k); ki += 1
        w_hh = jax.random.uniform(keys[ki], (4 * HIDDEN, HIDDEN), jnp.float32, -k, k); ki += 1
        b_ih = jax.random.uniform(keys[ki], (4 * HIDDEN,), jnp.float32, -k, k); ki += 1
        b_hh = jax.random.uniform(keys[ki], (4 * HIDDEN,), jnp.float32, -k, k); ki += 1
        params[f"wih{l}"] = w_ih.T                                  # (in, 4H)
        params[f"whh{l}"] = w_hh.T                                  # (H, 4H)
        params[f"b{l}"] = (b_ih + b_hh).reshape(1, 4 * HIDDEN)      # (1, 4H)
    fc_w = jax.random.uniform(keys[ki], (OUTPUT, HIDDEN), jnp.float32, -k, k); ki += 1
    fc_b = jax.random.uniform(keys[ki], (OUTPUT,), jnp.float32, -k, k)
    params["fcw"] = fc_w.T                                          # (H, O)
    params["fcb"] = fc_b.reshape(1, OUTPUT)                         # (1, O)
    return params


def _pack_params(params):
    """Kernel-side weight packing: gate-column scaling + block-diag recurrent fusion."""
    H = HIDDEN
    # Pre-halve i/f/o gate columns so sigmoid(z) = 0.5 + 0.5*tanh(z/2) in-kernel.
    col = jnp.concatenate([jnp.full((H,), 0.5, jnp.float32),
                           jnp.full((H,), 0.5, jnp.float32),
                           jnp.ones((H,), jnp.float32),
                           jnp.full((H,), 0.5, jnp.float32)])

    def sc(w):
        return (w.astype(jnp.float32) * col)

    whh_all = jnp.zeros((LAYERS * H, LAYERS * 4 * H), jnp.float32)
    for l in range(LAYERS):
        whh_all = whh_all.at[l * H:(l + 1) * H,
                             l * 4 * H:(l + 1) * 4 * H].set(sc(params[f"whh{l}"]))

    return dict(
        wih0=sc(params["wih0"]), wih1=sc(params["wih1"]), wih2=sc(params["wih2"]),
        b0=sc(params["b0"]), b1=sc(params["b1"]), b2=sc(params["b2"]),
        whh_all=whh_all,
        fcw=params["fcw"].astype(jnp.float32),
        fcb=params["fcb"].astype(jnp.float32),
    )


def lstm_forward(x, params):
    """x: (B, T, I) batch-first (matches PyTorch). Returns (B, OUTPUT)."""
    B, T, I = x.shape
    assert I == INPUT

    # input_size == 1 -> drop the degenerate last dim; x block is lane-dense (B, T).
    x2d = x[:, :, 0].astype(jnp.float32)                            # (B, T)

    # Adaptive batch block: pad to a sublane group, cap the block at 128 rows.
    b_pad8 = -(-B // 8) * 8
    b_block = min(128, b_pad8)
    n_blk = -(-b_pad8 // b_block)
    b_pad = n_blk * b_block
    if b_pad != B:
        x2d = jnp.pad(x2d, ((0, b_pad - B), (0, 0)))

    p = _pack_params(params)
    args = [x2d, p["wih0"], p["wih1"], p["wih2"], p["whh_all"],
            p["b0"], p["b1"], p["b2"], p["fcw"], p["fcb"]]

    def replicated(a):
        # Full-array block, same block for every batch-grid step.
        return pl.BlockSpec(a.shape, lambda b, nd=a.ndim: (0,) * nd)

    in_specs = [pl.BlockSpec((b_block, T), lambda b: (b, 0))]
    in_specs += [replicated(a) for a in args[1:]]

    out = pl.pallas_call(
        lstm_kernel,
        out_shape=jax.ShapeDtypeStruct((b_pad, OUTPUT), jnp.float32),
        grid_spec=pltpu.PrefetchScalarGridSpec(
            num_scalar_prefetch=0,
            grid=(n_blk,),
            in_specs=in_specs,
            out_specs=pl.BlockSpec((b_block, OUTPUT), lambda b: (b, 0)),
            scratch_shapes=[pltpu.VMEM((T, b_block, 4 * HIDDEN), jnp.float32)],
        ),
        compiler_params=pltpu.CompilerParams(
            # batch blocks are independent -> shard across TCs on v7x.
            dimension_semantics=("parallel",)),
    )(*args)
    return out[:B]


def lstm_reference(x, params):
    """Pure-JAX reference of the same forward pass (unscaled params, for validation)."""
    B, T, I = x.shape
    H = HIDDEN

    def cell(x_t, h, c, wih, whh, b):
        gates = x_t @ wih + h @ whh + b
        i = jax.nn.sigmoid(gates[:, 0 * H:1 * H])
        f = jax.nn.sigmoid(gates[:, 1 * H:2 * H])
        g = jnp.tanh(gates[:, 2 * H:3 * H])
        o = jax.nn.sigmoid(gates[:, 3 * H:4 * H])
        c = f * c + i * g
        h = o * jnp.tanh(c)
        return h, c

    hs = [jnp.zeros((B, H), jnp.float32) for _ in range(LAYERS)]
    cs = [jnp.zeros((B, H), jnp.float32) for _ in range(LAYERS)]
    for t in range(T):
        inp = x[:, t, :]
        for l in range(LAYERS):
            hs[l], cs[l] = cell(inp, hs[l], cs[l],
                                params[f"wih{l}"], params[f"whh{l}"], params[f"b{l}"])
            inp = hs[l]
    return hs[-1] @ params["fcw"] + params["fcb"]


if __name__ == "__main__":
    B, T = 2, 8
    key = jax.random.PRNGKey(0)
    kx, kp = jax.random.split(key)
    x = jax.random.normal(kx, (B, T, INPUT), jnp.float32)   # (batch, seq, input_size)
    params = init_params(kp)

    out = lstm_forward(x, params)
    out = jax.block_until_ready(out)

    ref = lstm_reference(x, params)
    assert out.shape == (B, OUTPUT)
    np.testing.assert_allclose(np.asarray(out), np.asarray(ref), rtol=2e-5, atol=2e-5)

    print("KERNEL_OK")
</pallas_src>

<mosaic_0001>
module attributes {stable_mosaic.version = 11 : i64} {
  func.func @lstm_kernel(%arg0: i32, %arg1: memref<8x8xf32, #tpu.memory_space<vmem>>, %arg2: memref<1x128xf32, #tpu.memory_space<vmem>>, %arg3: memref<32x128xf32, #tpu.memory_space<vmem>>, %arg4: memref<32x128xf32, #tpu.memory_space<vmem>>, %arg5: memref<96x384xf32, #tpu.memory_space<vmem>>, %arg6: memref<1x128xf32, #tpu.memory_space<vmem>>, %arg7: memref<1x128xf32, #tpu.memory_space<vmem>>, %arg8: memref<1x128xf32, #tpu.memory_space<vmem>>, %arg9: memref<32x1xf32, #tpu.memory_space<vmem>>, %arg10: memref<1x1xf32, #tpu.memory_space<vmem>>, %arg11: memref<8x1xf32, #tpu.memory_space<vmem>>, %arg12: memref<8x8x128xf32, #tpu.memory_space<vmem>>) attributes {dimension_semantics = [#tpu.dimension_semantics<parallel>], iteration_bounds = array<i64: 1>, scalar_prefetch = 0 : i64, scratch_operands = 1 : i64, tpu.core_type = #tpu.core_type<tc>, window_params = [{transform_indices = @transform_0, window_bounds = array<i64: 8, 8>}, {pipeline_mode = #tpu.pipeline_mode<synchronous>, transform_indices = @transform_1, window_bounds = array<i64: 1, 128>}, {pipeline_mode = #tpu.pipeline_mode<synchronous>, transform_indices = @transform_2, window_bounds = array<i64: 32, 128>}, {pipeline_mode = #tpu.pipeline_mode<synchronous>, transform_indices = @transform_3, window_bounds = array<i64: 32, 128>}, {pipeline_mode = #tpu.pipeline_mode<synchronous>, transform_indices = @transform_4, window_bounds = array<i64: 96, 384>}, {pipeline_mode = #tpu.pipeline_mode<synchronous>, transform_indices = @transform_5, window_bounds = array<i64: 1, 128>}, {pipeline_mode = #tpu.pipeline_mode<synchronous>, transform_indices = @transform_6, window_bounds = array<i64: 1, 128>}, {pipeline_mode = #tpu.pipeline_mode<synchronous>, transform_indices = @transform_7, window_bounds = array<i64: 1, 128>}, {pipeline_mode = #tpu.pipeline_mode<synchronous>, transform_indices = @transform_8, window_bounds = array<i64: 32, 1>}, {pipeline_mode = #tpu.pipeline_mode<synchronous>, transform_indices = @transform_9, window_bounds = array<i64: 1, 1>}, {transform_indices = @transform_10, window_bounds = array<i64: 8, 1>}]} {
    %c0 = arith.constant 0 : index
    %c0_0 = arith.constant 0 : index
    %0 = vector.load %arg2[%c0, %c0_0] : memref<1x128xf32, #tpu.memory_space<vmem>>, vector<1x128xf32>
    %c0_1 = arith.constant 0 : index
    %c0_2 = arith.constant 0 : index
    %1 = vector.load %arg3[%c0_1, %c0_2] : memref<32x128xf32, #tpu.memory_space<vmem>>, vector<32x128xf32>
    %c0_3 = arith.constant 0 : index
    %c0_4 = arith.constant 0 : index
    %2 = vector.load %arg4[%c0_3, %c0_4] : memref<32x128xf32, #tpu.memory_space<vmem>>, vector<32x128xf32>
    %c0_5 = arith.constant 0 : index
    %c0_6 = arith.constant 0 : index
    %3 = vector.load %arg5[%c0_5, %c0_6] : memref<96x384xf32, #tpu.memory_space<vmem>>, vector<96x384xf32>
    %c0_7 = arith.constant 0 : index
    %c0_8 = arith.constant 0 : index
    %4 = vector.load %arg6[%c0_7, %c0_8] : memref<1x128xf32, #tpu.memory_space<vmem>>, vector<1x128xf32>
    %c0_9 = arith.constant 0 : index
    %c0_10 = arith.constant 0 : index
    %5 = vector.load %arg1[%c0_9, %c0_10] : memref<8x8xf32, #tpu.memory_space<vmem>>, vector<8x8xf32>
    %6 = vector.extract_strided_slice %5 {offsets = [0, 0], sizes = [8, 1], strides = [1, 1]} : vector<8x8xf32> to vector<8x1xf32>
    %7 = vector.broadcast %6 : vector<8x1xf32> to vector<8x128xf32>
    %8 = vector.broadcast %0 : vector<1x128xf32> to vector<8x128xf32>
    %9 = arith.mulf %7, %8 : vector<8x128xf32>
    %10 = vector.broadcast %4 : vector<1x128xf32> to vector<8x128xf32>
    %11 = arith.addf %9, %10 : vector<8x128xf32>
    %c0_11 = arith.constant 0 : index
    %c0_12 = arith.constant 0 : index
    %c0_13 = arith.constant 0 : index
    %12 = vector.load %arg12[%c0_11, %c0_12, %c0_13] : memref<8x8x128xf32, #tpu.memory_space<vmem>>, vector<1x8x128xf32>
    %13 = vector.shape_cast %12 : vector<1x8x128xf32> to vector<8x128xf32>
    %14 = vector.shape_cast %11 : vector<8x128xf32> to vector<1x8x128xf32>
    tpu.vector_store %arg12[%c0_11, %c0_12, %c0_13], %14 {strides = array<i32>} : memref<8x8x128xf32, #tpu.memory_space<vmem>>, vector<1x8x128xf32>,
    %15 = vector.extract_strided_slice %5 {offsets = [0, 1], sizes = [8, 1], strides = [1, 1]} : vector<8x8xf32> to vector<8x1xf32>
    %16 = vector.broadcast %15 : vector<8x1xf32> to vector<8x128xf32>
    %17 = vector.broadcast %0 : vector<1x128xf32> to vector<8x128xf32>
    %18 = arith.mulf %16, %17 : vector<8x128xf32>
    %19 = vector.broadcast %4 : vector<1x128xf32> to vector<8x128xf32>
    %20 = arith.addf %18, %19 : vector<8x128xf32>
    %c1 = arith.constant 1 : index
    %c0_14 = arith.constant 0 : index
    %c0_15 = arith.constant 0 : index
    %21 = vector.load %arg12[%c1, %c0_14, %c0_15] : memref<8x8x128xf32, #tpu.memory_space<vmem>>, vector<1x8x128xf32>
    %22 = vector.shape_cast %21 : vector<1x8x128xf32> to vector<8x128xf32>
    %23 = vector.shape_cast %20 : vector<8x128xf32> to vector<1x8x128xf32>
    tpu.vector_store %arg12[%c1, %c0_14, %c0_15], %23 {strides = array<i32>} : memref<8x8x128xf32, #tpu.memory_space<vmem>>, vector<1x8x128xf32>,
    %24 = vector.extract_strided_slice %5 {offsets = [0, 2], sizes = [8, 1], strides = [1, 1]} : vector<8x8xf32> to vector<8x1xf32>
    %25 = vector.broadcast %24 : vector<8x1xf32> to vector<8x128xf32>
    %26 = vector.broadcast %0 : vector<1x128xf32> to vector<8x128xf32>
    %27 = arith.mulf %25, %26 : vector<8x128xf32>
    %28 = vector.broadcast %4 : vector<1x128xf32> to vector<8x128xf32>
    %29 = arith.addf %27, %28 : vector<8x128xf32>
    %c2 = arith.constant 2 : index
    %c0_16 = arith.constant 0 : index
    %c0_17 = arith.constant 0 : index
    %30 = vector.load %arg12[%c2, %c0_16, %c0_17] : memref<8x8x128xf32, #tpu.memory_space<vmem>>, vector<1x8x128xf32>
    %31 = vector.shape_cast %30 : vector<1x8x128xf32> to vector<8x128xf32>
    %32 = vector.shape_cast %29 : vector<8x128xf32> to vector<1x8x128xf32>
    tpu.vector_store %arg12[%c2, %c0_16, %c0_17], %32 {strides = array<i32>} : memref<8x8x128xf32, #tpu.memory_space<vmem>>, vector<1x8x128xf32>,
    %33 = vector.extract_strided_slice %5 {offsets = [0, 3], sizes = [8, 1], strides = [1, 1]} : vector<8x8xf32> to vector<8x1xf32>
    %34 = vector.broadcast %33 : vector<8x1xf32> to vector<8x128xf32>
    %35 = vector.broadcast %0 : vector<1x128xf32> to vector<8x128xf32>
    %36 = arith.mulf %34, %35 : vector<8x128xf32>
    %37 = vector.broadcast %4 : vector<1x128xf32> to vector<8x128xf32>
    %38 = arith.addf %36, %37 : vector<8x128xf32>
    %c3 = arith.constant 3 : index
    %c0_18 = arith.constant 0 : index
    %c0_19 = arith.constant 0 : index
    %39 = vector.load %arg12[%c3, %c0_18, %c0_19] : memref<8x8x128xf32, #tpu.memory_space<vmem>>, vector<1x8x128xf32>
    %40 = vector.shape_cast %39 : vector<1x8x128xf32> to vector<8x128xf32>
    %41 = vector.shape_cast %38 : vector<8x128xf32> to vector<1x8x128xf32>
    tpu.vector_store %arg12[%c3, %c0_18, %c0_19], %41 {strides = array<i32>} : memref<8x8x128xf32, #tpu.memory_space<vmem>>, vector<1x8x128xf32>,
    %42 = vector.extract_strided_slice %5 {offsets = [0, 4], sizes = [8, 1], strides = [1, 1]} : vector<8x8xf32> to vector<8x1xf32>
    %43 = vector.broadcast %42 : vector<8x1xf32> to vector<8x128xf32>
    %44 = vector.broadcast %0 : vector<1x128xf32> to vector<8x128xf32>
    %45 = arith.mulf %43, %44 : vector<8x128xf32>
    %46 = vector.broadcast %4 : vector<1x128xf32> to vector<8x128xf32>
    %47 = arith.addf %45, %46 : vector<8x128xf32>
    %c4 = arith.constant 4 : index
    %c0_20 = arith.constant 0 : index
    %c0_21 = arith.constant 0 : index
    %48 = vector.load %arg12[%c4, %c0_20, %c0_21] : memref<8x8x128xf32, #tpu.memory_space<vmem>>, vector<1x8x128xf32>
    %49 = vector.shape_cast %48 : vector<1x8x128xf32> to vector<8x128xf32>
    %50 = vector.shape_cast %47 : vector<8x128xf32> to vector<1x8x128xf32>
    tpu.vector_store %arg12[%c4, %c0_20, %c0_21], %50 {strides = array<i32>} : memref<8x8x128xf32, #tpu.memory_space<vmem>>, vector<1x8x128xf32>,
    %51 = vector.extract_strided_slice %5 {offsets = [0, 5], sizes = [8, 1], strides = [1, 1]} : vector<8x8xf32> to vector<8x1xf32>
    %52 = vector.broadcast %51 : vector<8x1xf32> to vector<8x128xf32>
    %53 = vector.broadcast %0 : vector<1x128xf32> to vector<8x128xf32>
    %54 = arith.mulf %52, %53 : vector<8x128xf32>
    %55 = vector.broadcast %4 : vector<1x128xf32> to vector<8x128xf32>
    %56 = arith.addf %54, %55 : vector<8x128xf32>
    %c5 = arith.constant 5 : index
    %c0_22 = arith.constant 0 : index
    %c0_23 = arith.constant 0 : index
    %57 = vector.load %arg12[%c5, %c0_22, %c0_23] : memref<8x8x128xf32, #tpu.memory_space<vmem>>, vector<1x8x128xf32>
    %58 = vector.shape_cast %57 : vector<1x8x128xf32> to vector<8x128xf32>
    %59 = vector.shape_cast %56 : vector<8x128xf32> to vector<1x8x128xf32>
    tpu.vector_store %arg12[%c5, %c0_22, %c0_23], %59 {strides = array<i32>} : memref<8x8x128xf32, #tpu.memory_space<vmem>>, vector<1x8x128xf32>,
    %60 = vector.extract_strided_slice %5 {offsets = [0, 6], sizes = [8, 1], strides = [1, 1]} : vector<8x8xf32> to vector<8x1xf32>
    %61 = vector.broadcast %60 : vector<8x1xf32> to vector<8x128xf32>
    %62 = vector.broadcast %0 : vector<1x128xf32> to vector<8x128xf32>
    %63 = arith.mulf %61, %62 : vector<8x128xf32>
    %64 = vector.broadcast %4 : vector<1x128xf32> to vector<8x128xf32>
    %65 = arith.addf %63, %64 : vector<8x128xf32>
    %c6 = arith.constant 6 : index
    %c0_24 = arith.constant 0 : index
    %c0_25 = arith.constant 0 : index
    %66 = vector.load %arg12[%c6, %c0_24, %c0_25] : memref<8x8x128xf32, #tpu.memory_space<vmem>>, vector<1x8x128xf32>
    %67 = vector.shape_cast %66 : vector<1x8x128xf32> to vector<8x128xf32>
    %68 = vector.shape_cast %65 : vector<8x128xf32> to vector<1x8x128xf32>
    tpu.vector_store %arg12[%c6, %c0_24, %c0_25], %68 {strides = array<i32>} : memref<8x8x128xf32, #tpu.memory_space<vmem>>, vector<1x8x128xf32>,
    %69 = vector.extract_strided_slice %5 {offsets = [0, 7], sizes = [8, 1], strides = [1, 1]} : vector<8x8xf32> to vector<8x1xf32>
    %70 = vector.broadcast %69 : vector<8x1xf32> to vector<8x128xf32>
    %71 = vector.broadcast %0 : vector<1x128xf32> to vector<8x128xf32>
    %72 = arith.mulf %70, %71 : vector<8x128xf32>
    %73 = vector.broadcast %4 : vector<1x128xf32> to vector<8x128xf32>
    %74 = arith.addf %72, %73 : vector<8x128xf32>
    %c7 = arith.constant 7 : index
    %c0_26 = arith.constant 0 : index
    %c0_27 = arith.constant 0 : index
    %75 = vector.load %arg12[%c7, %c0_26, %c0_27] : memref<8x8x128xf32, #tpu.memory_space<vmem>>, vector<1x8x128xf32>
    %76 = vector.shape_cast %75 : vector<1x8x128xf32> to vector<8x128xf32>
    %77 = vector.shape_cast %74 : vector<8x128xf32> to vector<1x8x128xf32>
    tpu.vector_store %arg12[%c7, %c0_26, %c0_27], %77 {strides = array<i32>} : memref<8x8x128xf32, #tpu.memory_space<vmem>>, vector<1x8x128xf32>,
    %c0_28 = arith.constant 0 : index
    %c0_29 = arith.constant 0 : index
    %78 = vector.load %arg7[%c0_28, %c0_29] : memref<1x128xf32, #tpu.memory_space<vmem>>, vector<1x128xf32>
    %79 = vector.shape_cast %78 : vector<1x128xf32> to vector<1x128xf32>
    %80 = vector.broadcast %79 : vector<1x128xf32> to vector<8x128xf32>
    %c0_30 = arith.constant 0 : index
    %c0_31 = arith.constant 0 : index
    %81 = vector.load %arg8[%c0_30, %c0_31] : memref<1x128xf32, #tpu.memory_space<vmem>>, vector<1x128xf32>
    %82 = vector.shape_cast %81 : vector<1x128xf32> to vector<1x128xf32>
    %83 = vector.broadcast %82 : vector<1x128xf32> to vector<8x128xf32>
    %cst = arith.constant 0.000000e+00 : f32
    %84 = vector.broadcast %cst : f32 to vector<8x32xf32>
    %cst_32 = arith.constant 5.000000e-01 : f32
    %c0_i32 = arith.constant 0 : i32
    %85 = tpu.concatenate %84, %84, %84 in 1 : vector<8x32xf32>, vector<8x32xf32>, vector<8x32xf32> -> vector<8x96xf32>
    %cst_33 = arith.constant dense<0.000000e+00> : vector<8x384xf32>
    %86 = tpu.matmul %85, %3, %cst_33 {dimension_numbers = #tpu.dot_dimension_numbers<[1], [0], [0], [1], [0, 0, 1, 1], [], []>} : vector<8x96xf32>, vector<96x384xf32>, vector<8x384xf32> -> vector<8x384xf32>
    %87 = arith.index_cast %c0_i32 : i32 to index
    %c0_34 = arith.constant 0 : index
    %c0_35 = arith.constant 0 : index
    %88 = vector.load %arg12[%87, %c0_34, %c0_35] : memref<8x8x128xf32, #tpu.memory_space<vmem>>, vector<1x8x128xf32>
    %89 = vector.shape_cast %88 : vector<1x8x128xf32> to vector<8x128xf32>
    %90 = vector.extract_strided_slice %86 {offsets = [0, 0], sizes = [8, 128], strides = [1, 1]} : vector<8x384xf32> to vector<8x128xf32>
    %91 = arith.addf %89, %90 : vector<8x128xf32>
    %92 = math.tanh %91 : vector<8x128xf32>
    %93 = vector.extract_strided_slice %92 {offsets = [0, 0], sizes = [8, 32], strides = [1, 1]} : vector<8x128xf32> to vector<8x32xf32>
    %94 = vector.broadcast %cst_32 : f32 to vector<8x32xf32>
    %95 = arith.mulf %94, %93 : vector<8x32xf32>
    %96 = vector.broadcast %cst_32 : f32 to vector<8x32xf32>
    %97 = arith.addf %96, %95 : vector<8x32xf32>
    %98 = vector.extract_strided_slice %92 {offsets = [0, 32], sizes = [8, 32], strides = [1, 1]} : vector<8x128xf32> to vector<8x32xf32>
    %99 = vector.broadcast %cst_32 : f32 to vector<8x32xf32>
    %100 = arith.mulf %99, %98 : vector<8x32xf32>
    %101 = vector.broadcast %cst_32 : f32 to vector<8x32xf32>
    %102 = arith.addf %101, %100 : vector<8x32xf32>
    %103 = vector.extract_strided_slice %92 {offsets = [0, 64], sizes = [8, 32], strides = [1, 1]} : vector<8x128xf32> to vector<8x32xf32>
    %104 = vector.extract_strided_slice %92 {offsets = [0, 96], sizes = [8, 32], strides = [1, 1]} : vector<8x128xf32> to vector<8x32xf32>
    %105 = vector.broadcast %cst_32 : f32 to vector<8x32xf32>
    %106 = arith.mulf %105, %104 : vector<8x32xf32>
    %107 = vector.broadcast %cst_32 : f32 to vector<8x32xf32>
    %108 = arith.addf %107, %106 : vector<8x32xf32>
    %109 = arith.mulf %102, %84 : vector<8x32xf32>
    %110 = arith.mulf %97, %103 : vector<8x32xf32>
    %111 = arith.addf %109, %110 : vector<8x32xf32>
    %112 = math.tanh %111 : vector<8x32xf32>
    %113 = arith.mulf %108, %112 : vector<8x32xf32>
    %cst_36 = arith.constant dense<0.000000e+00> : vector<8x128xf32>
    %114 = tpu.matmul %113, %1, %cst_36 {dimension_numbers = #tpu.dot_dimension_numbers<[1], [0], [0], [1], [0, 0, 1, 1], [], []>} : vector<8x32xf32>, vector<32x128xf32>, vector<8x128xf32> -> vector<8x128xf32>
    %115 = vector.extract_strided_slice %86 {offsets = [0, 128], sizes = [8, 128], strides = [1, 1]} : vector<8x384xf32> to vector<8x128xf32>
    %116 = arith.addf %114, %115 : vector<8x128xf32>
    %117 = arith.addf %116, %80 : vector<8x128xf32>
    %118 = math.tanh %117 : vector<8x128xf32>
    %119 = vector.extract_strided_slice %118 {offsets = [0, 0], sizes = [8, 32], strides = [1, 1]} : vector<8x128xf32> to vector<8x32xf32>
    %120 = vector.broadcast %cst_32 : f32 to vector<8x32xf32>
    %121 = arith.mulf %120, %119 : vector<8x32xf32>
    %122 = vector.broadcast %cst_32 : f32 to vector<8x32xf32>
    %123 = arith.addf %122, %121 : vector<8x32xf32>
    %124 = vector.extract_strided_slice %118 {offsets = [0, 32], sizes = [8, 32], strides = [1, 1]} : vector<8x128xf32> to vector<8x32xf32>
    %125 = vector.broadcast %cst_32 : f32 to vector<8x32xf32>
    %126 = arith.mulf %125, %124 : vector<8x32xf32>
    %127 = vector.broadcast %cst_32 : f32 to vector<8x32xf32>
    %128 = arith.addf %127, %126 : vector<8x32xf32>
    %129 = vector.extract_strided_slice %118 {offsets = [0, 64], sizes = [8, 32], strides = [1, 1]} : vector<8x128xf32> to vector<8x32xf32>
    %130 = vector.extract_strided_slice %118 {offsets = [0, 96], sizes = [8, 32], strides = [1, 1]} : vector<8x128xf32> to vector<8x32xf32>
    %131 = vector.broadcast %cst_32 : f32 to vector<8x32xf32>
    %132 = arith.mulf %131, %130 : vector<8x32xf32>
    %133 = vector.broadcast %cst_32 : f32 to vector<8x32xf32>
    %134 = arith.addf %133, %132 : vector<8x32xf32>
    %135 = arith.mulf %128, %84 : vector<8x32xf32>
    %136 = arith.mulf %123, %129 : vector<8x32xf32>
    %137 = arith.addf %135, %136 : vector<8x32xf32>
    %138 = math.tanh %137 : vector<8x32xf32>
    %139 = arith.mulf %134, %138 : vector<8x32xf32>
    %cst_37 = arith.constant dense<0.000000e+00> : vector<8x128xf32>
    %140 = tpu.matmul %139, %2, %cst_37 {dimension_numbers = #tpu.dot_dimension_numbers<[1], [0], [0], [1], [0, 0, 1, 1], [], []>} : vector<8x32xf32>, vector<32x128xf32>, vector<8x128xf32> -> vector<8x128xf32>
    %141 = vector.extract_strided_slice %86 {offsets = [0, 256], sizes = [8, 128], strides = [1, 1]} : vector<8x384xf32> to vector<8x128xf32>
    %142 = arith.addf %140, %141 : vector<8x128xf32>
    %143 = arith.addf %142, %83 : vector<8x128xf32>
    %144 = math.tanh %143 : vector<8x128xf32>
    %145 = vector.extract_strided_slice %144 {offsets = [0, 0], sizes = [8, 32], strides = [1, 1]} : vector<8x128xf32> to vector<8x32xf32>
    %146 = vector.broadcast %cst_32 : f32 to vector<8x32xf32>
    %147 = arith.mulf %146, %145 : vector<8x32xf32>
    %148 = vector.broadcast %cst_32 : f32 to vector<8x32xf32>
    %149 = arith.addf %148, %147 : vector<8x32xf32>
    %150 = vector.extract_strided_slice %144 {offsets = [0, 32], sizes = [8, 32], strides = [1, 1]} : vector<8x128xf32> to vector<8x32xf32>
    %151 = vector.broadcast %cst_32 : f32 to vector<8x32xf32>
    %152 = arith.mulf %151, %150 : vector<8x32xf32>
    %153 = vector.broadcast %cst_32 : f32 to vector<8x32xf32>
    %154 = arith.addf %153, %152 : vector<8x32xf32>
    %155 = vector.extract_strided_slice %144 {offsets = [0, 64], sizes = [8, 32], strides = [1, 1]} : vector<8x128xf32> to vector<8x32xf32>
    %156 = vector.extract_strided_slice %144 {offsets = [0, 96], sizes = [8, 32], strides = [1, 1]} : vector<8x128xf32> to vector<8x32xf32>
    %157 = vector.broadcast %cst_32 : f32 to vector<8x32xf32>
    %158 = arith.mulf %157, %156 : vector<8x32xf32>
    %159 = vector.broadcast %cst_32 : f32 to vector<8x32xf32>
    %160 = arith.addf %159, %158 : vector<8x32xf32>
    %161 = arith.mulf %154, %84 : vector<8x32xf32>
    %162 = arith.mulf %149, %155 : vector<8x32xf32>
    %163 = arith.addf %161, %162 : vector<8x32xf32>
    %164 = math.tanh %163 : vector<8x32xf32>
    %165 = arith.mulf %160, %164 : vector<8x32xf32>
    %c1_i32 = arith.constant 1 : i32
    %166 = tpu.concatenate %113, %139, %165 in 1 : vector<8x32xf32>, vector<8x32xf32>, vector<8x32xf32> -> vector<8x96xf32>
    %cst_38 = arith.constant dense<0.000000e+00> : vector<8x384xf32>
    %167 = tpu.matmul %166, %3, %cst_38 {dimension_numbers = #tpu.dot_dimension_numbers<[1], [0], [0], [1], [0, 0, 1, 1], [], []>} : vector<8x96xf32>, vector<96x384xf32>, vector<8x384xf32> -> vector<8x384xf32>
    %168 = arith.index_cast %c1_i32 : i32 to index
    %c0_39 = arith.constant 0 : index
    %c0_40 = arith.constant 0 : index
    %169 = vector.load %arg12[%168, %c0_39, %c0_40] : memref<8x8x128xf32, #tpu.memory_space<vmem>>, vector<1x8x128xf32>
    %170 = vector.shape_cast %169 : vector<1x8x128xf32> to vector<8x128xf32>
    %171 = vector.extract_strided_slice %167 {offsets = [0, 0], sizes = [8, 128], strides = [1, 1]} : vector<8x384xf32> to vector<8x128xf32>
    %172 = arith.addf %170, %171 : vector<8x128xf32>
    %173 = math.tanh %172 : vector<8x128xf32>
    %174 = vector.extract_strided_slice %173 {offsets = [0, 0], sizes = [8, 32], strides = [1, 1]} : vector<8x128xf32> to vector<8x32xf32>
    %175 = vector.broadcast %cst_32 : f32 to vector<8x32xf32>
    %176 = arith.mulf %175, %174 : vector<8x32xf32>
    %177 = vector.broadcast %cst_32 : f32 to vector<8x32xf32>
    %178 = arith.addf %177, %176 : vector<8x32xf32>
    %179 = vector.extract_strided_slice %173 {offsets = [0, 32], sizes = [8, 32], strides = [1, 1]} : vector<8x128xf32> to vector<8x32xf32>
    %180 = vector.broadcast %cst_32 : f32 to vector<8x32xf32>
    %181 = arith.mulf %180, %179 : vector<8x32xf32>
    %182 = vector.broadcast %cst_32 : f32 to vector<8x32xf32>
    %183 = arith.addf %182, %181 : vector<8x32xf32>
    %184 = vector.extract_strided_slice %173 {offsets = [0, 64], sizes = [8, 32], strides = [1, 1]} : vector<8x128xf32> to vector<8x32xf32>
    %185 = vector.extract_strided_slice %173 {offsets = [0, 96], sizes = [8, 32], strides = [1, 1]} : vector<8x128xf32> to vector<8x32xf32>
    %186 = vector.broadcast %cst_32 : f32 to vector<8x32xf32>
    %187 = arith.mulf %186, %185 : vector<8x32xf32>
    %188 = vector.broadcast %cst_32 : f32 to vector<8x32xf32>
    %189 = arith.addf %188, %187 : vector<8x32xf32>
    %190 = arith.mulf %183, %111 : vector<8x32xf32>
    %191 = arith.mulf %178, %184 : vector<8x32xf32>
    %192 = arith.addf %190, %191 : vector<8x32xf32>
    %193 = math.tanh %192 : vector<8x32xf32>
    %194 = arith.mulf %189, %193 : vector<8x32xf32>
    %cst_41 = arith.constant dense<0.000000e+00> : vector<8x128xf32>
    %195 = tpu.matmul %194, %1, %cst_41 {dimension_numbers = #tpu.dot_dimension_numbers<[1], [0], [0], [1], [0, 0, 1, 1], [], []>} : vector<8x32xf32>, vector<32x128xf32>, vector<8x128xf32> -> vector<8x128xf32>
    %196 = vector.extract_strided_slice %167 {offsets = [0, 128], sizes = [8, 128], strides = [1, 1]} : vector<8x384xf32> to vector<8x128xf32>
    %197 = arith.addf %195, %196 : vector<8x128xf32>
    %198 = arith.addf %197, %80 : vector<8x128xf32>
    %199 = math.tanh %198 : vector<8x128xf32>
    %200 = vector.extract_strided_slice %199 {offsets = [0, 0], sizes = [8, 32], strides = [1, 1]} : vector<8x128xf32> to vector<8x32xf32>
    %201 = vector.broadcast %cst_32 : f32 to vector<8x32xf32>
    %202 = arith.mulf %201, %200 : vector<8x32xf32>
    %203 = vector.broadcast %cst_32 : f32 to vector<8x32xf32>
    %204 = arith.addf %203, %202 : vector<8x32xf32>
    %205 = vector.extract_strided_slice %199 {offsets = [0, 32], sizes = [8, 32], strides = [1, 1]} : vector<8x128xf32> to vector<8x32xf32>
    %206 = vector.broadcast %cst_32 : f32 to vector<8x32xf32>
    %207 = arith.mulf %206, %205 : vector<8x32xf32>
    %208 = vector.broadcast %cst_32 : f32 to vector<8x32xf32>
    %209 = arith.addf %208, %207 : vector<8x32xf32>
    %210 = vector.extract_strided_slice %199 {offsets = [0, 64], sizes = [8, 32], strides = [1, 1]} : vector<8x128xf32> to vector<8x32xf32>
    %211 = vector.extract_strided_slice %199 {offsets = [0, 96], sizes = [8, 32], strides = [1, 1]} : vector<8x128xf32> to vector<8x32xf32>
    %212 = vector.broadcast %cst_32 : f32 to vector<8x32xf32>
    %213 = arith.mulf %212, %211 : vector<8x32xf32>
    %214 = vector.broadcast %cst_32 : f32 to vector<8x32xf32>
    %215 = arith.addf %214, %213 : vector<8x32xf32>
    %216 = arith.mulf %209, %137 : vector<8x32xf32>
    %217 = arith.mulf %204, %210 : vector<8x32xf32>
    %218 = arith.addf %216, %217 : vector<8x32xf32>
    %219 = math.tanh %218 : vector<8x32xf32>
    %220 = arith.mulf %215, %219 : vector<8x32xf32>
    %cst_42 = arith.constant dense<0.000000e+00> : vector<8x128xf32>
    %221 = tpu.matmul %220, %2, %cst_42 {dimension_numbers = #tpu.dot_dimension_numbers<[1], [0], [0], [1], [0, 0, 1, 1], [], []>} : vector<8x32xf32>, vector<32x128xf32>, vector<8x128xf32> -> vector<8x128xf32>
    %222 = vector.extract_strided_slice %167 {offsets = [0, 256], sizes = [8, 128], strides = [1, 1]} : vector<8x384xf32> to vector<8x128xf32>
    %223 = arith.addf %221, %222 : vector<8x128xf32>
    %224 = arith.addf %223, %83 : vector<8x128xf32>
    %225 = math.tanh %224 : vector<8x128xf32>
    %226 = vector.extract_strided_slice %225 {offsets = [0, 0], sizes = [8, 32], strides = [1, 1]} : vector<8x128xf32> to vector<8x32xf32>
    %227 = vector.broadcast %cst_32 : f32 to vector<8x32xf32>
    %228 = arith.mulf %227, %226 : vector<8x32xf32>
    %229 = vector.broadcast %cst_32 : f32 to vector<8x32xf32>
    %230 = arith.addf %229, %228 : vector<8x32xf32>
    %231 = vector.extract_strided_slice %225 {offsets = [0, 32], sizes = [8, 32], strides = [1, 1]} : vector<8x128xf32> to vector<8x32xf32>
    %232 = vector.broadcast %cst_32 : f32 to vector<8x32xf32>
    %233 = arith.mulf %232, %231 : vector<8x32xf32>
    %234 = vector.broadcast %cst_32 : f32 to vector<8x32xf32>
    %235 = arith.addf %234, %233 : vector<8x32xf32>
    %236 = vector.extract_strided_slice %225 {offsets = [0, 64], sizes = [8, 32], strides = [1, 1]} : vector<8x128xf32> to vector<8x32xf32>
    %237 = vector.extract_strided_slice %225 {offsets = [0, 96], sizes = [8, 32], strides = [1, 1]} : vector<8x128xf32> to vector<8x32xf32>
    %238 = vector.broadcast %cst_32 : f32 to vector<8x32xf32>
    %239 = arith.mulf %238, %237 : vector<8x32xf32>
    %240 = vector.broadcast %cst_32 : f32 to vector<8x32xf32>
    %241 = arith.addf %240, %239 : vector<8x32xf32>
    %242 = arith.mulf %235, %163 : vector<8x32xf32>
    %243 = arith.mulf %230, %236 : vector<8x32xf32>
    %244 = arith.addf %242, %243 : vector<8x32xf32>
    %245 = math.tanh %244 : vector<8x32xf32>
    %246 = arith.mulf %241, %245 : vector<8x32xf32>
    %c2_i32 = arith.constant 2 : i32
    %247 = tpu.concatenate %194, %220, %246 in 1 : vector<8x32xf32>, vector<8x32xf32>, vector<8x32xf32> -> vector<8x96xf32>
    %cst_43 = arith.constant dense<0.000000e+00> : vector<8x384xf32>
    %248 = tpu.matmul %247, %3, %cst_43 {dimension_numbers = #tpu.dot_dimension_numbers<[1], [0], [0], [1], [0, 0, 1, 1], [], []>} : vector<8x96xf32>, vector<96x384xf32>, vector<8x384xf32> -> vector<8x384xf32>
    %249 = arith.index_cast %c2_i32 : i32 to index
    %c0_44 = arith.constant 0 : index
    %c0_45 = arith.constant 0 : index
    %250 = vector.load %arg12[%249, %c0_44, %c0_45] : memref<8x8x128xf32, #tpu.memory_space<vmem>>, vector<1x8x128xf32>
    %251 = vector.shape_cast %250 : vector<1x8x128xf32> to vector<8x128xf32>
    %252 = vector.extract_strided_slice %248 {offsets = [0, 0], sizes = [8, 128], strides = [1, 1]} : vector<8x384xf32> to vector<8x128xf32>
    %253 = arith.addf %251, %252 : vector<8x128xf32>
    %254 = math.tanh %253 : vector<8x128xf32>
    %255 = vector.extract_strided_slice %254 {offsets = [0, 0], sizes = [8, 32], strides = [1, 1]} : vector<8x128xf32> to vector<8x32xf32>
    %256 = vector.broadcast %cst_32 : f32 to vector<8x32xf32>
    %257 = arith.mulf %256, %255 : vector<8x32xf32>
    %258 = vector.broadcast %cst_32 : f32 to vector<8x32xf32>
    %259 = arith.addf %258, %257 : vector<8x32xf32>
    %260 = vector.extract_strided_slice %254 {offsets = [0, 32], sizes = [8, 32], strides = [1, 1]} : vector<8x128xf32> to vector<8x32xf32>
    %261 = vector.broadcast %cst_32 : f32 to vector<8x32xf32>
    %262 = arith.mulf %261, %260 : vector<8x32xf32>
    %263 = vector.broadcast %cst_32 : f32 to vector<8x32xf32>
    %264 = arith.addf %263, %262 : vector<8x32xf32>
    %265 = vector.extract_strided_slice %254 {offsets = [0, 64], sizes = [8, 32], strides = [1, 1]} : vector<8x128xf32> to vector<8x32xf32>
    %266 = vector.extract_strided_slice %254 {offsets = [0, 96], sizes = [8, 32], strides = [1, 1]} : vector<8x128xf32> to vector<8x32xf32>
    %267 = vector.broadcast %cst_32 : f32 to vector<8x32xf32>
    %268 = arith.mulf %267, %266 : vector<8x32xf32>
    %269 = vector.broadcast %cst_32 : f32 to vector<8x32xf32>
    %270 = arith.addf %269, %268 : vector<8x32xf32>
    %271 = arith.mulf %264, %192 : vector<8x32xf32>
    %272 = arith.mulf %259, %265 : vector<8x32xf32>
    %273 = arith.addf %271, %272 : vector<8x32xf32>
    %274 = math.tanh %273 : vector<8x32xf32>
    %275 = arith.mulf %270, %274 : vector<8x32xf32>
    %cst_46 = arith.constant dense<0.000000e+00> : vector<8x128xf32>
    %276 = tpu.matmul %275, %1, %cst_46 {dimension_numbers = #tpu.dot_dimension_numbers<[1], [0], [0], [1], [0, 0, 1, 1], [], []>} : vector<8x32xf32>, vector<32x128xf32>, vector<8x128xf32> -> vector<8x128xf32>
    %277 = vector.extract_strided_slice %248 {offsets = [0, 128], sizes = [8, 128], strides = [1, 1]} : vector<8x384xf32> to vector<8x128xf32>
    %278 = arith.addf %276, %277 : vector<8x128xf32>
    %279 = arith.addf %278, %80 : vector<8x128xf32>
    %280 = math.tanh %279 : vector<8x128xf32>
    %281 = vector.extract_strided_slice %280 {offsets = [0, 0], sizes = [8, 32], strides = [1, 1]} : vector<8x128xf32> to vector<8x32xf32>
    %282 = vector.broadcast %cst_32 : f32 to vector<8x32xf32>
    %283 = arith.mulf %282, %281 : vector<8x32xf32>
    %284 = vector.broadcast %cst_32 : f32 to vector<8x32xf32>
    %285 = arith.addf %284, %283 : vector<8x32xf32>
    %286 = vector.extract_strided_slice %280 {offsets = [0, 32], sizes = [8, 32], strides = [1, 1]} : vector<8x128xf32> to vector<8x32xf32>
    %287 = vector.broadcast %cst_32 : f32 to vector<8x32xf32>
    %288 = arith.mulf %287, %286 : vector<8x32xf32>
    %289 = vector.broadcast %cst_32 : f32 to vector<8x32xf32>
    %290 = arith.addf %289, %288 : vector<8x32xf32>
    %291 = vector.extract_strided_slice %280 {offsets = [0, 64], sizes = [8, 32], strides = [1, 1]} : vector<8x128xf32> to vector<8x32xf32>
    %292 = vector.extract_strided_slice %280 {offsets = [0, 96], sizes = [8, 32], strides = [1, 1]} : vector<8x128xf32> to vector<8x32xf32>
    %293 = vector.broadcast %cst_32 : f32 to vector<8x32xf32>
    %294 = arith.mulf %293, %292 : vector<8x32xf32>
    %295 = vector.broadcast %cst_32 : f32 to vector<8x32xf32>
    %296 = arith.addf %295, %294 : vector<8x32xf32>
    %297 = arith.mulf %290, %218 : vector<8x32xf32>
    %298 = arith.mulf %285, %291 : vector<8x32xf32>
    %299 = arith.addf %297, %298 : vector<8x32xf32>
    %300 = math.tanh %299 : vector<8x32xf32>
    %301 = arith.mulf %296, %300 : vector<8x32xf32>
    %cst_47 = arith.constant dense<0.000000e+00> : vector<8x128xf32>
    %302 = tpu.matmul %301, %2, %cst_47 {dimension_numbers = #tpu.dot_dimension_numbers<[1], [0], [0], [1], [0, 0, 1, 1], [], []>} : vector<8x32xf32>, vector<32x128xf32>, vector<8x128xf32> -> vector<8x128xf32>
    %303 = vector.extract_strided_slice %248 {offsets = [0, 256], sizes = [8, 128], strides = [1, 1]} : vector<8x384xf32> to vector<8x128xf32>
    %304 = arith.addf %302, %303 : vector<8x128xf32>
    %305 = arith.addf %304, %83 : vector<8x128xf32>
    %306 = math.tanh %305 : vector<8x128xf32>
    %307 = vector.extract_strided_slice %306 {offsets = [0, 0], sizes = [8, 32], strides = [1, 1]} : vector<8x128xf32> to vector<8x32xf32>
    %308 = vector.broadcast %cst_32 : f32 to vector<8x32xf32>
    %309 = arith.mulf %308, %307 : vector<8x32xf32>
    %310 = vector.broadcast %cst_32 : f32 to vector<8x32xf32>
    %311 = arith.addf %310, %309 : vector<8x32xf32>
    %312 = vector.extract_strided_slice %306 {offsets = [0, 32], sizes = [8, 32], strides = [1, 1]} : vector<8x128xf32> to vector<8x32xf32>
    %313 = vector.broadcast %cst_32 : f32 to vector<8x32xf32>
    %314 = arith.mulf %313, %312 : vector<8x32xf32>
    %315 = vector.broadcast %cst_32 : f32 to vector<8x32xf32>
    %316 = arith.addf %315, %314 : vector<8x32xf32>
    %317 = vector.extract_strided_slice %306 {offsets = [0, 64], sizes = [8, 32], strides = [1, 1]} : vector<8x128xf32> to vector<8x32xf32>
    %318 = vector.extract_strided_slice %306 {offsets = [0, 96], sizes = [8, 32], strides = [1, 1]} : vector<8x128xf32> to vector<8x32xf32>
    %319 = vector.broadcast %cst_32 : f32 to vector<8x32xf32>
    %320 = arith.mulf %319, %318 : vector<8x32xf32>
    %321 = vector.broadcast %cst_32 : f32 to vector<8x32xf32>
    %322 = arith.addf %321, %320 : vector<8x32xf32>
    %323 = arith.mulf %316, %244 : vector<8x32xf32>
    %324 = arith.mulf %311, %317 : vector<8x32xf32>
    %325 = arith.addf %323, %324 : vector<8x32xf32>
    %326 = math.tanh %325 : vector<8x32xf32>
    %327 = arith.mulf %322, %326 : vector<8x32xf32>
    %c3_i32 = arith.constant 3 : i32
    %328 = tpu.concatenate %275, %301, %327 in 1 : vector<8x32xf32>, vector<8x32xf32>, vector<8x32xf32> -> vector<8x96xf32>
    %cst_48 = arith.constant dense<0.000000e+00> : vector<8x384xf32>
    %329 = tpu.matmul %328, %3, %cst_48 {dimension_numbers = #tpu.dot_dimension_numbers<[1], [0], [0], [1], [0, 0, 1, 1], [], []>} : vector<8x96xf32>, vector<96x384xf32>, vector<8x384xf32> -> vector<8x384xf32>
    %330 = arith.index_cast %c3_i32 : i32 to index
    %c0_49 = arith.constant 0 : index
    %c0_50 = arith.constant 0 : index
    %331 = vector.load %arg12[%330, %c0_49, %c0_50] : memref<8x8x128xf32, #tpu.memory_space<vmem>>, vector<1x8x128xf32>
    %332 = vector.shape_cast %331 : vector<1x8x128xf32> to vector<8x128xf32>
    %333 = vector.extract_strided_slice %329 {offsets = [0, 0], sizes = [8, 128], strides = [1, 1]} : vector<8x384xf32> to vector<8x128xf32>
    %334 = arith.addf %332, %333 : vector<8x128xf32>
    %335 = math.tanh %334 : vector<8x128xf32>
    %336 = vector.extract_strided_slice %335 {offsets = [0, 0], sizes = [8, 32], strides = [1, 1]} : vector<8x128xf32> to vector<8x32xf32>
    %337 = vector.broadcast %cst_32 : f32 to vector<8x32xf32>
    %338 = arith.mulf %337, %336 : vector<8x32xf32>
    %339 = vector.broadcast %cst_32 : f32 to vector<8x32xf32>
    %340 = arith.addf %339, %338 : vector<8x32xf32>
    %341 = vector.extract_strided_slice %335 {offsets = [0, 32], sizes = [8, 32], strides = [1, 1]} : vector<8x128xf32> to vector<8x32xf32>
    %342 = vector.broadcast %cst_32 : f32 to vector<8x32xf32>
    %343 = arith.mulf %342, %341 : vector<8x32xf32>
    %344 = vector.broadcast %cst_32 : f32 to vector<8x32xf32>
    %345 = arith.addf %344, %343 : vector<8x32xf32>
    %346 = vector.extract_strided_slice %335 {offsets = [0, 64], sizes = [8, 32], strides = [1, 1]} : vector<8x128xf32> to vector<8x32xf32>
    %347 = vector.extract_strided_slice %335 {offsets = [0, 96], sizes = [8, 32], strides = [1, 1]} : vector<8x128xf32> to vector<8x32xf32>
    %348 = vector.broadcast %cst_32 : f32 to vector<8x32xf32>
    %349 = arith.mulf %348, %347 : vector<8x32xf32>
    %350 = vector.broadcast %cst_32 : f32 to vector<8x32xf32>
    %351 = arith.addf %350, %349 : vector<8x32xf32>
    %352 = arith.mulf %345, %273 : vector<8x32xf32>
    %353 = arith.mulf %340, %346 : vector<8x32xf32>
    %354 = arith.addf %352, %353 : vector<8x32xf32>
    %355 = math.tanh %354 : vector<8x32xf32>
    %356 = arith.mulf %351, %355 : vector<8x32xf32>
    %cst_51 = arith.constant dense<0.000000e+00> : vector<8x128xf32>
    %357 = tpu.matmul %356, %1, %cst_51 {dimension_numbers = #tpu.dot_dimension_numbers<[1], [0], [0], [1], [0, 0, 1, 1], [], []>} : vector<8x32xf32>, vector<32x128xf32>, vector<8x128xf32> -> vector<8x128xf32>
    %358 = vector.extract_strided_slice %329 {offsets = [0, 128], sizes = [8, 128], strides = [1, 1]} : vector<8x384xf32> to vector<8x128xf32>
    %359 = arith.addf %357, %358 : vector<8x128xf32>
    %360 = arith.addf %359, %80 : vector<8x128xf32>
    %361 = math.tanh %360 : vector<8x128xf32>
    %362 = vector.extract_strided_slice %361 {offsets = [0, 0], sizes = [8, 32], strides = [1, 1]} : vector<8x128xf32> to vector<8x32xf32>
    %363 = vector.broadcast %cst_32 : f32 to vector<8x32xf32>
    %364 = arith.mulf %363, %362 : vector<8x32xf32>
    %365 = vector.broadcast %cst_32 : f32 to vector<8x32xf32>
    %366 = arith.addf %365, %364 : vector<8x32xf32>
    %367 = vector.extract_strided_slice %361 {offsets = [0, 32], sizes = [8, 32], strides = [1, 1]} : vector<8x128xf32> to vector<8x32xf32>
    %368 = vector.broadcast %cst_32 : f32 to vector<8x32xf32>
    %369 = arith.mulf %368, %367 : vector<8x32xf32>
    %370 = vector.broadcast %cst_32 : f32 to vector<8x32xf32>
    %371 = arith.addf %370, %369 : vector<8x32xf32>
    %372 = vector.extract_strided_slice %361 {offsets = [0, 64], sizes = [8, 32], strides = [1, 1]} : vector<8x128xf32> to vector<8x32xf32>
    %373 = vector.extract_strided_slice %361 {offsets = [0, 96], sizes = [8, 32], strides = [1, 1]} : vector<8x128xf32> to vector<8x32xf32>
    %374 = vector.broadcast %cst_32 : f32 to vector<8x32xf32>
    %375 = arith.mulf %374, %373 : vector<8x32xf32>
    %376 = vector.broadcast %cst_32 : f32 to vector<8x32xf32>
    %377 = arith.addf %376, %375 : vector<8x32xf32>
    %378 = arith.mulf %371, %299 : vector<8x32xf32>
    %379 = arith.mulf %366, %372 : vector<8x32xf32>
    %380 = arith.addf %378, %379 : vector<8x32xf32>
    %381 = math.tanh %380 : vector<8x32xf32>
    %382 = arith.mulf %377, %381 : vector<8x32xf32>
    %cst_52 = arith.constant dense<0.000000e+00> : vector<8x128xf32>
    %383 = tpu.matmul %382, %2, %cst_52 {dimension_numbers = #tpu.dot_dimension_numbers<[1], [0], [0], [1], [0, 0, 1, 1], [], []>} : vector<8x32xf32>, vector<32x128xf32>, vector<8x128xf32> -> vector<8x128xf32>
    %384 = vector.extract_strided_slice %329 {offsets = [0, 256], sizes = [8, 128], strides = [1, 1]} : vector<8x384xf32> to vector<8x128xf32>
    %385 = arith.addf %383, %384 : vector<8x128xf32>
    %386 = arith.addf %385, %83 : vector<8x128xf32>
    %387 = math.tanh %386 : vector<8x128xf32>
    %388 = vector.extract_strided_slice %387 {offsets = [0, 0], sizes = [8, 32], strides = [1, 1]} : vector<8x128xf32> to vector<8x32xf32>
    %389 = vector.broadcast %cst_32 : f32 to vector<8x32xf32>
    %390 = arith.mulf %389, %388 : vector<8x32xf32>
    %391 = vector.broadcast %cst_32 : f32 to vector<8x32xf32>
    %392 = arith.addf %391, %390 : vector<8x32xf32>
    %393 = vector.extract_strided_slice %387 {offsets = [0, 32], sizes = [8, 32], strides = [1, 1]} : vector<8x128xf32> to vector<8x32xf32>
    %394 = vector.broadcast %cst_32 : f32 to vector<8x32xf32>
    %395 = arith.mulf %394, %393 : vector<8x32xf32>
    %396 = vector.broadcast %cst_32 : f32 to vector<8x32xf32>
    %397 = arith.addf %396, %395 : vector<8x32xf32>
    %398 = vector.extract_strided_slice %387 {offsets = [0, 64], sizes = [8, 32], strides = [1, 1]} : vector<8x128xf32> to vector<8x32xf32>
    %399 = vector.extract_strided_slice %387 {offsets = [0, 96], sizes = [8, 32], strides = [1, 1]} : vector<8x128xf32> to vector<8x32xf32>
    %400 = vector.broadcast %cst_32 : f32 to vector<8x32xf32>
    %401 = arith.mulf %400, %399 : vector<8x32xf32>
    %402 = vector.broadcast %cst_32 : f32 to vector<8x32xf32>
    %403 = arith.addf %402, %401 : vector<8x32xf32>
    %404 = arith.mulf %397, %325 : vector<8x32xf32>
    %405 = arith.mulf %392, %398 : vector<8x32xf32>
    %406 = arith.addf %404, %405 : vector<8x32xf32>
    %407 = math.tanh %406 : vector<8x32xf32>
    %408 = arith.mulf %403, %407 : vector<8x32xf32>
    %c4_i32 = arith.constant 4 : i32
    %409 = tpu.concatenate %356, %382, %408 in 1 : vector<8x32xf32>, vector<8x32xf32>, vector<8x32xf32> -> vector<8x96xf32>
    %cst_53 = arith.constant dense<0.000000e+00> : vector<8x384xf32>
    %410 = tpu.matmul %409, %3, %cst_53 {dimension_numbers = #tpu.dot_dimension_numbers<[1], [0], [0], [1], [0, 0, 1, 1], [], []>} : vector<8x96xf32>, vector<96x384xf32>, vector<8x384xf32> -> vector<8x384xf32>
    %411 = arith.index_cast %c4_i32 : i32 to index
    %c0_54 = arith.constant 0 : index
    %c0_55 = arith.constant 0 : index
    %412 = vector.load %arg12[%411, %c0_54, %c0_55] : memref<8x8x128xf32, #tpu.memory_space<vmem>>, vector<1x8x128xf32>
    %413 = vector.shape_cast %412 : vector<1x8x128xf32> to vector<8x128xf32>
    %414 = vector.extract_strided_slice %410 {offsets = [0, 0], sizes = [8, 128], strides = [1, 1]} : vector<8x384xf32> to vector<8x128xf32>
    %415 = arith.addf %413, %414 : vector<8x128xf32>
    %416 = math.tanh %415 : vector<8x128xf32>
    %417 = vector.extract_strided_slice %416 {offsets = [0, 0], sizes = [8, 32], strides = [1, 1]} : vector<8x128xf32> to vector<8x32xf32>
    %418 = vector.broadcast %cst_32 : f32 to vector<8x32xf32>
    %419 = arith.mulf %418, %417 : vector<8x32xf32>
    %420 = vector.broadcast %cst_32 : f32 to vector<8x32xf32>
    %421 = arith.addf %420, %419 : vector<8x32xf32>
    %422 = vector.extract_strided_slice %416 {offsets = [0, 32], sizes = [8, 32], strides = [1, 1]} : vector<8x128xf32> to vector<8x32xf32>
    %423 = vector.broadcast %cst_32 : f32 to vector<8x32xf32>
    %424 = arith.mulf %423, %422 : vector<8x32xf32>
    %425 = vector.broadcast %cst_32 : f32 to vector<8x32xf32>
    %426 = arith.addf %425, %424 : vector<8x32xf32>
    %427 = vector.extract_strided_slice %416 {offsets = [0, 64], sizes = [8, 32], strides = [1, 1]} : vector<8x128xf32> to vector<8x32xf32>
    %428 = vector.extract_strided_slice %416 {offsets = [0, 96], sizes = [8, 32], strides = [1, 1]} : vector<8x128xf32> to vector<8x32xf32>
    %429 = vector.broadcast %cst_32 : f32 to vector<8x32xf32>
    %430 = arith.mulf %429, %428 : vector<8x32xf32>
    %431 = vector.broadcast %cst_32 : f32 to vector<8x32xf32>
    %432 = arith.addf %431, %430 : vector<8x32xf32>
    %433 = arith.mulf %426, %354 : vector<8x32xf32>
    %434 = arith.mulf %421, %427 : vector<8x32xf32>
    %435 = arith.addf %433, %434 : vector<8x32xf32>
    %436 = math.tanh %435 : vector<8x32xf32>
    %437 = arith.mulf %432, %436 : vector<8x32xf32>
    %cst_56 = arith.constant dense<0.000000e+00> : vector<8x128xf32>
    %438 = tpu.matmul %437, %1, %cst_56 {dimension_numbers = #tpu.dot_dimension_numbers<[1], [0], [0], [1], [0, 0, 1, 1], [], []>} : vector<8x32xf32>, vector<32x128xf32>, vector<8x128xf32> -> vector<8x128xf32>
    %439 = vector.extract_strided_slice %410 {offsets = [0, 128], sizes = [8, 128], strides = [1, 1]} : vector<8x384xf32> to vector<8x128xf32>
    %440 = arith.addf %438, %439 : vector<8x128xf32>
    %441 = arith.addf %440, %80 : vector<8x128xf32>
    %442 = math.tanh %441 : vector<8x128xf32>
    %443 = vector.extract_strided_slice %442 {offsets = [0, 0], sizes = [8, 32], strides = [1, 1]} : vector<8x128xf32> to vector<8x32xf32>
    %444 = vector.broadcast %cst_32 : f32 to vector<8x32xf32>
    %445 = arith.mulf %444, %443 : vector<8x32xf32>
    %446 = vector.broadcast %cst_32 : f32 to vector<8x32xf32>
    %447 = arith.addf %446, %445 : vector<8x32xf32>
    %448 = vector.extract_strided_slice %442 {offsets = [0, 32], sizes = [8, 32], strides = [1, 1]} : vector<8x128xf32> to vector<8x32xf32>
    %449 = vector.broadcast %cst_32 : f32 to vector<8x32xf32>
    %450 = arith.mulf %449, %448 : vector<8x32xf32>
    %451 = vector.broadcast %cst_32 : f32 to vector<8x32xf32>
    %452 = arith.addf %451, %450 : vector<8x32xf32>
    %453 = vector.extract_strided_slice %442 {offsets = [0, 64], sizes = [8, 32], strides = [1, 1]} : vector<8x128xf32> to vector<8x32xf32>
    %454 = vector.extract_strided_slice %442 {offsets = [0, 96], sizes = [8, 32], strides = [1, 1]} : vector<8x128xf32> to vector<8x32xf32>
    %455 = vector.broadcast %cst_32 : f32 to vector<8x32xf32>
    %456 = arith.mulf %455, %454 : vector<8x32xf32>
    %457 = vector.broadcast %cst_32 : f32 to vector<8x32xf32>
    %458 = arith.addf %457, %456 : vector<8x32xf32>
    %459 = arith.mulf %452, %380 : vector<8x32xf32>
    %460 = arith.mulf %447, %453 : vector<8x32xf32>
    %461 = arith.addf %459, %460 : vector<8x32xf32>
    %462 = math.tanh %461 : vector<8x32xf32>
    %463 = arith.mulf %458, %462 : vector<8x32xf32>
    %cst_57 = arith.constant dense<0.000000e+00> : vector<8x128xf32>
    %464 = tpu.matmul %463, %2, %cst_57 {dimension_numbers = #tpu.dot_dimension_numbers<[1], [0], [0], [1], [0, 0, 1, 1], [], []>} : vector<8x32xf32>, vector<32x128xf32>, vector<8x128xf32> -> vector<8x128xf32>
    %465 = vector.extract_strided_slice %410 {offsets = [0, 256], sizes = [8, 128], strides = [1, 1]} : vector<8x384xf32> to vector<8x128xf32>
    %466 = arith.addf %464, %465 : vector<8x128xf32>
    %467 = arith.addf %466, %83 : vector<8x128xf32>
    %468 = math.tanh %467 : vector<8x128xf32>
    %469 = vector.extract_strided_slice %468 {offsets = [0, 0], sizes = [8, 32], strides = [1, 1]} : vector<8x128xf32> to vector<8x32xf32>
    %470 = vector.broadcast %cst_32 : f32 to vector<8x32xf32>
    %471 = arith.mulf %470, %469 : vector<8x32xf32>
    %472 = vector.broadcast %cst_32 : f32 to vector<8x32xf32>
    %473 = arith.addf %472, %471 : vector<8x32xf32>
    %474 = vector.extract_strided_slice %468 {offsets = [0, 32], sizes = [8, 32], strides = [1, 1]} : vector<8x128xf32> to vector<8x32xf32>
    %475 = vector.broadcast %cst_32 : f32 to vector<8x32xf32>
    %476 = arith.mulf %475, %474 : vector<8x32xf32>
    %477 = vector.broadcast %cst_32 : f32 to vector<8x32xf32>
    %478 = arith.addf %477, %476 : vector<8x32xf32>
    %479 = vector.extract_strided_slice %468 {offsets = [0, 64], sizes = [8, 32], strides = [1, 1]} : vector<8x128xf32> to vector<8x32xf32>
    %480 = vector.extract_strided_slice %468 {offsets = [0, 96], sizes = [8, 32], strides = [1, 1]} : vector<8x128xf32> to vector<8x32xf32>
    %481 = vector.broadcast %cst_32 : f32 to vector<8x32xf32>
    %482 = arith.mulf %481, %480 : vector<8x32xf32>
    %483 = vector.broadcast %cst_32 : f32 to vector<8x32xf32>
    %484 = arith.addf %483, %482 : vector<8x32xf32>
    %485 = arith.mulf %478, %406 : vector<8x32xf32>
    %486 = arith.mulf %473, %479 : vector<8x32xf32>
    %487 = arith.addf %485, %486 : vector<8x32xf32>
    %488 = math.tanh %487 : vector<8x32xf32>
    %489 = arith.mulf %484, %488 : vector<8x32xf32>
    %c5_i32 = arith.constant 5 : i32
    %490 = tpu.concatenate %437, %463, %489 in 1 : vector<8x32xf32>, vector<8x32xf32>, vector<8x32xf32> -> vector<8x96xf32>
    %cst_58 = arith.constant dense<0.000000e+00> : vector<8x384xf32>
    %491 = tpu.matmul %490, %3, %cst_58 {dimension_numbers = #tpu.dot_dimension_numbers<[1], [0], [0], [1], [0, 0, 1, 1], [], []>} : vector<8x96xf32>, vector<96x384xf32>, vector<8x384xf32> -> vector<8x384xf32>
    %492 = arith.index_cast %c5_i32 : i32 to index
    %c0_59 = arith.constant 0 : index
    %c0_60 = arith.constant 0 : index
    %493 = vector.load %arg12[%492, %c0_59, %c0_60] : memref<8x8x128xf32, #tpu.memory_space<vmem>>, vector<1x8x128xf32>
    %494 = vector.shape_cast %493 : vector<1x8x128xf32> to vector<8x128xf32>
    %495 = vector.extract_strided_slice %491 {offsets = [0, 0], sizes = [8, 128], strides = [1, 1]} : vector<8x384xf32> to vector<8x128xf32>
    %496 = arith.addf %494, %495 : vector<8x128xf32>
    %497 = math.tanh %496 : vector<8x128xf32>
    %498 = vector.extract_strided_slice %497 {offsets = [0, 0], sizes = [8, 32], strides = [1, 1]} : vector<8x128xf32> to vector<8x32xf32>
    %499 = vector.broadcast %cst_32 : f32 to vector<8x32xf32>
    %500 = arith.mulf %499, %498 : vector<8x32xf32>
    %501 = vector.broadcast %cst_32 : f32 to vector<8x32xf32>
    %502 = arith.addf %501, %500 : vector<8x32xf32>
    %503 = vector.extract_strided_slice %497 {offsets = [0, 32], sizes = [8, 32], strides = [1, 1]} : vector<8x128xf32> to vector<8x32xf32>
    %504 = vector.broadcast %cst_32 : f32 to vector<8x32xf32>
    %505 = arith.mulf %504, %503 : vector<8x32xf32>
    %506 = vector.broadcast %cst_32 : f32 to vector<8x32xf32>
    %507 = arith.addf %506, %505 : vector<8x32xf32>
    %508 = vector.extract_strided_slice %497 {offsets = [0, 64], sizes = [8, 32], strides = [1, 1]} : vector<8x128xf32> to vector<8x32xf32>
    %509 = vector.extract_strided_slice %497 {offsets = [0, 96], sizes = [8, 32], strides = [1, 1]} : vector<8x128xf32> to vector<8x32xf32>
    %510 = vector.broadcast %cst_32 : f32 to vector<8x32xf32>
    %511 = arith.mulf %510, %509 : vector<8x32xf32>
    %512 = vector.broadcast %cst_32 : f32 to vector<8x32xf32>
    %513 = arith.addf %512, %511 : vector<8x32xf32>
    %514 = arith.mulf %507, %435 : vector<8x32xf32>
    %515 = arith.mulf %502, %508 : vector<8x32xf32>
    %516 = arith.addf %514, %515 : vector<8x32xf32>
    %517 = math.tanh %516 : vector<8x32xf32>
    %518 = arith.mulf %513, %517 : vector<8x32xf32>
    %cst_61 = arith.constant dense<0.000000e+00> : vector<8x128xf32>
    %519 = tpu.matmul %518, %1, %cst_61 {dimension_numbers = #tpu.dot_dimension_numbers<[1], [0], [0], [1], [0, 0, 1, 1], [], []>} : vector<8x32xf32>, vector<32x128xf32>, vector<8x128xf32> -> vector<8x128xf32>
    %520 = vector.extract_strided_slice %491 {offsets = [0, 128], sizes = [8, 128], strides = [1, 1]} : vector<8x384xf32> to vector<8x128xf32>
    %521 = arith.addf %519, %520 : vector<8x128xf32>
    %522 = arith.addf %521, %80 : vector<8x128xf32>
    %523 = math.tanh %522 : vector<8x128xf32>
    %524 = vector.extract_strided_slice %523 {offsets = [0, 0], sizes = [8, 32], strides = [1, 1]} : vector<8x128xf32> to vector<8x32xf32>
    %525 = vector.broadcast %cst_32 : f32 to vector<8x32xf32>
    %526 = arith.mulf %525, %524 : vector<8x32xf32>
    %527 = vector.broadcast %cst_32 : f32 to vector<8x32xf32>
    %528 = arith.addf %527, %526 : vector<8x32xf32>
    %529 = vector.extract_strided_slice %523 {offsets = [0, 32], sizes = [8, 32], strides = [1, 1]} : vector<8x128xf32> to vector<8x32xf32>
    %530 = vector.broadcast %cst_32 : f32 to vector<8x32xf32>
    %531 = arith.mulf %530, %529 : vector<8x32xf32>
    %532 = vector.broadcast %cst_32 : f32 to vector<8x32xf32>
    %533 = arith.addf %532, %531 : vector<8x32xf32>
    %534 = vector.extract_strided_slice %523 {offsets = [0, 64], sizes = [8, 32], strides = [1, 1]} : vector<8x128xf32> to vector<8x32xf32>
    %535 = vector.extract_strided_slice %523 {offsets = [0, 96], sizes = [8, 32], strides = [1, 1]} : vector<8x128xf32> to vector<8x32xf32>
    %536 = vector.broadcast %cst_32 : f32 to vector<8x32xf32>
    %537 = arith.mulf %536, %535 : vector<8x32xf32>
    %538 = vector.broadcast %cst_32 : f32 to vector<8x32xf32>
    %539 = arith.addf %538, %537 : vector<8x32xf32>
    %540 = arith.mulf %533, %461 : vector<8x32xf32>
    %541 = arith.mulf %528, %534 : vector<8x32xf32>
    %542 = arith.addf %540, %541 : vector<8x32xf32>
    %543 = math.tanh %542 : vector<8x32xf32>
    %544 = arith.mulf %539, %543 : vector<8x32xf32>
    %cst_62 = arith.constant dense<0.000000e+00> : vector<8x128xf32>
    %545 = tpu.matmul %544, %2, %cst_62 {dimension_numbers = #tpu.dot_dimension_numbers<[1], [0], [0], [1], [0, 0, 1, 1], [], []>} : vector<8x32xf32>, vector<32x128xf32>, vector<8x128xf32> -> vector<8x128xf32>
    %546 = vector.extract_strided_slice %491 {offsets = [0, 256], sizes = [8, 128], strides = [1, 1]} : vector<8x384xf32> to vector<8x128xf32>
    %547 = arith.addf %545, %546 : vector<8x128xf32>
    %548 = arith.addf %547, %83 : vector<8x128xf32>
    %549 = math.tanh %548 : vector<8x128xf32>
    %550 = vector.extract_strided_slice %549 {offsets = [0, 0], sizes = [8, 32], strides = [1, 1]} : vector<8x128xf32> to vector<8x32xf32>
    %551 = vector.broadcast %cst_32 : f32 to vector<8x32xf32>
    %552 = arith.mulf %551, %550 : vector<8x32xf32>
    %553 = vector.broadcast %cst_32 : f32 to vector<8x32xf32>
    %554 = arith.addf %553, %552 : vector<8x32xf32>
    %555 = vector.extract_strided_slice %549 {offsets = [0, 32], sizes = [8, 32], strides = [1, 1]} : vector<8x128xf32> to vector<8x32xf32>
    %556 = vector.broadcast %cst_32 : f32 to vector<8x32xf32>
    %557 = arith.mulf %556, %555 : vector<8x32xf32>
    %558 = vector.broadcast %cst_32 : f32 to vector<8x32xf32>
    %559 = arith.addf %558, %557 : vector<8x32xf32>
    %560 = vector.extract_strided_slice %549 {offsets = [0, 64], sizes = [8, 32], strides = [1, 1]} : vector<8x128xf32> to vector<8x32xf32>
    %561 = vector.extract_strided_slice %549 {offsets = [0, 96], sizes = [8, 32], strides = [1, 1]} : vector<8x128xf32> to vector<8x32xf32>
    %562 = vector.broadcast %cst_32 : f32 to vector<8x32xf32>
    %563 = arith.mulf %562, %561 : vector<8x32xf32>
    %564 = vector.broadcast %cst_32 : f32 to vector<8x32xf32>
    %565 = arith.addf %564, %563 : vector<8x32xf32>
    %566 = arith.mulf %559, %487 : vector<8x32xf32>
    %567 = arith.mulf %554, %560 : vector<8x32xf32>
    %568 = arith.addf %566, %567 : vector<8x32xf32>
    %569 = math.tanh %568 : vector<8x32xf32>
    %570 = arith.mulf %565, %569 : vector<8x32xf32>
    %c6_i32 = arith.constant 6 : i32
    %571 = tpu.concatenate %518, %544, %570 in 1 : vector<8x32xf32>, vector<8x32xf32>, vector<8x32xf32> -> vector<8x96xf32>
    %cst_63 = arith.constant dense<0.000000e+00> : vector<8x384xf32>
    %572 = tpu.matmul %571, %3, %cst_63 {dimension_numbers = #tpu.dot_dimension_numbers<[1], [0], [0], [1], [0, 0, 1, 1], [], []>} : vector<8x96xf32>, vector<96x384xf32>, vector<8x384xf32> -> vector<8x384xf32>
    %573 = arith.index_cast %c6_i32 : i32 to index
    %c0_64 = arith.constant 0 : index
    %c0_65 = arith.constant 0 : index
    %574 = vector.load %arg12[%573, %c0_64, %c0_65] : memref<8x8x128xf32, #tpu.memory_space<vmem>>, vector<1x8x128xf32>
    %575 = vector.shape_cast %574 : vector<1x8x128xf32> to vector<8x128xf32>
    %576 = vector.extract_strided_slice %572 {offsets = [0, 0], sizes = [8, 128], strides = [1, 1]} : vector<8x384xf32> to vector<8x128xf32>
    %577 = arith.addf %575, %576 : vector<8x128xf32>
    %578 = math.tanh %577 : vector<8x128xf32>
    %579 = vector.extract_strided_slice %578 {offsets = [0, 0], sizes = [8, 32], strides = [1, 1]} : vector<8x128xf32> to vector<8x32xf32>
    %580 = vector.broadcast %cst_32 : f32 to vector<8x32xf32>
    %581 = arith.mulf %580, %579 : vector<8x32xf32>
    %582 = vector.broadcast %cst_32 : f32 to vector<8x32xf32>
    %583 = arith.addf %582, %581 : vector<8x32xf32>
    %584 = vector.extract_strided_slice %578 {offsets = [0, 32], sizes = [8, 32], strides = [1, 1]} : vector<8x128xf32> to vector<8x32xf32>
    %585 = vector.broadcast %cst_32 : f32 to vector<8x32xf32>
    %586 = arith.mulf %585, %584 : vector<8x32xf32>
    %587 = vector.broadcast %cst_32 : f32 to vector<8x32xf32>
    %588 = arith.addf %587, %586 : vector<8x32xf32>
    %589 = vector.extract_strided_slice %578 {offsets = [0, 64], sizes = [8, 32], strides = [1, 1]} : vector<8x128xf32> to vector<8x32xf32>
    %590 = vector.extract_strided_slice %578 {offsets = [0, 96], sizes = [8, 32], strides = [1, 1]} : vector<8x128xf32> to vector<8x32xf32>
    %591 = vector.broadcast %cst_32 : f32 to vector<8x32xf32>
    %592 = arith.mulf %591, %590 : vector<8x32xf32>
    %593 = vector.broadcast %cst_32 : f32 to vector<8x32xf32>
    %594 = arith.addf %593, %592 : vector<8x32xf32>
    %595 = arith.mulf %588, %516 : vector<8x32xf32>
    %596 = arith.mulf %583, %589 : vector<8x32xf32>
    %597 = arith.addf %595, %596 : vector<8x32xf32>
    %598 = math.tanh %597 : vector<8x32xf32>
    %599 = arith.mulf %594, %598 : vector<8x32xf32>
    %cst_66 = arith.constant dense<0.000000e+00> : vector<8x128xf32>
    %600 = tpu.matmul %599, %1, %cst_66 {dimension_numbers = #tpu.dot_dimension_numbers<[1], [0], [0], [1], [0, 0, 1, 1], [], []>} : vector<8x32xf32>, vector<32x128xf32>, vector<8x128xf32> -> vector<8x128xf32>
    %601 = vector.extract_strided_slice %572 {offsets = [0, 128], sizes = [8, 128], strides = [1, 1]} : vector<8x384xf32> to vector<8x128xf32>
    %602 = arith.addf %600, %601 : vector<8x128xf32>
    %603 = arith.addf %602, %80 : vector<8x128xf32>
    %604 = math.tanh %603 : vector<8x128xf32>
    %605 = vector.extract_strided_slice %604 {offsets = [0, 0], sizes = [8, 32], strides = [1, 1]} : vector<8x128xf32> to vector<8x32xf32>
    %606 = vector.broadcast %cst_32 : f32 to vector<8x32xf32>
    %607 = arith.mulf %606, %605 : vector<8x32xf32>
    %608 = vector.broadcast %cst_32 : f32 to vector<8x32xf32>
    %609 = arith.addf %608, %607 : vector<8x32xf32>
    %610 = vector.extract_strided_slice %604 {offsets = [0, 32], sizes = [8, 32], strides = [1, 1]} : vector<8x128xf32> to vector<8x32xf32>
    %611 = vector.broadcast %cst_32 : f32 to vector<8x32xf32>
    %612 = arith.mulf %611, %610 : vector<8x32xf32>
    %613 = vector.broadcast %cst_32 : f32 to vector<8x32xf32>
    %614 = arith.addf %613, %612 : vector<8x32xf32>
    %615 = vector.extract_strided_slice %604 {offsets = [0, 64], sizes = [8, 32], strides = [1, 1]} : vector<8x128xf32> to vector<8x32xf32>
    %616 = vector.extract_strided_slice %604 {offsets = [0, 96], sizes = [8, 32], strides = [1, 1]} : vector<8x128xf32> to vector<8x32xf32>
    %617 = vector.broadcast %cst_32 : f32 to vector<8x32xf32>
    %618 = arith.mulf %617, %616 : vector<8x32xf32>
    %619 = vector.broadcast %cst_32 : f32 to vector<8x32xf32>
    %620 = arith.addf %619, %618 : vector<8x32xf32>
    %621 = arith.mulf %614, %542 : vector<8x32xf32>
    %622 = arith.mulf %609, %615 : vector<8x32xf32>
    %623 = arith.addf %621, %622 : vector<8x32xf32>
    %624 = math.tanh %623 : vector<8x32xf32>
    %625 = arith.mulf %620, %624 : vector<8x32xf32>
    %cst_67 = arith.constant dense<0.000000e+00> : vector<8x128xf32>
    %626 = tpu.matmul %625, %2, %cst_67 {dimension_numbers = #tpu.dot_dimension_numbers<[1], [0], [0], [1], [0, 0, 1, 1], [], []>} : vector<8x32xf32>, vector<32x128xf32>, vector<8x128xf32> -> vector<8x128xf32>
    %627 = vector.extract_strided_slice %572 {offsets = [0, 256], sizes = [8, 128], strides = [1, 1]} : vector<8x384xf32> to vector<8x128xf32>
    %628 = arith.addf %626, %627 : vector<8x128xf32>
    %629 = arith.addf %628, %83 : vector<8x128xf32>
    %630 = math.tanh %629 : vector<8x128xf32>
    %631 = vector.extract_strided_slice %630 {offsets = [0, 0], sizes = [8, 32], strides = [1, 1]} : vector<8x128xf32> to vector<8x32xf32>
    %632 = vector.broadcast %cst_32 : f32 to vector<8x32xf32>
    %633 = arith.mulf %632, %631 : vector<8x32xf32>
    %634 = vector.broadcast %cst_32 : f32 to vector<8x32xf32>
    %635 = arith.addf %634, %633 : vector<8x32xf32>
    %636 = vector.extract_strided_slice %630 {offsets = [0, 32], sizes = [8, 32], strides = [1, 1]} : vector<8x128xf32> to vector<8x32xf32>
    %637 = vector.broadcast %cst_32 : f32 to vector<8x32xf32>
    %638 = arith.mulf %637, %636 : vector<8x32xf32>
    %639 = vector.broadcast %cst_32 : f32 to vector<8x32xf32>
    %640 = arith.addf %639, %638 : vector<8x32xf32>
    %641 = vector.extract_strided_slice %630 {offsets = [0, 64], sizes = [8, 32], strides = [1, 1]} : vector<8x128xf32> to vector<8x32xf32>
    %642 = vector.extract_strided_slice %630 {offsets = [0, 96], sizes = [8, 32], strides = [1, 1]} : vector<8x128xf32> to vector<8x32xf32>
    %643 = vector.broadcast %cst_32 : f32 to vector<8x32xf32>
    %644 = arith.mulf %643, %642 : vector<8x32xf32>
    %645 = vector.broadcast %cst_32 : f32 to vector<8x32xf32>
    %646 = arith.addf %645, %644 : vector<8x32xf32>
    %647 = arith.mulf %640, %568 : vector<8x32xf32>
    %648 = arith.mulf %635, %641 : vector<8x32xf32>
    %649 = arith.addf %647, %648 : vector<8x32xf32>
    %650 = math.tanh %649 : vector<8x32xf32>
    %651 = arith.mulf %646, %650 : vector<8x32xf32>
    %c7_i32 = arith.constant 7 : i32
    %652 = tpu.concatenate %599, %625, %651 in 1 : vector<8x32xf32>, vector<8x32xf32>, vector<8x32xf32> -> vector<8x96xf32>
    %cst_68 = arith.constant dense<0.000000e+00> : vector<8x384xf32>
    %653 = tpu.matmul %652, %3, %cst_68 {dimension_numbers = #tpu.dot_dimension_numbers<[1], [0], [0], [1], [0, 0, 1, 1], [], []>} : vector<8x96xf32>, vector<96x384xf32>, vector<8x384xf32> -> vector<8x384xf32>
    %654 = arith.index_cast %c7_i32 : i32 to index
    %c0_69 = arith.constant 0 : index
    %c0_70 = arith.constant 0 : index
    %655 = vector.load %arg12[%654, %c0_69, %c0_70] : memref<8x8x128xf32, #tpu.memory_space<vmem>>, vector<1x8x128xf32>
    %656 = vector.shape_cast %655 : vector<1x8x128xf32> to vector<8x128xf32>
    %657 = vector.extract_strided_slice %653 {offsets = [0, 0], sizes = [8, 128], strides = [1, 1]} : vector<8x384xf32> to vector<8x128xf32>
    %658 = arith.addf %656, %657 : vector<8x128xf32>
    %659 = math.tanh %658 : vector<8x128xf32>
    %660 = vector.extract_strided_slice %659 {offsets = [0, 0], sizes = [8, 32], strides = [1, 1]} : vector<8x128xf32> to vector<8x32xf32>
    %661 = vector.broadcast %cst_32 : f32 to vector<8x32xf32>
    %662 = arith.mulf %661, %660 : vector<8x32xf32>
    %663 = vector.broadcast %cst_32 : f32 to vector<8x32xf32>
    %664 = arith.addf %663, %662 : vector<8x32xf32>
    %665 = vector.extract_strided_slice %659 {offsets = [0, 32], sizes = [8, 32], strides = [1, 1]} : vector<8x128xf32> to vector<8x32xf32>
    %666 = vector.broadcast %cst_32 : f32 to vector<8x32xf32>
    %667 = arith.mulf %666, %665 : vector<8x32xf32>
    %668 = vector.broadcast %cst_32 : f32 to vector<8x32xf32>
    %669 = arith.addf %668, %667 : vector<8x32xf32>
    %670 = vector.extract_strided_slice %659 {offsets = [0, 64], sizes = [8, 32], strides = [1, 1]} : vector<8x128xf32> to vector<8x32xf32>
    %671 = vector.extract_strided_slice %659 {offsets = [0, 96], sizes = [8, 32], strides = [1, 1]} : vector<8x128xf32> to vector<8x32xf32>
    %672 = vector.broadcast %cst_32 : f32 to vector<8x32xf32>
    %673 = arith.mulf %672, %671 : vector<8x32xf32>
    %674 = vector.broadcast %cst_32 : f32 to vector<8x32xf32>
    %675 = arith.addf %674, %673 : vector<8x32xf32>
    %676 = arith.mulf %669, %597 : vector<8x32xf32>
    %677 = arith.mulf %664, %670 : vector<8x32xf32>
    %678 = arith.addf %676, %677 : vector<8x32xf32>
    %679 = math.tanh %678 : vector<8x32xf32>
    %680 = arith.mulf %675, %679 : vector<8x32xf32>
    %cst_71 = arith.constant dense<0.000000e+00> : vector<8x128xf32>
    %681 = tpu.matmul %680, %1, %cst_71 {dimension_numbers = #tpu.dot_dimension_numbers<[1], [0], [0], [1], [0, 0, 1, 1], [], []>} : vector<8x32xf32>, vector<32x128xf32>, vector<8x128xf32> -> vector<8x128xf32>
    %682 = vector.extract_strided_slice %653 {offsets = [0, 128], sizes = [8, 128], strides = [1, 1]} : vector<8x384xf32> to vector<8x128xf32>
    %683 = arith.addf %681, %682 : vector<8x128xf32>
    %684 = arith.addf %683, %80 : vector<8x128xf32>
    %685 = math.tanh %684 : vector<8x128xf32>
    %686 = vector.extract_strided_slice %685 {offsets = [0, 0], sizes = [8, 32], strides = [1, 1]} : vector<8x128xf32> to vector<8x32xf32>
    %687 = vector.broadcast %cst_32 : f32 to vector<8x32xf32>
    %688 = arith.mulf %687, %686 : vector<8x32xf32>
    %689 = vector.broadcast %cst_32 : f32 to vector<8x32xf32>
    %690 = arith.addf %689, %688 : vector<8x32xf32>
    %691 = vector.extract_strided_slice %685 {offsets = [0, 32], sizes = [8, 32], strides = [1, 1]} : vector<8x128xf32> to vector<8x32xf32>
    %692 = vector.broadcast %cst_32 : f32 to vector<8x32xf32>
    %693 = arith.mulf %692, %691 : vector<8x32xf32>
    %694 = vector.broadcast %cst_32 : f32 to vector<8x32xf32>
    %695 = arith.addf %694, %693 : vector<8x32xf32>
    %696 = vector.extract_strided_slice %685 {offsets = [0, 64], sizes = [8, 32], strides = [1, 1]} : vector<8x128xf32> to vector<8x32xf32>
    %697 = vector.extract_strided_slice %685 {offsets = [0, 96], sizes = [8, 32], strides = [1, 1]} : vector<8x128xf32> to vector<8x32xf32>
    %698 = vector.broadcast %cst_32 : f32 to vector<8x32xf32>
    %699 = arith.mulf %698, %697 : vector<8x32xf32>
    %700 = vector.broadcast %cst_32 : f32 to vector<8x32xf32>
    %701 = arith.addf %700, %699 : vector<8x32xf32>
    %702 = arith.mulf %695, %623 : vector<8x32xf32>
    %703 = arith.mulf %690, %696 : vector<8x32xf32>
    %704 = arith.addf %702, %703 : vector<8x32xf32>
    %705 = math.tanh %704 : vector<8x32xf32>
    %706 = arith.mulf %701, %705 : vector<8x32xf32>
    %cst_72 = arith.constant dense<0.000000e+00> : vector<8x128xf32>
    %707 = tpu.matmul %706, %2, %cst_72 {dimension_numbers = #tpu.dot_dimension_numbers<[1], [0], [0], [1], [0, 0, 1, 1], [], []>} : vector<8x32xf32>, vector<32x128xf32>, vector<8x128xf32> -> vector<8x128xf32>
    %708 = vector.extract_strided_slice %653 {offsets = [0, 256], sizes = [8, 128], strides = [1, 1]} : vector<8x384xf32> to vector<8x128xf32>
    %709 = arith.addf %707, %708 : vector<8x128xf32>
    %710 = arith.addf %709, %83 : vector<8x128xf32>
    %711 = math.tanh %710 : vector<8x128xf32>
    %712 = vector.extract_strided_slice %711 {offsets = [0, 0], sizes = [8, 32], strides = [1, 1]} : vector<8x128xf32> to vector<8x32xf32>
    %713 = vector.broadcast %cst_32 : f32 to vector<8x32xf32>
    %714 = arith.mulf %713, %712 : vector<8x32xf32>
    %715 = vector.broadcast %cst_32 : f32 to vector<8x32xf32>
    %716 = arith.addf %715, %714 : vector<8x32xf32>
    %717 = vector.extract_strided_slice %711 {offsets = [0, 32], sizes = [8, 32], strides = [1, 1]} : vector<8x128xf32> to vector<8x32xf32>
    %718 = vector.broadcast %cst_32 : f32 to vector<8x32xf32>
    %719 = arith.mulf %718, %717 : vector<8x32xf32>
    %720 = vector.broadcast %cst_32 : f32 to vector<8x32xf32>
    %721 = arith.addf %720, %719 : vector<8x32xf32>
    %722 = vector.extract_strided_slice %711 {offsets = [0, 64], sizes = [8, 32], strides = [1, 1]} : vector<8x128xf32> to vector<8x32xf32>
    %723 = vector.extract_strided_slice %711 {offsets = [0, 96], sizes = [8, 32], strides = [1, 1]} : vector<8x128xf32> to vector<8x32xf32>
    %724 = vector.broadcast %cst_32 : f32 to vector<8x32xf32>
    %725 = arith.mulf %724, %723 : vector<8x32xf32>
    %726 = vector.broadcast %cst_32 : f32 to vector<8x32xf32>
    %727 = arith.addf %726, %725 : vector<8x32xf32>
    %728 = arith.mulf %721, %649 : vector<8x32xf32>
    %729 = arith.mulf %716, %722 : vector<8x32xf32>
    %730 = arith.addf %728, %729 : vector<8x32xf32>
    %731 = math.tanh %730 : vector<8x32xf32>
    %732 = arith.mulf %727, %731 : vector<8x32xf32>
    %c8_i32 = arith.constant 8 : i32
    %c0_73 = arith.constant 0 : index
    %c0_74 = arith.constant 0 : index
    %733 = vector.load %arg9[%c0_73, %c0_74] : memref<32x1xf32, #tpu.memory_space<vmem>>, vector<32x1xf32>
    %cst_75 = arith.constant dense<0.000000e+00> : vector<8x1xf32>
    %734 = tpu.matmul %732, %733, %cst_75 {dimension_numbers = #tpu.dot_dimension_numbers<[1], [0], [0], [1], [0, 0, 1, 1], [], []>} : vector<8x32xf32>, vector<32x1xf32>, vector<8x1xf32> -> vector<8x1xf32>
    %c0_76 = arith.constant 0 : index
    %c0_77 = arith.constant 0 : index
    %735 = vector.load %arg10[%c0_76, %c0_77] : memref<1x1xf32, #tpu.memory_space<vmem>>, vector<1x1xf32>
    %736 = vector.broadcast %735 : vector<1x1xf32> to vector<8x1xf32>
    %737 = arith.addf %734, %736 : vector<8x1xf32>
    %c0_78 = arith.constant 0 : index
    %c0_79 = arith.constant 0 : index
    %738 = vector.load %arg11[%c0_78, %c0_79] : memref<8x1xf32, #tpu.memory_space<vmem>>, vector<8x1xf32>
    tpu.vector_store %arg11[%c0_78, %c0_79], %737 {strides = array<i32>} : memref<8x1xf32, #tpu.memory_space<vmem>>, vector<8x1xf32>,
    return
  }
  func.func @transform_0(%arg0: i32) -> (i32, i32) {
    %c0_i32 = arith.constant 0 : i32
    %c0_i32_0 = arith.constant 0 : i32
    return %arg0, %c0_i32 : i32, i32
  }
  func.func @transform_1(%arg0: i32) -> (i32, i32) {
    %c0_i32 = arith.constant 0 : i32
    %c0_i32_0 = arith.constant 0 : i32
    %c0_i32_1 = arith.constant 0 : i32
    return %c0_i32, %c0_i32_0 : i32, i32
  }
  func.func @transform_2(%arg0: i32) -> (i32, i32) {
    %c0_i32 = arith.constant 0 : i32
    %c0_i32_0 = arith.constant 0 : i32
    %c0_i32_1 = arith.constant 0 : i32
    return %c0_i32, %c0_i32_0 : i32, i32
  }
  func.func @transform_3(%arg0: i32) -> (i32, i32) {
    %c0_i32 = arith.constant 0 : i32
    %c0_i32_0 = arith.constant 0 : i32
    %c0_i32_1 = arith.constant 0 : i32
    return %c0_i32, %c0_i32_0 : i32, i32
  }
  func.func @transform_4(%arg0: i32) -> (i32, i32) {
    %c0_i32 = arith.constant 0 : i32
    %c0_i32_0 = arith.constant 0 : i32
    %c0_i32_1 = arith.constant 0 : i32
    return %c0_i32, %c0_i32_0 : i32, i32
  }
  func.func @transform_5(%arg0: i32) -> (i32, i32) {
    %c0_i32 = arith.constant 0 : i32
    %c0_i32_0 = arith.constant 0 : i32
    %c0_i32_1 = arith.constant 0 : i32
    return %c0_i32, %c0_i32_0 : i32, i32
  }
  func.func @transform_6(%arg0: i32) -> (i32, i32) {
    %c0_i32 = arith.constant 0 : i32
    %c0_i32_0 = arith.constant 0 : i32
    %c0_i32_1 = arith.constant 0 : i32
    return %c0_i32, %c0_i32_0 : i32, i32
  }
  func.func @transform_7(%arg0: i32) -> (i32, i32) {
    %c0_i32 = arith.constant 0 : i32
    %c0_i32_0 = arith.constant 0 : i32
    %c0_i32_1 = arith.constant 0 : i32
    return %c0_i32, %c0_i32_0 : i32, i32
  }
  func.func @transform_8(%arg0: i32) -> (i32, i32) {
    %c0_i32 = arith.constant 0 : i32
    %c0_i32_0 = arith.constant 0 : i32
    %c0_i32_1 = arith.constant 0 : i32
    return %c0_i32, %c0_i32_0 : i32, i32
  }
  func.func @transform_9(%arg0: i32) -> (i32, i32) {
    %c0_i32 = arith.constant 0 : i32
    %c0_i32_0 = arith.constant 0 : i32
    %c0_i32_1 = arith.constant 0 : i32
    return %c0_i32, %c0_i32_0 : i32, i32
  }
  func.func @transform_10(%arg0: i32) -> (i32, i32) {
    %c0_i32 = arith.constant 0 : i32
    %c0_i32_0 = arith.constant 0 : i32
    return %arg0, %c0_i32 : i32, i32
  }
}

</mosaic_0001>

<bundles_post_ra>
// kernel: tpu_custom_call.1
= control target key start
LH: loop header
LB: loop body
LE: loop exit
PB: predicated region body
PF: predicated region fallthrough
CT: control target
= control target key end

     0   :  { %s5356_s0 = inlined_call_operand.hbm [shape: f32[8,8], index: 0, kind: input, shape index: {}]   ;;  %s5357_s1 = inlined_call_operand.vmem [shape: f32[1,128], index: 1, kind: input, shape index: {}]   ;;  %s5358_s2 = inlined_call_operand.vmem [shape: f32[32,128], index: 2, kind: input, shape index: {}]   ;;  %s5359_s3 = inlined_call_operand.hbm [shape: f32[32,128], index: 3, kind: input, shape index: {}]   ;;  %s5360_s4 = inlined_call_operand.hbm [shape: f32[96,384], index: 4, kind: input, shape index: {}]   ;;  %s5361_s5 = inlined_call_operand.vmem [shape: f32[1,128], index: 5, kind: input, shape index: {}]   ;;  %s5362_s6 = inlined_call_operand.vmem [shape: f32[1,128], index: 6, kind: input, shape index: {}]   ;;  %s5363_s7 = inlined_call_operand.vmem [shape: f32[1,128], index: 7, kind: input, shape index: {}]   ;;  %s5364_s8 = inlined_call_operand.vmem [shape: f32[32,1], index: 8, kind: input, shape index: {}]   ;;  %s5365_s9 = inlined_call_operand.<no memory space> [shape: f32[1,1], index: 9, kind: input, shape index: {}]   ;;  %s5366_s10 = inlined_call_operand.vmem [shape: f32[8,1], index: 10, kind: output, shape index: {}]  }
   0x1   :  { %v15_v0 = vstv %s5365_s9 }
   0x2   :  { %16 = vst [vmem:[#allocation3] sm:$0x1] %v15_v0 }
   0x3   :  { %17 = vsyncpa [#allocation5], 0 }
   0x4   :  { %18 = vsyncpa [#allocation7], 0  ;;  %s4113_s15 = smov [#allocation6]  }
   0x5   :  { %s38_s16 = sshll.u32 %s4113_s15, 4  ;;  %s39_s16 = int_to_ptr.vmem [resolvable:$true] %s38_s16 }
   0x6   :  { %s4057_s17 = scalar_lea.vmem %s39_s16, 512  ;;  %p4062_p1 = scmp.lt.s32.totalorder %s39_s16, %s39_s16 }
   0x7   :  { %p4058_p0 = scmp.ne.s32.totalorder %s39_s16, %s4057_s17  ;;  %p4063_p2 = scmp.lt.s32.totalorder %s4057_s17, %s4057_s17 }
   0x9   :  { %p4064_p3 = por %p4063_p2, %p4062_p1 }
   0xb   :  { %p4065_p4 = pnand %p4064_p3, %p4058_p0 }
   0xd   :  { %4068 = shalt.err (!%p4065_p4)
}
   0xe   :  { %s4114_s18 = smov 128   ;;  %s4115_s19 = smov 8  }
   0xf   :  { %44 = dma.hbm_to_vmem [thread:$0]  %s5359_s3, 512, %s39_s16, [#allocation7], %s4114_s18, %s4114_s18, %s4115_s19  }
  0x10   :  { %s4116_s9 = smov [#allocation4]   ;;  %s4117_s23 = smov [#allocation8]  }
  0x11   :  { %s25_s22 = sshll.u32 %s4116_s9, 4  ;;  %s50_s24 = sshll.u32 %s4117_s23, 4  ;;  %s26_s22 = int_to_ptr.vmem [resolvable:$true] %s25_s22  ;;  %s51_s24 = int_to_ptr.vmem [resolvable:$true] %s50_s24 }
  0x12   :  { %s4077_s25 = scalar_lea.vmem %s26_s22, 128  ;;  %p4082_p6 = scmp.lt.s32.totalorder %s26_s22, %s26_s22 }
  0x13   :  { %p4078_p5 = scmp.ne.s32.totalorder %s26_s22, %s4077_s25  ;;  %p4083_p7 = scmp.lt.s32.totalorder %s4077_s25, %s4077_s25 }
  0x15   :  { %p4084_p8 = por %p4083_p7, %p4082_p6 }
  0x17   :  { %p4085_p9 = pnand %p4084_p8, %p4078_p5 }
  0x19   :  { %4088 = shalt.err (!%p4085_p9)
}
  0x1a   :  { %28 = dma.hbm_to_vmem [thread:$0]  %s5356_s0, 128, %s26_s22, [#allocation5]  }
  0x1b   :  { %s4097_s28 = scalar_lea.vmem %s51_s24, 4608  ;;  %p4102_p11 = scmp.lt.s32.totalorder %s51_s24, %s51_s24 }
  0x1c   :  { %p4098_p10 = scmp.ne.s32.totalorder %s51_s24, %s4097_s28  ;;  %p4103_p12 = scmp.lt.s32.totalorder %s4097_s28, %s4097_s28 }
  0x1e   :  { %p4104_p13 = por %p4103_p12, %p4102_p11 }
  0x20   :  { %p4105_p0 = pnand %p4104_p13, %p4098_p10 }
  0x22   :  { %4108 = shalt.err (!%p4105_p0)
}
  0x23   :  { %s4118_s3 = smov 384   ;;  %s4119_s29 = smov 24  }
  0x24   :  { %56 = dma.hbm_to_vmem [thread:$0]  %s5360_s4, 4608, %s51_s24, [#allocation7], %s4118_s3, %s4118_s3, %s4119_s29  }
  0x25   :  { %4109 = dma.done.wait [#allocation5], 128  }
  0x26   :  { %4110 = vsyncadd [#allocation5], 4294967168 }
  0x27   :  { %4111 = dma.done.wait [#allocation7], 5120  }
  0x28   :  { %4112 = vsyncadd [#allocation7], 4294962176  ;;  %v5367_v1 = vmov 0.0   ;;  %v4121_v2 = vmov 0   ;;  %v4202_v3 = vld [vmem:[#allocation8 + $0x110] sm:$0xff]  ;;  %v4204_v4 = vld [vmem:[#allocation8 + $0x108] sm:$0xff] }
  0x29   :  { %281 = vmatprep.mubr.f32.mxu0 %v5367_v1  ;;  %3892 = vset.pattern.permute.xlu0 %v4121_v2  ;;  %v4206_v5 = vld [vmem:[#allocation8 + $0xf8] sm:$0xff]  ;;  %v4209_v6 = vld [vmem:[#allocation8 + $0xf0] sm:$0xff]  ;;  %v4212_v7 = vld [vmem:[#allocation8 + $0xe0] sm:$0xff]  ;;  %s4122_s14 = smov 64   ;;  %s4123_s15 = smov 32   ;;  %vm4124_vm0 = vmmov 0  }
  0x2a   :  { %3469 = vmatprep.subr.mxu1 %v5367_v1  ;;  %225 = vmatprep.subr.mxu0 %v4202_v3  ;;  %v4215_v8 = vld [vmem:[#allocation8 + $0xd8] sm:$0xff]  ;;  %v4218_v9 = vld [vmem:[#allocation8 + $0xc8] sm:$0xff]  ;;  %v4221_v10 = vld [vmem:[#allocation8 + $0xc0] sm:$0xff]  ;;  %vm383_vm1 = vcmask 261120   ;;  %s4126_s27 = smov 96   ;;  %vm582_vm2 = vcmask 523264  }
  0x2b   :  { %226 = vmatpush1.msra.mxu0 %v4204_v4  ;;  %v4224_v11 = vld [vmem:[#allocation8 + $0xb0] sm:$0xff]  ;;  %v4227_v12 = vld [vmem:[#allocation8 + $0xa8] sm:$0xff]  ;;  %v4230_v13 = vld [vmem:[#allocation8 + $0x98] sm:$0xff]  ;;  %3493 = vmatprep.mubr.msk.f32.mxu1 %vm4124_vm0, %v5367_v1  ;;  %vm213_vm3 = vcmask 785408   ;;  %vm3236_vm4 = vcmask 7168  }
  0x2c   :  { %227 = vmatprep.subr.mxu0 %v4206_v5  ;;  %v4232_v14 = vld [vmem:[#allocation4] sm:$0xff]  ;;  %v4235_v15 = vld [vmem:[#allocation8 + $0x90] sm:$0xff]  ;;  %v4239_v16 = vld [vmem:[#allocation8 + $0x80] sm:$0xff] }
  0x2d   :  { %228 = vmatpush1.msra.mxu0 %v4209_v6  ;;  %125 = vperm.xlu0 %3892, %v4232_v14   ;;  %v4242_v17 = vld [vmem:[#allocation8 + $0x78] sm:$0xff]  ;;  %v4245_v18 = vld [vmem:[#allocation8 + $0x68] sm:$0xff]  ;;  %v4248_v19 = vld [vmem:[#allocation8 + $0x60] sm:$0xff] }
  0x2e   :  { %229 = vmatprep.subr.mxu0 %v4212_v7  ;;  %v4251_v20 = vld [vmem:[#allocation8 + $0x50] sm:$0xff]  ;;  %v4254_v21 = vld [vmem:[#allocation8 + $0x48] sm:$0xff]  ;;  %v4257_v22 = vld [vmem:[#allocation8 + $0x38] sm:$0xff] }
  0x2f   :  { %230 = vmatpush1.msra.mxu0 %v4215_v8  ;;  %v4260_v23 = vld [vmem:[#allocation8 + $0x30] sm:$0xff]  ;;  %v4263_v24 = vld [vmem:[#allocation8 + $0x20] sm:$0xff]  ;;  %v4266_v25 = vld [vmem:[#allocation8 + $0x18] sm:$0xff] }
  0x30   :  { %231 = vmatprep.subr.mxu0 %v4218_v9  ;;  %v4269_v26 = vld [vmem:[#allocation8 + $0x8] sm:$0xff]  ;;  %v4272_v27 = vld [vmem:[#allocation8] sm:$0xff]  ;;  %v4282_v29 = vld [vmem:[%s5357_s1] ss:$0 sm:$0xff] }
  0x31   :  { %232 = vmatpush1.msra.mxu0 %v4221_v10  ;;  %5380 = vst [vmem:[#allocation11_spill] sm:$0xff] %v4272_v27  ;;  %5381 = vst [vmem:[#allocation12_spill] sm:$0xff] %v4282_v29  ;;  %v4288_v31 = vld [vmem:[%s5361_s5] ss:$0 sm:$0xff]  ;;  %v4299_v43 = vld [vmem:[%s5358_s2 + $0x18] sm:$0xff] }
  0x32   :  { %233 = vmatprep.subr.mxu0 %v4224_v11  ;;  %v4304_v44 = vld [vmem:[%s5358_s2 + $0x10] sm:$0xff]  ;;  %v4313_v45 = vld [vmem:[%s5358_s2 + $0x8] sm:$0xff]  ;;  %v4322_v46 = vld [vmem:[%s5358_s2] sm:$0xff] }
  0x33   :  { %234 = vmatpush1.msra.mxu0 %v4227_v12  ;;  %v4362_v52 = vld [vmem:[%s5362_s6] ss:$0 sm:$0xff]  ;;  %v4370_v2 = vld [vmem:[#allocation8 + $0x118] sm:$0xff] }
  0x34   :  { %235 = vmatprep.subr.mxu0 %v4230_v13  ;;  %3470 = vmatpush3.msra.mxu1 %v4370_v2 }
  0x35   :  { %236 = vmatpush1.msra.mxu0 %v4235_v15  ;;  %3471 = vmatprep.subr.mxu1 %v5367_v1 }
  0x36   :  { %237 = vmatprep.subr.mxu0 %v4239_v16 }
  0x37   :  { %238 = vmatpush1.msra.mxu0 %v4242_v17 }
  0x38   :  { %239 = vmatprep.subr.mxu0 %v4245_v18 }
  0x39   :  { %240 = vmatpush1.msra.mxu0 %v4248_v19 }
  0x3a   :  { %241 = vmatprep.subr.mxu0 %v4251_v20 }
  0x3b   :  { %242 = vmatpush1.msra.mxu0 %v4254_v21 }
  0x3c   :  { %243 = vmatprep.subr.mxu0 %v4257_v22 }
  0x3d   :  { %244 = vmatpush1.msra.mxu0 %v4260_v23 }
  0x3e   :  { %245 = vmatprep.subr.mxu0 %v4263_v24 }
  0x3f   :  { %246 = vmatpush1.msra.mxu0 %v4266_v25 }
  0x40   :  { %247 = vmatprep.subr.mxu0 %v4269_v26 }
  0x41   :  { %248 = vmatpush1.msra.mxu0 %v4272_v27 }
  0x42   :  { %282 = vmatmul.mubr.f32.vlgmr.msra.gmra.mxu0 %v5367_v1  ;;  %3496 = vmatprep.subr.mxu0 %v5367_v1 }
  0x43   :  { %3497 = vmatpush3.msra.mxu0 %v4299_v43  ;;  %3504 = vmatprep.mubr.msk.f32.mxu0 %vm4124_vm0, %v5367_v1 }
  0x44   :  { %3498 = vmatprep.subr.mxu0 %v5367_v1 }
  0x45   :  { %3499 = vmatpush3.msra.mxu0 %v4304_v44 }
  0x46   :  { %3500 = vmatprep.subr.mxu0 %v5367_v1 }
  0x47   :  { %3501 = vmatpush3.msra.mxu0 %v4313_v45 }
  0x48   :  { %3502 = vmatprep.subr.mxu0 %v5367_v1 }
  0x49   :  { %3503 = vmatpush3.msra.mxu0 %v4322_v46 }
  0x4a   :  { %595 = vmatprep.subr.mxu0 %v4202_v3 }
  0xa8   :  { %v126_v28 = vpop.permute.xlu0 %125 }
  0xa9   :  { %v134_v30 = vmul.f32 %v4282_v29, %v126_v28  ;;  %v4372_v28 = vld [vmem:[#allocation8 + $0x100] sm:$0xff] }
  0xaa   :  { %3472 = vmatpush3.msra.mxu1 %v4372_v28 }
  0xab   :  { %v141_v32 = vadd.f32 %v4288_v31, %v134_v30  ;;  %v4376_v30 = vld [vmem:[#allocation8 + $0xe8] sm:$0xff]  ;;  %3473 = vmatprep.subr.mxu1 %v5367_v1 }
  0xac   :  { %3474 = vmatpush3.msra.mxu1 %v4376_v30 }
  0xad   :  { %3475 = vmatprep.subr.mxu1 %v5367_v1 }
 0x102   :  { %v283_v33 = vpop.f32.mrf.mxu0 }
 0x103   :  { %v359_v34 = vadd.f32 %v283_v33, %v141_v32  ;;  %v4380_v32 = vld [vmem:[#allocation8 + $0xd0] sm:$0xff]  ;;  %v4384_v33 = vld [vmem:[#allocation8 + $0xb8] sm:$0xff] }
 0x104   :  { %v285_v51 = vpop.f32.mrf.mxu0  ;;  %3476 = vmatpush3.msra.mxu1 %v4380_v32 }
 0x105   :  { %3901 = vtanh.f32 %v359_v34  ;;  %3477 = vmatprep.subr.mxu1 %v5367_v1  ;;  %v4388_v34 = vld [vmem:[#allocation8 + $0xa0] sm:$0xff] }
 0x106   :  { %3478 = vmatpush3.msra.mxu1 %v4384_v33 }
 0x107   :  { %3479 = vmatprep.subr.mxu1 %v5367_v1 }
 0x108   :  { %3480 = vmatpush3.msra.mxu1 %v4388_v34 }
 0x109   :  { %3481 = vmatprep.subr.mxu1 %v5367_v1 }
 0x112   :  { %v3902_v35 = vpop.eup %3901 }
 0x113   :  { %365 = vrot.lane.b32.xlu0 %v3902_v35, %s4122_s14  ;;  %v361_v36 = vmul.f32 0.5, %v3902_v35 }
 0x115   :  { %v362_v37 = vadd.f32 0.5, %v361_v36  ;;  %v4392_v36 = vld [vmem:[#allocation8 + $0x88] sm:$0xff] }
 0x116   :  { %3482 = vmatpush3.msra.mxu1 %v4392_v36 }
 0x117   :  { %v363_v40 = vmul.f32 0.0, %v362_v37  ;;  %3483 = vmatprep.subr.mxu1 %v5367_v1 }
 0x185   :  { %v366_v38 = vpop.permute.xlu0 %365 }
 0x186   :  { %v368_v39 = vmul.f32 %v366_v38, %v362_v37  ;;  %v4401_v38 = vld [vmem:[#allocation8 + $0x58] sm:$0xff] }
 0x188   :  { %370 = vrot.lane.b32.xlu1 %v368_v39, %s4123_s15  ;;  %v4405_v39 = vld [vmem:[#allocation8 + $0x40] sm:$0xff] }
 0x1fa   :  { %v371_v41 = vpop.permute.xlu1 %370 }
 0x1fb   :  { %v4293_v42 = vadd.f32 %v371_v41, %v363_v40  ;;  %v4409_v40 = vld [vmem:[#allocation8 + $0x28] sm:$0xff]  ;;  %v4413_v41 = vld [vmem:[#allocation8 + $0x10] sm:$0xff] }
 0x1fc   :  { %5382 = vst [vmem:[#allocation13_spill] sm:$0xff] %v4409_v40  ;;  %5383 = vst [vmem:[#allocation14_spill] sm:$0xff] %v4413_v41 }
 0x1fd   :  { %3903 = vtanh.f32 %v4293_v42 }
 0x20a   :  { %v3904_v47 = vpop.eup %3903 }
 0x20b   :  { %376 = vrot.lane.b32.xlu1 %v3904_v47, %s4122_s14  ;;  %v4417_v47 = vld [vmem:[#allocation6 + $0x18] sm:$0xff] }
 0x27d   :  { %v377_v48 = vpop.permute.xlu1 %376 }
 0x27e   :  { %v379_v49 = vmul.f32 %v377_v48, %v362_v37  ;;  %v4397_v37 = vld [vmem:[#allocation8 + $0x70] sm:$0xff] }
 0x27f   :  { %3484 = vmatpush3.msra.mxu1 %v4397_v37  ;;  %v4422_v48 = vld [vmem:[#allocation6 + $0x10] sm:$0xff] }
 0x280   :  { %381 = vrot.lane.b32.xlu0 %v379_v49, %s4123_s15  ;;  %3485 = vmatprep.subr.mxu1 %v5367_v1  ;;  %v4428_v49 = vld [vmem:[#allocation6 + $0x8] sm:$0xff] }
 0x281   :  { %3486 = vmatpush3.msra.mxu1 %v4401_v38 }
 0x282   :  { %3487 = vmatprep.subr.mxu1 %v5367_v1 }
 0x283   :  { %3488 = vmatpush3.msra.mxu1 %v4405_v39 }
 0x284   :  { %3489 = vmatprep.subr.mxu1 %v5367_v1 }
 0x285   :  { %3490 = vmatpush3.msra.mxu1 %v4409_v40 }
 0x286   :  { %3491 = vmatprep.subr.mxu1 %v5367_v1 }
 0x287   :  { %3492 = vmatpush3.msra.mxu1 %v4413_v41 }
 0x288   :  { %3494 = vmatmul.mubr.f32.vlgmr.msra.gmra.mxu1 %v5367_v1  ;;  %3507 = vmatprep.subr.mxu1 %v5367_v1 }
 0x289   :  { %3508 = vmatpush3.msra.mxu1 %v4417_v47  ;;  %3515 = vmatprep.mubr.msk.f32.mxu1 %vm4124_vm0, %v5367_v1 }
 0x28a   :  { %3509 = vmatprep.subr.mxu1 %v5367_v1 }
 0x28b   :  { %3510 = vmatpush3.msra.mxu1 %v4422_v48 }
 0x28c   :  { %3511 = vmatprep.subr.mxu1 %v5367_v1 }
 0x28d   :  { %3512 = vmatpush3.msra.mxu1 %v4428_v49 }
 0x28e   :  { %3513 = vmatprep.subr.mxu1 %v5367_v1 }
 0x2f2   :  { %v4330_v50 = vpop.permute.xlu0 %381 }
 0x2f3   :  { %3505 = vmatmul.mubr.msk.f32.vlgmr.msra.gmra.mxu0 %vm383_vm1, %v4330_v50 }
 0x2f4   :  { %596 = vmatpush1.msra.mxu0 %v4204_v4  ;;  %651 = vmatprep.mubr.f32.mxu0 %v5367_v1 }
 0x2f5   :  { %597 = vmatprep.subr.mxu0 %v4206_v5 }
 0x2f6   :  { %598 = vmatpush1.msra.mxu0 %v4209_v6 }
 0x2f7   :  { %599 = vmatprep.subr.mxu0 %v4212_v7 }
 0x2f8   :  { %600 = vmatpush1.msra.mxu0 %v4215_v8 }
 0x2f9   :  { %601 = vmatprep.subr.mxu0 %v4218_v9 }
 0x2fa   :  { %602 = vmatpush1.msra.mxu0 %v4221_v10 }
 0x2fb   :  { %603 = vmatprep.subr.mxu0 %v4224_v11 }
 0x2fc   :  { %604 = vmatpush1.msra.mxu0 %v4227_v12 }
 0x2fd   :  { %605 = vmatprep.subr.mxu0 %v4230_v13 }
 0x2fe   :  { %606 = vmatpush1.msra.mxu0 %v4235_v15 }
 0x2ff   :  { %607 = vmatprep.subr.mxu0 %v4239_v16 }
 0x300   :  { %608 = vmatpush1.msra.mxu0 %v4242_v17 }
 0x301   :  { %609 = vmatprep.subr.mxu0 %v4245_v18 }
 0x302   :  { %610 = vmatpush1.msra.mxu0 %v4248_v19 }
 0x303   :  { %611 = vmatprep.subr.mxu0 %v4251_v20 }
 0x304   :  { %612 = vmatpush1.msra.mxu0 %v4254_v21 }
 0x305   :  { %613 = vmatprep.subr.mxu0 %v4257_v22 }
 0x306   :  { %614 = vmatpush1.msra.mxu0 %v4260_v23 }
 0x307   :  { %615 = vmatprep.subr.mxu0 %v4263_v24 }
 0x308   :  { %616 = vmatpush1.msra.mxu0 %v4266_v25 }
 0x309   :  { %617 = vmatprep.subr.mxu0 %v4269_v26 }
 0x30a   :  { %618 = vmatpush1.msra.mxu0 %v4272_v27 }
 0x30b   :  { %3545 = vmatprep.subr.mxu0 %v5367_v1 }
 0x3b3   :  { %v452_v53 = vpop.f32.mrf.mxu0 }
 0x3b4   :  { %v453_v54 = vadd.f32 %v452_v53, %v285_v51  ;;  %v4432_v51 = vld [vmem:[#allocation6] sm:$0xff] }
 0x3b5   :  { %v3506_v55 = vpop.f32.mrf.mxu0  ;;  %3514 = vmatpush3.msra.mxu1 %v4432_v51 }
 0x3b6   :  { %v456_v56 = vadd.f32 %v4362_v52, %v453_v54  ;;  %3518 = vmatprep.subr.mxu1 %v5367_v1  ;;  %v354_v55 = vpop.f32.mrf.mxu1 }
 0x3b8   :  { %3905 = vtanh.f32 %v456_v56  ;;  %v3495_v56 = vpop.f32.mrf.mxu1 }
 0x3c5   :  { %v3906_v57 = vpop.eup %3905 }
 0x3c6   :  { %462 = vrot.lane.b32.xlu1 %v3906_v57, %s4122_s14  ;;  %v458_v58 = vmul.f32 0.5, %v3906_v57 }
 0x3c8   :  { %v459_v59 = vadd.f32 0.5, %v458_v58  ;;  %v4469_v58 = vld [vmem:[%s5363_s7] ss:$0 sm:$0xff] }
 0x3ca   :  { %v460_v62 = vmul.f32 0.0, %v459_v59 }
 0x438   :  { %v463_v60 = vpop.permute.xlu1 %462 }
 0x439   :  { %v465_v61 = vmul.f32 %v463_v60, %v459_v59 }
 0x43b   :  { %467 = vrot.lane.b32.xlu0 %v465_v61, %s4123_s15 }
 0x4ad   :  { %v468_v63 = vpop.permute.xlu0 %467 }
 0x4ae   :  { %v4367_v0 = vadd.f32 %v468_v63, %v460_v62 }
 0x4b0   :  { %3907 = vtanh.f32 %v4367_v0 }
 0x4bd   :  { %v3908_v35 = vpop.eup %3907 }
 0x4be   :  { %473 = vrot.lane.b32.xlu1 %v3908_v35, %s4122_s14 }
 0x530   :  { %v474_v53 = vpop.permute.xlu1 %473 }
 0x531   :  { %v476_v54 = vmul.f32 %v474_v53, %v459_v59 }
 0x533   :  { %478 = vrot.lane.b32.xlu0 %v476_v54, %s4123_s15 }
 0x5a5   :  { %v479_v57 = vpop.permute.xlu0 %478 }
 0x5a6   :  { %3516 = vmatmul.mubr.msk.f32.vlgmr.msra.gmra.mxu1 %vm383_vm1, %v479_v57 }
 0x5a7   :  { %3519 = vmatpush3.msra.mxu1 %v4370_v2  ;;  %3542 = vmatprep.mubr.msk.f32.mxu1 %vm4124_vm0, %v5367_v1 }
 0x5a8   :  { %3520 = vmatprep.subr.mxu1 %v5367_v1 }
 0x5a9   :  { %3521 = vmatpush3.msra.mxu1 %v4372_v28 }
 0x5aa   :  { %3522 = vmatprep.subr.mxu1 %v5367_v1 }
 0x5ab   :  { %3523 = vmatpush3.msra.mxu1 %v4376_v30 }
 0x5ac   :  { %3524 = vmatprep.subr.mxu1 %v5367_v1 }
 0x5ad   :  { %3525 = vmatpush3.msra.mxu1 %v4380_v32 }
 0x5ae   :  { %3526 = vmatprep.subr.mxu1 %v5367_v1 }
 0x5af   :  { %3527 = vmatpush3.msra.mxu1 %v4384_v33 }
 0x5b0   :  { %3528 = vmatprep.subr.mxu1 %v5367_v1 }
 0x5b1   :  { %3529 = vmatpush3.msra.mxu1 %v4388_v34 }
 0x5b2   :  { %3530 = vmatprep.subr.mxu1 %v5367_v1 }
 0x5b3   :  { %3531 = vmatpush3.msra.mxu1 %v4392_v36 }
 0x5b4   :  { %3532 = vmatprep.subr.mxu1 %v5367_v1 }
 0x5b5   :  { %3533 = vmatpush3.msra.mxu1 %v4397_v37 }
 0x5b6   :  { %3534 = vmatprep.subr.mxu1 %v5367_v1 }
 0x5b7   :  { %3535 = vmatpush3.msra.mxu1 %v4401_v38 }
 0x5b8   :  { %3536 = vmatprep.subr.mxu1 %v5367_v1 }
 0x5b9   :  { %3537 = vmatpush3.msra.mxu1 %v4405_v39 }
 0x5ba   :  { %3538 = vmatprep.subr.mxu1 %v5367_v1 }
 0x5bb   :  { %3539 = vmatpush3.msra.mxu1 %v4409_v40 }
 0x5bc   :  { %3540 = vmatprep.subr.mxu1 %v5367_v1 }
 0x5bd   :  { %3541 = vmatpush3.msra.mxu1 %v4413_v41 }
 0x5be   :  { %3556 = vmatprep.subr.mxu1 %v5367_v1 }
 0x666   :  { %v548_v59 = vpop.f32.mrf.mxu1 }
 0x667   :  { %v549_v60 = vadd.f32 %v548_v59, %v354_v55  ;;  %v4125_v59 = vmov 1  }
 0x668   :  { %v3517_v61 = vpop.f32.mrf.mxu1  ;;  %3893 = vset.pattern.permute.xlu0 %v4125_v59 }
 0x669   :  { %v552_v62 = vadd.f32 %v4469_v58, %v549_v60 }
 0x66b   :  { %3909 = vtanh.f32 %v552_v62 }
 0x678   :  { %v3910_v63 = vpop.eup %3909 }
 0x679   :  { %558 = vrot.lane.b32.xlu1 %v3910_v63, %s4122_s14  ;;  %v554_v35 = vmul.f32 0.5, %v3910_v63  ;;  %v5384_v63 = vmov 0.0  }
 0x67b   :  { %v555_v53 = vadd.f32 0.5, %v554_v35 }
 0x67d   :  { %v556_v1 = vmul.f32 0.0, %v555_v53 }
 0x6eb   :  { %v559_v56 = vpop.permute.xlu1 %558 }
 0x6ec   :  { %v561_v57 = vmul.f32 %v559_v56, %v555_v53 }
 0x6ee   :  { %563 = vrot.lane.b32.xlu0 %v561_v57, %s4123_s15 }
 0x6f2   :  { %574 = vrot.lane.b32.xlu0 %v476_v54, %s4122_s14 }
 0x6f6   :  { %144 = vperm.xlu0 %3893, %v4232_v14  }
 0x760   :  { %v564_v41 = vpop.permute.xlu0 %563 }
 0x761   :  { %v4475_v40 = vadd.f32 %v564_v41, %v556_v1 }
 0x763   :  { %3911 = vtanh.f32 %v4475_v40 }
 0x764   :  { %v575_v62 = vpop.permute.xlu0 %574 }
 0x765   :  { %v581_v1 = vsel %vm383_vm1, %v4330_v50, %v575_v62 }
 0x770   :  { %v3912_v55 = vpop.eup %3911 }
 0x771   :  { %569 = vrot.lane.b32.xlu1 %v3912_v55, %s4122_s14  ;;  %v145_v50 = vpop.permute.xlu0 %144 }
 0x772   :  { %v147_v35 = vmul.f32 %v4282_v29, %v145_v50 }
 0x7e3   :  { %v570_v60 = vpop.permute.xlu1 %569 }
 0x7e4   :  { %v572_v61 = vmul.f32 %v570_v60, %v555_v53  ;;  %v148_v53 = vadd.f32 %v4288_v31, %v147_v35 }
 0x7e6   :  { %578 = vrot.lane.b32.xlu1 %v572_v61, %s4126_s27 }
 0x858   :  { %v579_v41 = vpop.permute.xlu1 %578 }
 0x859   :  { %v583_v54 = vsel %vm582_vm2, %v581_v1, %v579_v41 }
 0x85a   :  { %3250 = vmatmul.mubr.msk.f32.vlgmr.msra.gmra.mxu0 %vm213_vm3, %v583_v54  ;;  %3543 = vmatmul.mubr.msk.f32.vlgmr.msra.gmra.mxu1 %vm213_vm3, %v583_v54 }
 0x85b   :  { %3546 = vmatpush3.msra.mxu0 %v4299_v43  ;;  %3553 = vmatprep.mubr.msk.f32.mxu0 %vm4124_vm0, %v5384_v63 }
 0x85c   :  { %3547 = vmatprep.subr.mxu0 %v5384_v63  ;;  %3557 = vmatpush3.msra.mxu1 %v4417_v47 }
 0x85d   :  { %3548 = vmatpush3.msra.mxu0 %v4304_v44  ;;  %3558 = vmatprep.subr.mxu1 %v5384_v63 }
 0x85e   :  { %3549 = vmatprep.subr.mxu0 %v5384_v63  ;;  %3559 = vmatpush3.msra.mxu1 %v4422_v48 }
 0x85f   :  { %3550 = vmatpush3.msra.mxu0 %v4313_v45  ;;  %3560 = vmatprep.subr.mxu1 %v5384_v63 }
 0x860   :  { %3551 = vmatprep.subr.mxu0 %v5384_v63  ;;  %3561 = vmatpush3.msra.mxu1 %v4428_v49 }
 0x861   :  { %3552 = vmatpush3.msra.mxu0 %v4322_v46  ;;  %3562 = vmatprep.subr.mxu1 %v5384_v63 }
 0x862   :  { %3563 = vmatpush3.msra.mxu1 %v4432_v51  ;;  %3564 = vmatprep.mubr.msk.f32.mxu1 %vm4124_vm0, %v5384_v63 }
 0x863   :  { %963 = vmatprep.subr.mxu0 %v4202_v3  ;;  %3567 = vmatprep.subr.mxu1 %v5384_v63 }
 0x91a   :  { %v653_v56 = vpop.f32.mrf.mxu0  ;;  %v4508_v57 = vpop.f32.mrf.mxu1 }
 0x91b   :  { %v729_v55 = vadd.f32 %v653_v56, %v148_v53 }
 0x91c   :  { %v3544_v59 = vpop.f32.mrf.mxu1 }
 0x91d   :  { %3913 = vtanh.f32 %v729_v55 }
 0x92a   :  { %v3914_v60 = vpop.eup %3913 }
 0x92b   :  { %735 = vrot.lane.b32.xlu1 %v3914_v60, %s4122_s14  ;;  %v731_v61 = vmul.f32 0.5, %v3914_v60 }
 0x92d   :  { %v732_v62 = vadd.f32 0.5, %v731_v61 }
 0x92f   :  { %v733_v54 = vmul.f32 %v732_v62, %v4293_v42  ;;  %v655_v42 = vpop.f32.mrf.mxu0 }
 0x99d   :  { %v736_v1 = vpop.permute.xlu1 %735 }
 0x99e   :  { %v738_v41 = vmul.f32 %v736_v1, %v732_v62 }
 0x9a0   :  { %740 = vrot.lane.b32.xlu1 %v738_v41, %s4123_s15 }
 0xa12   :  { %v741_v50 = vpop.permute.xlu1 %740 }
 0xa13   :  { %v4513_v29 = vadd.f32 %v741_v50, %v733_v54 }
 0xa15   :  { %3915 = vtanh.f32 %v4513_v29 }
 0xa22   :  { %v3916_v35 = vpop.eup %3915 }
 0xa23   :  { %746 = vrot.lane.b32.xlu0 %v3916_v35, %s4122_s14 }
 0xa95   :  { %v747_v53 = vpop.permute.xlu0 %746 }
 0xa96   :  { %v749_v56 = vmul.f32 %v747_v53, %v732_v62 }
 0xa98   :  { %751 = vrot.lane.b32.xlu1 %v749_v56, %s4123_s15 }
 0xb0a   :  { %v4518_v55 = vpop.permute.xlu1 %751 }
 0xb0b   :  { %3554 = vmatmul.mubr.msk.f32.vlgmr.msra.gmra.mxu0 %vm383_vm1, %v4518_v55 }
 0xb0c   :  { %964 = vmatpush1.msra.mxu0 %v4204_v4  ;;  %1019 = vmatprep.mubr.f32.mxu0 %v5384_v63 }
 0xb0d   :  { %965 = vmatprep.subr.mxu0 %v4206_v5 }
 0xb0e   :  { %966 = vmatpush1.msra.mxu0 %v4209_v6 }
 0xb0f   :  { %967 = vmatprep.subr.mxu0 %v4212_v7 }
 0xb10   :  { %968 = vmatpush1.msra.mxu0 %v4215_v8 }
 0xb11   :  { %969 = vmatprep.subr.mxu0 %v4218_v9 }
 0xb12   :  { %970 = vmatpush1.msra.mxu0 %v4221_v10 }
 0xb13   :  { %971 = vmatprep.subr.mxu0 %v4224_v11 }
 0xb14   :  { %972 = vmatpush1.msra.mxu0 %v4227_v12 }
 0xb15   :  { %973 = vmatprep.subr.mxu0 %v4230_v13 }
 0xb16   :  { %974 = vmatpush1.msra.mxu0 %v4235_v15 }
 0xb17   :  { %975 = vmatprep.subr.mxu0 %v4239_v16 }
 0xb18   :  { %976 = vmatpush1.msra.mxu0 %v4242_v17 }
 0xb19   :  { %977 = vmatprep.subr.mxu0 %v4245_v18 }
 0xb1a   :  { %978 = vmatpush1.msra.mxu0 %v4248_v19 }
 0xb1b   :  { %979 = vmatprep.subr.mxu0 %v4251_v20 }
 0xb1c   :  { %980 = vmatpush1.msra.mxu0 %v4254_v21 }
 0xb1d   :  { %981 = vmatprep.subr.mxu0 %v4257_v22 }
 0xb1e   :  { %982 = vmatpush1.msra.mxu0 %v4260_v23 }
 0xb1f   :  { %983 = vmatprep.subr.mxu0 %v4263_v24 }
 0xb20   :  { %984 = vmatpush1.msra.mxu0 %v4266_v25 }
 0xb21   :  { %985 = vmatprep.subr.mxu0 %v4269_v26 }
 0xb22   :  { %986 = vmatpush1.msra.mxu0 %v4272_v27 }
 0xb23   :  { %3594 = vmatprep.subr.mxu0 %v5384_v63 }
 0xbcb   :  { %v821_v59 = vpop.f32.mrf.mxu0 }
 0xbcc   :  { %v822_v60 = vadd.f32 %v821_v59, %v655_v42 }
 0xbcd   :  { %v3555_v61 = vpop.f32.mrf.mxu0 }
 0xbce   :  { %v825_v62 = vadd.f32 %v4362_v52, %v822_v60 }
 0xbd0   :  { %3917 = vtanh.f32 %v825_v62  ;;  %v5386_v62 = vld [vmem:[#allocation14_spill] sm:$0xff] }
 0xbdd   :  { %v3918_v1 = vpop.eup %3917 }
 0xbde   :  { %831 = vrot.lane.b32.xlu0 %v3918_v1, %s4122_s14  ;;  %v827_v41 = vmul.f32 0.5, %v3918_v1 }
 0xbe0   :  { %v828_v54 = vadd.f32 0.5, %v827_v41 }
 0xbe2   :  { %v829_v53 = vmul.f32 %v828_v54, %v4367_v0  ;;  %v5385_v0 = vld [vmem:[#allocation13_spill] sm:$0xff] }
 0xc50   :  { %v832_v50 = vpop.permute.xlu0 %831 }
 0xc51   :  { %v834_v35 = vmul.f32 %v832_v50, %v828_v54 }
 0xc53   :  { %836 = vrot.lane.b32.xlu1 %v834_v35, %s4123_s15 }
 0xcc5   :  { %v837_v56 = vpop.permute.xlu1 %836 }
 0xcc6   :  { %v4551_v27 = vadd.f32 %v837_v56, %v829_v53 }
 0xcc8   :  { %3919 = vtanh.f32 %v4551_v27 }
 0xcd5   :  { %v3920_v42 = vpop.eup %3919 }
 0xcd6   :  { %842 = vrot.lane.b32.xlu0 %v3920_v42, %s4122_s14 }
 0xd48   :  { %v843_v59 = vpop.permute.xlu0 %842 }
 0xd49   :  { %v845_v60 = vmul.f32 %v843_v59, %v828_v54 }
 0xd4b   :  { %847 = vrot.lane.b32.xlu1 %v845_v60, %s4123_s15 }
 0xdbd   :  { %v848_v61 = vpop.permute.xlu1 %847 }
 0xdbe   :  { %3565 = vmatmul.mubr.msk.f32.vlgmr.msra.gmra.mxu1 %vm383_vm1, %v848_v61 }
 0xdbf   :  { %3568 = vmatpush3.msra.mxu1 %v4370_v2  ;;  %3591 = vmatprep.mubr.msk.f32.mxu1 %vm4124_vm0, %v5384_v63 }
 0xdc0   :  { %3569 = vmatprep.subr.mxu1 %v5384_v63 }
 0xdc1   :  { %3570 = vmatpush3.msra.mxu1 %v4372_v28 }
 0xdc2   :  { %3571 = vmatprep.subr.mxu1 %v5384_v63 }
 0xdc3   :  { %3572 = vmatpush3.msra.mxu1 %v4376_v30 }
 0xdc4   :  { %3573 = vmatprep.subr.mxu1 %v5384_v63 }
 0xdc5   :  { %3574 = vmatpush3.msra.mxu1 %v4380_v32 }
 0xdc6   :  { %3575 = vmatprep.subr.mxu1 %v5384_v63 }
 0xdc7   :  { %3576 = vmatpush3.msra.mxu1 %v4384_v33 }
 0xdc8   :  { %3577 = vmatprep.subr.mxu1 %v5384_v63 }
 0xdc9   :  { %3578 = vmatpush3.msra.mxu1 %v4388_v34 }
 0xdca   :  { %3579 = vmatprep.subr.mxu1 %v5384_v63 }
 0xdcb   :  { %3580 = vmatpush3.msra.mxu1 %v4392_v36 }
 0xdcc   :  { %3581 = vmatprep.subr.mxu1 %v5384_v63 }
 0xdcd   :  { %3582 = vmatpush3.msra.mxu1 %v4397_v37 }
 0xdce   :  { %3583 = vmatprep.subr.mxu1 %v5384_v63 }
 0xdcf   :  { %3584 = vmatpush3.msra.mxu1 %v4401_v38 }
 0xdd0   :  { %3585 = vmatprep.subr.mxu1 %v5384_v63 }
 0xdd1   :  { %3586 = vmatpush3.msra.mxu1 %v4405_v39 }
 0xdd2   :  { %3587 = vmatprep.subr.mxu1 %v5384_v63 }
 0xdd3   :  { %3588 = vmatpush3.msra.mxu1 %v5385_v0 }
 0xdd4   :  { %3589 = vmatprep.subr.mxu1 %v5384_v63 }
 0xdd5   :  { %3590 = vmatpush3.msra.mxu1 %v5386_v62 }
 0xdd6   :  { %3605 = vmatprep.subr.mxu1 %v5384_v63 }
 0xe7e   :  { %v917_v1 = vpop.f32.mrf.mxu1 }
 0xe7f   :  { %v918_v41 = vadd.f32 %v917_v1, %v4508_v57  ;;  %v4127_v1 = vmov 2  }
 0xe80   :  { %v3566_v54 = vpop.f32.mrf.mxu1  ;;  %3894 = vset.pattern.permute.xlu1 %v4127_v1 }
 0xe81   :  { %v921_v50 = vadd.f32 %v4469_v58, %v918_v41 }
 0xe83   :  { %3921 = vtanh.f32 %v921_v50 }
 0xe90   :  { %v3922_v35 = vpop.eup %3921 }
 0xe91   :  { %927 = vrot.lane.b32.xlu0 %v3922_v35, %s4122_s14  ;;  %v923_v53 = vmul.f32 0.5, %v3922_v35 }
 0xe93   :  { %v924_v56 = vadd.f32 0.5, %v923_v53 }
 0xe95   :  { %v925_v61 = vmul.f32 %v924_v56, %v4475_v40 }
 0xf03   :  { %v928_v42 = vpop.permute.xlu0 %927 }
 0xf04   :  { %v930_v59 = vmul.f32 %v928_v42, %v924_v56 }
 0xf06   :  { %932 = vrot.lane.b32.xlu1 %v930_v59, %s4123_s15 }
 0xf0a   :  { %943 = vrot.lane.b32.xlu1 %v845_v60, %s4122_s14 }
 0xf0e   :  { %152 = vperm.xlu1 %3894, %v4232_v14  }
 0xf78   :  { %v933_v62 = vpop.permute.xlu1 %932 }
 0xf79   :  { %v4589_v0 = vadd.f32 %v933_v62, %v925_v61 }
 0xf7b   :  { %3923 = vtanh.f32 %v4589_v0 }
 0xf7c   :  { %v944_v50 = vpop.permute.xlu1 %943 }
 0xf7d   :  { %v950_v40 = vsel %vm383_vm1, %v4518_v55, %v944_v50  ;;  %v5387_v55 = vld [vmem:[#allocation12_spill] sm:$0xff] }
 0xf88   :  { %v3924_v57 = vpop.eup %3923 }
 0xf89   :  { %938 = vrot.lane.b32.xlu0 %v3924_v57, %s4122_s14  ;;  %v153_v14 = vpop.permute.xlu1 %152 }
 0xf8a   :  { %v155_v35 = vmul.f32 %v5387_v55, %v153_v14 }
 0xf8c   :  { %v156_v53 = vadd.f32 %v4288_v31, %v155_v35 }
 0xffb   :  { %v939_v41 = vpop.permute.xlu0 %938 }
 0xffc   :  { %v941_v54 = vmul.f32 %v939_v41, %v924_v56 }
 0xffe   :  { %947 = vrot.lane.b32.xlu0 %v941_v54, %s4126_s27 }
0x1070   :  { %v948_v60 = vpop.permute.xlu0 %947 }
0x1071   :  { %v951_v62 = vsel %vm582_vm2, %v950_v40, %v948_v60 }
0x1072   :  { %3254 = vmatmul.mubr.msk.f32.vlgmr.msra.gmra.mxu0 %vm213_vm3, %v951_v62  ;;  %3592 = vmatmul.mubr.msk.f32.vlgmr.msra.gmra.mxu1 %vm213_vm3, %v951_v62 }
0x1073   :  { %3595 = vmatpush3.msra.mxu0 %v4299_v43  ;;  %3602 = vmatprep.mubr.msk.f32.mxu0 %vm4124_vm0, %v5384_v63 }
0x1074   :  { %3596 = vmatprep.subr.mxu0 %v5384_v63  ;;  %3606 = vmatpush3.msra.mxu1 %v4417_v47 }
0x1075   :  { %3597 = vmatpush3.msra.mxu0 %v4304_v44  ;;  %3607 = vmatprep.subr.mxu1 %v5384_v63 }
0x1076   :  { %3598 = vmatprep.subr.mxu0 %v5384_v63  ;;  %3608 = vmatpush3.msra.mxu1 %v4422_v48 }
0x1077   :  { %3599 = vmatpush3.msra.mxu0 %v4313_v45  ;;  %3609 = vmatprep.subr.mxu1 %v5384_v63 }
0x1078   :  { %3600 = vmatprep.subr.mxu0 %v5384_v63  ;;  %3610 = vmatpush3.msra.mxu1 %v4428_v49 }
0x1079   :  { %3601 = vmatpush3.msra.mxu0 %v4322_v46  ;;  %3611 = vmatprep.subr.mxu1 %v5384_v63 }
0x107a   :  { %3612 = vmatpush3.msra.mxu1 %v4432_v51  ;;  %3613 = vmatprep.mubr.msk.f32.mxu1 %vm4124_vm0, %v5384_v63 }
0x107b   :  { %1331 = vmatprep.subr.mxu0 %v4202_v3  ;;  %3616 = vmatprep.subr.mxu1 %v5384_v63 }
0x1132   :  { %v1021_v56 = vpop.f32.mrf.mxu0  ;;  %v4622_v42 = vpop.f32.mrf.mxu1 }
0x1133   :  { %v1097_v59 = vadd.f32 %v1021_v56, %v156_v53 }
0x1134   :  { %v3593_v61 = vpop.f32.mrf.mxu1 }
0x1135   :  { %3925 = vtanh.f32 %v1097_v59 }
0x1142   :  { %v3926_v57 = vpop.eup %3925 }
0x1143   :  { %1103 = vrot.lane.b32.xlu0 %v3926_v57, %s4122_s14  ;;  %v1099_v1 = vmul.f32 0.5, %v3926_v57 }
0x1145   :  { %v1100_v41 = vadd.f32 0.5, %v1099_v1 }
0x1147   :  { %v1101_v50 = vmul.f32 %v1100_v41, %v4513_v29 }
0x11b5   :  { %v1104_v54 = vpop.permute.xlu0 %1103 }
0x11b6   :  { %v1106_v3 = vmul.f32 %v1104_v54, %v1100_v41  ;;  %v4707_v54 = vld [vmem:[#allocation4] sm:$0xff] }
0x11b8   :  { %1108 = vrot.lane.b32.xlu1 %v1106_v3, %s4123_s15 }
0x122a   :  { %v1109_v40 = vpop.permute.xlu1 %1108 }
0x122b   :  { %v4627_v60 = vadd.f32 %v1109_v40, %v1101_v50 }
0x122d   :  { %3927 = vtanh.f32 %v4627_v60 }
0x123a   :  { %v3928_v31 = vpop.eup %3927 }
0x123b   :  { %1114 = vrot.lane.b32.xlu0 %v3928_v31, %s4122_s14 }
0x12ad   :  { %v1115_v62 = vpop.permute.xlu0 %1114 }
0x12ae   :  { %v1117_v14 = vmul.f32 %v1115_v62, %v1100_v41  ;;  %v4128_v41 = vmov 3  }
0x12af   :  { %3895 = vset.pattern.permute.xlu1 %v4128_v41  ;;  %v4819_v41 = vld [vmem:[#allocation8 + $0x30] sm:$0xff] }
0x12b0   :  { %1119 = vrot.lane.b32.xlu1 %v1117_v14, %s4123_s15 }
0x1322   :  { %v4632_v55 = vpop.permute.xlu1 %1119 }
0x1323   :  { %3603 = vmatmul.mubr.msk.f32.vlgmr.msra.gmra.mxu0 %vm383_vm1, %v4632_v55 }
0x1324   :  { %1332 = vmatpush1.msra.mxu0 %v4204_v4  ;;  %1387 = vmatprep.mubr.f32.mxu0 %v5384_v63  ;;  %v5388_v4 = vld [vmem:[#allocation11_spill] sm:$0xff] }
0x1325   :  { %1333 = vmatprep.subr.mxu0 %v4206_v5  ;;  %v1023_v5 = vpop.f32.mrf.mxu0 }
0x1326   :  { %1334 = vmatpush1.msra.mxu0 %v4209_v6 }
0x1327   :  { %1335 = vmatprep.subr.mxu0 %v4212_v7 }
0x1328   :  { %1336 = vmatpush1.msra.mxu0 %v4215_v8 }
0x1329   :  { %1337 = vmatprep.subr.mxu0 %v4218_v9 }
0x132a   :  { %1338 = vmatpush1.msra.mxu0 %v4221_v10 }
0x132b   :  { %1339 = vmatprep.subr.mxu0 %v4224_v11 }
0x132c   :  { %1340 = vmatpush1.msra.mxu0 %v4227_v12 }
0x132d   :  { %1341 = vmatprep.subr.mxu0 %v4230_v13 }
0x132e   :  { %1342 = vmatpush1.msra.mxu0 %v4235_v15 }
0x132f   :  { %1343 = vmatprep.subr.mxu0 %v4239_v16 }
0x1330   :  { %1344 = vmatpush1.msra.mxu0 %v4242_v17 }
0x1331   :  { %1345 = vmatprep.subr.mxu0 %v4245_v18 }
0x1332   :  { %1346 = vmatpush1.msra.mxu0 %v4248_v19 }
0x1333   :  { %1347 = vmatprep.subr.mxu0 %v4251_v20 }
0x1334   :  { %1348 = vmatpush1.msra.mxu0 %v4254_v21 }
0x1335   :  { %1349 = vmatprep.subr.mxu0 %v4257_v22 }
0x1336   :  { %1350 = vmatpush1.msra.mxu0 %v4260_v23  ;;  %v5389_v23 = vld [vmem:[#allocation13_spill] sm:$0xff] }
0x1337   :  { %1351 = vmatprep.subr.mxu0 %v4263_v24  ;;  %v5390_v24 = vld [vmem:[#allocation14_spill] sm:$0xff] }
0x1338   :  { %1352 = vmatpush1.msra.mxu0 %v4266_v25 }
0x1339   :  { %1353 = vmatprep.subr.mxu0 %v4269_v26 }
0x133a   :  { %1354 = vmatpush1.msra.mxu0 %v5388_v4 }
0x133b   :  { %3643 = vmatprep.subr.mxu0 %v5384_v63 }
0x13e3   :  { %v1189_v6 = vpop.f32.mrf.mxu0 }
0x13e4   :  { %v1190_v7 = vadd.f32 %v1189_v6, %v1023_v5 }
0x13e5   :  { %v3604_v8 = vpop.f32.mrf.mxu0 }
0x13e6   :  { %v1193_v9 = vadd.f32 %v4362_v52, %v1190_v7 }
0x13e8   :  { %3929 = vtanh.f32 %v1193_v9 }
0x13f5   :  { %v3930_v10 = vpop.eup %3929 }
0x13f6   :  { %1199 = vrot.lane.b32.xlu0 %v3930_v10, %s4122_s14  ;;  %v1195_v11 = vmul.f32 0.5, %v3930_v10 }
0x13f8   :  { %v1196_v12 = vadd.f32 0.5, %v1195_v11 }
0x13fa   :  { %v1197_v16 = vmul.f32 %v1196_v12, %v4551_v27 }
0x1468   :  { %v1200_v13 = vpop.permute.xlu0 %1199 }
0x1469   :  { %v1202_v15 = vmul.f32 %v1200_v13, %v1196_v12 }
0x146b   :  { %1204 = vrot.lane.b32.xlu1 %v1202_v15, %s4123_s15 }
0x14dd   :  { %v1205_v17 = vpop.permute.xlu1 %1204 }
0x14de   :  { %v4665_v18 = vadd.f32 %v1205_v17, %v1197_v16  ;;  %v4764_v17 = vld [vmem:[#allocation8 + $0x108] sm:$0xff] }
0x14e0   :  { %3931 = vtanh.f32 %v4665_v18 }
0x14ed   :  { %v3932_v19 = vpop.eup %3931 }
0x14ee   :  { %1210 = vrot.lane.b32.xlu0 %v3932_v19, %s4122_s14  ;;  %v4771_v19 = vld [vmem:[#allocation8 + $0xf0] sm:$0xff] }
0x1560   :  { %v1211_v20 = vpop.permute.xlu0 %1210 }
0x1561   :  { %v1213_v21 = vmul.f32 %v1211_v20, %v1196_v12  ;;  %v4774_v20 = vld [vmem:[#allocation8 + $0xe0] sm:$0xff] }
0x1563   :  { %1215 = vrot.lane.b32.xlu1 %v1213_v21, %s4123_s15 }
0x15d5   :  { %v1216_v22 = vpop.permute.xlu1 %1215 }
0x15d6   :  { %3614 = vmatmul.mubr.msk.f32.vlgmr.msra.gmra.mxu1 %vm383_vm1, %v1216_v22  ;;  %v4780_v22 = vld [vmem:[#allocation8 + $0xc8] sm:$0xff] }
0x15d7   :  { %3617 = vmatpush3.msra.mxu1 %v4370_v2  ;;  %3640 = vmatprep.mubr.msk.f32.mxu1 %vm4124_vm0, %v5384_v63 }
0x15d8   :  { %3618 = vmatprep.subr.mxu1 %v5384_v63 }
0x15d9   :  { %3619 = vmatpush3.msra.mxu1 %v4372_v28 }
0x15da   :  { %3620 = vmatprep.subr.mxu1 %v5384_v63 }
0x15db   :  { %3621 = vmatpush3.msra.mxu1 %v4376_v30 }
0x15dc   :  { %3622 = vmatprep.subr.mxu1 %v5384_v63 }
0x15dd   :  { %3623 = vmatpush3.msra.mxu1 %v4380_v32 }
0x15de   :  { %3624 = vmatprep.subr.mxu1 %v5384_v63 }
0x15df   :  { %3625 = vmatpush3.msra.mxu1 %v4384_v33 }
0x15e0   :  { %3626 = vmatprep.subr.mxu1 %v5384_v63 }
0x15e1   :  { %3627 = vmatpush3.msra.mxu1 %v4388_v34 }
0x15e2   :  { %3628 = vmatprep.subr.mxu1 %v5384_v63 }
0x15e3   :  { %3629 = vmatpush3.msra.mxu1 %v4392_v36 }
0x15e4   :  { %3630 = vmatprep.subr.mxu1 %v5384_v63 }
0x15e5   :  { %3631 = vmatpush3.msra.mxu1 %v4397_v37 }
0x15e6   :  { %3632 = vmatprep.subr.mxu1 %v5384_v63 }
0x15e7   :  { %3633 = vmatpush3.msra.mxu1 %v4401_v38 }
0x15e8   :  { %3634 = vmatprep.subr.mxu1 %v5384_v63 }
0x15e9   :  { %3635 = vmatpush3.msra.mxu1 %v4405_v39 }
0x15ea   :  { %3636 = vmatprep.subr.mxu1 %v5384_v63 }
0x15eb   :  { %3637 = vmatpush3.msra.mxu1 %v5389_v23 }
0x15ec   :  { %3638 = vmatprep.subr.mxu1 %v5384_v63 }
0x15ed   :  { %3639 = vmatpush3.msra.mxu1 %v5390_v24 }
0x15ee   :  { %3654 = vmatprep.subr.mxu1 %v5384_v63 }
0x1696   :  { %v1285_v25 = vpop.f32.mrf.mxu1 }
0x1697   :  { %v1286_v26 = vadd.f32 %v1285_v25, %v4622_v42  ;;  %v4783_v25 = vld [vmem:[#allocation8 + $0xc0] sm:$0xff] }
0x1698   :  { %v3615_v27 = vpop.f32.mrf.mxu1 }
0x1699   :  { %v1289_v29 = vadd.f32 %v4469_v58, %v1286_v26  ;;  %v4786_v26 = vld [vmem:[#allocation8 + $0xb0] sm:$0xff]  ;;  %v4789_v27 = vld [vmem:[#allocation8 + $0xa8] sm:$0xff] }
0x169b   :  { %3933 = vtanh.f32 %v1289_v29  ;;  %v4792_v29 = vld [vmem:[#allocation8 + $0x98] sm:$0xff] }
0x16a8   :  { %v3934_v28 = vpop.eup %3933 }
0x16a9   :  { %1295 = vrot.lane.b32.xlu0 %v3934_v28, %s4122_s14  ;;  %v1291_v35 = vmul.f32 0.5, %v3934_v28  ;;  %v4795_v28 = vld [vmem:[#allocation8 + $0x90] sm:$0xff] }
0x16ab   :  { %v1292_v53 = vadd.f32 0.5, %v1291_v35  ;;  %v4798_v35 = vld [vmem:[#allocation8 + $0x80] sm:$0xff] }
0x16ad   :  { %v1293_v61 = vmul.f32 %v1292_v53, %v4589_v0 }
0x171b   :  { %v1296_v56 = vpop.permute.xlu0 %1295 }
0x171c   :  { %v1298_v59 = vmul.f32 %v1296_v56, %v1292_v53  ;;  %v4804_v56 = vld [vmem:[#allocation8 + $0x68] sm:$0xff] }
0x171e   :  { %1300 = vrot.lane.b32.xlu1 %v1298_v59, %s4123_s15  ;;  %v4807_v59 = vld [vmem:[#allocation8 + $0x60] sm:$0xff] }
0x1722   :  { %1311 = vrot.lane.b32.xlu1 %v1213_v21, %s4122_s14  ;;  %v4777_v21 = vld [vmem:[#allocation8 + $0xd8] sm:$0xff] }
0x1726   :  { %160 = vperm.xlu1 %3895, %v4707_v54  }
0x1790   :  { %v1301_v57 = vpop.permute.xlu1 %1300 }
0x1791   :  { %v4703_v1 = vadd.f32 %v1301_v57, %v1293_v61  ;;  %v4810_v61 = vld [vmem:[#allocation8 + $0x50] sm:$0xff]  ;;  %v4813_v57 = vld [vmem:[#allocation8 + $0x48] sm:$0xff] }
0x1793   :  { %3935 = vtanh.f32 %v4703_v1 }
0x1794   :  { %v1312_v40 = vpop.permute.xlu1 %1311 }
0x1795   :  { %v1318_v0 = vsel %vm383_vm1, %v4632_v55, %v1312_v40  ;;  %v4828_v40 = vld [vmem:[#allocation8 + $0x8] sm:$0xff] }
0x17a0   :  { %v3936_v42 = vpop.eup %3935 }
0x17a1   :  { %1306 = vrot.lane.b32.xlu0 %v3936_v42, %s4122_s14  ;;  %v4816_v42 = vld [vmem:[#allocation8 + $0x38] sm:$0xff] }
0x1813   :  { %v1307_v3 = vpop.permute.xlu0 %1306 }
0x1814   :  { %v1309_v50 = vmul.f32 %v1307_v3, %v1292_v53  ;;  %v4801_v53 = vld [vmem:[#allocation8 + $0x78] sm:$0xff]  ;;  %v4822_v3 = vld [vmem:[#allocation8 + $0x20] sm:$0xff] }
0x1816   :  { %1315 = vrot.lane.b32.xlu0 %v1309_v50, %s4126_s27  ;;  %v4825_v50 = vld [vmem:[#allocation8 + $0x18] sm:$0xff] }
0x1888   :  { %v1316_v31 = vpop.permute.xlu0 %1315 }
0x1889   :  { %v1319_v62 = vsel %vm582_vm2, %v1318_v0, %v1316_v31  ;;  %v4831_v0 = vld [vmem:[#allocation8] sm:$0xff] }
0x188a   :  { %3258 = vmatmul.mubr.msk.f32.vlgmr.msra.gmra.mxu0 %vm213_vm3, %v1319_v62  ;;  %3641 = vmatmul.mubr.msk.f32.vlgmr.msra.gmra.mxu1 %vm213_vm3, %v1319_v62  ;;  %5393 = vst [vmem:[#allocation13_spill] sm:$0xff] %v4831_v0 }
0x188b   :  { %3644 = vmatpush3.msra.mxu0 %v4299_v43  ;;  %3651 = vmatprep.mubr.msk.f32.mxu0 %vm4124_vm0, %v5384_v63  ;;  %v4734_v43 = vld [vmem:[#allocation8 + $0x110] sm:$0xff] }
0x188c   :  { %3645 = vmatprep.subr.mxu0 %v5384_v63  ;;  %3655 = vmatpush3.msra.mxu1 %v4417_v47  ;;  %5391 = vst [vmem:[#allocation12_spill] sm:$0xff] %v4734_v43  ;;  %v4747_v47 = vld [vmem:[%s5361_s5] ss:$0 sm:$0xff] }
0x188d   :  { %3646 = vmatpush3.msra.mxu0 %v4304_v44  ;;  %3656 = vmatprep.subr.mxu1 %v5384_v63  ;;  %v161_v44 = vpop.permute.xlu1 %160 }
0x188e   :  { %3647 = vmatprep.subr.mxu0 %v5384_v63  ;;  %3657 = vmatpush3.msra.mxu1 %v4422_v48 }
0x188f   :  { %3648 = vmatpush3.msra.mxu0 %v4313_v45  ;;  %3658 = vmatprep.subr.mxu1 %v5384_v63  ;;  %v4741_v45 = vld [vmem:[%s5357_s1] ss:$0 sm:$0xff] }
0x1890   :  { %3649 = vmatprep.subr.mxu0 %v5384_v63  ;;  %3659 = vmatpush3.msra.mxu1 %v4428_v49  ;;  %5392 = vst [vmem:[#allocation11_spill] sm:$0xff] %v4741_v45 }
0x1891   :  { %3650 = vmatpush3.msra.mxu0 %v4322_v46  ;;  %3660 = vmatprep.subr.mxu1 %v5384_v63  ;;  %v163_v46 = vmul.f32 %v4741_v45, %v161_v44 }
0x1892   :  { %3661 = vmatpush3.msra.mxu1 %v4432_v51  ;;  %3662 = vmatprep.mubr.msk.f32.mxu1 %vm4124_vm0, %v5384_v63 }
0x1893   :  { %1699 = vmatprep.subr.mxu0 %v4734_v43  ;;  %3665 = vmatprep.subr.mxu1 %v5384_v63  ;;  %v164_v48 = vadd.f32 %v4747_v47, %v163_v46 }
0x194a   :  { %v1389_v49 = vpop.f32.mrf.mxu0  ;;  %v4750_v51 = vpop.f32.mrf.mxu1 }
0x194b   :  { %v1465_v14 = vadd.f32 %v1389_v49, %v164_v48 }
0x194c   :  { %v3642_v55 = vpop.f32.mrf.mxu1  ;;  %v1391_v31 = vpop.f32.mrf.mxu0 }
0x194d   :  { %3937 = vtanh.f32 %v1465_v14 }
0x195a   :  { %v3938_v4 = vpop.eup %3937 }
0x195b   :  { %1471 = vrot.lane.b32.xlu0 %v3938_v4, %s4122_s14  ;;  %v1467_v5 = vmul.f32 0.5, %v3938_v4 }
0x195d   :  { %v1468_v6 = vadd.f32 0.5, %v1467_v5 }
0x195f   :  { %v1469_v9 = vmul.f32 %v1468_v6, %v4627_v60  ;;  %v4768_v60 = vld [vmem:[#allocation8 + $0xf8] sm:$0xff] }
0x19cd   :  { %v1472_v7 = vpop.permute.xlu0 %1471 }
0x19ce   :  { %v1474_v8 = vmul.f32 %v1472_v7, %v1468_v6 }
0x19d0   :  { %1476 = vrot.lane.b32.xlu1 %v1474_v8, %s4123_s15 }
0x1a42   :  { %v1477_v10 = vpop.permute.xlu1 %1476 }
0x1a43   :  { %v4755_v11 = vadd.f32 %v1477_v10, %v1469_v9 }
0x1a45   :  { %3939 = vtanh.f32 %v4755_v11 }
0x1a52   :  { %v3940_v12 = vpop.eup %3939 }
0x1a53   :  { %1482 = vrot.lane.b32.xlu0 %v3940_v12, %s4122_s14 }
0x1ac5   :  { %v1483_v13 = vpop.permute.xlu0 %1482 }
0x1ac6   :  { %v1485_v15 = vmul.f32 %v1483_v13, %v1468_v6 }
0x1ac8   :  { %1487 = vrot.lane.b32.xlu1 %v1485_v15, %s4123_s15 }
0x1b3a   :  { %v4760_v16 = vpop.permute.xlu1 %1487 }
0x1b3b   :  { %3652 = vmatmul.mubr.msk.f32.vlgmr.msra.gmra.mxu0 %vm383_vm1, %v4760_v16 }
0x1b3c   :  { %1700 = vmatpush1.msra.mxu0 %v4764_v17  ;;  %1755 = vmatprep.mubr.f32.mxu0 %v5384_v63 }
0x1b3d   :  { %1701 = vmatprep.subr.mxu0 %v4768_v60 }
0x1b3e   :  { %1702 = vmatpush1.msra.mxu0 %v4771_v19 }
0x1b3f   :  { %1703 = vmatprep.subr.mxu0 %v4774_v20 }
0x1b40   :  { %1704 = vmatpush1.msra.mxu0 %v4777_v21 }
0x1b41   :  { %1705 = vmatprep.subr.mxu0 %v4780_v22 }
0x1b42   :  { %1706 = vmatpush1.msra.mxu0 %v4783_v25 }
0x1b43   :  { %1707 = vmatprep.subr.mxu0 %v4786_v26 }
0x1b44   :  { %1708 = vmatpush1.msra.mxu0 %v4789_v27 }
0x1b45   :  { %1709 = vmatprep.subr.mxu0 %v4792_v29 }
0x1b46   :  { %1710 = vmatpush1.msra.mxu0 %v4795_v28 }
0x1b47   :  { %1711 = vmatprep.subr.mxu0 %v4798_v35 }
0x1b48   :  { %1712 = vmatpush1.msra.mxu0 %v4801_v53 }
0x1b49   :  { %1713 = vmatprep.subr.mxu0 %v4804_v56 }
0x1b4a   :  { %1714 = vmatpush1.msra.mxu0 %v4807_v59 }
0x1b4b   :  { %1715 = vmatprep.subr.mxu0 %v4810_v61 }
0x1b4c   :  { %1716 = vmatpush1.msra.mxu0 %v4813_v57 }
0x1b4d   :  { %1717 = vmatprep.subr.mxu0 %v4816_v42 }
0x1b4e   :  { %1718 = vmatpush1.msra.mxu0 %v4819_v41 }
0x1b4f   :  { %1719 = vmatprep.subr.mxu0 %v4822_v3 }
0x1b50   :  { %1720 = vmatpush1.msra.mxu0 %v4825_v50 }
0x1b51   :  { %1721 = vmatprep.subr.mxu0 %v4828_v40 }
0x1b52   :  { %1722 = vmatpush1.msra.mxu0 %v4831_v0 }
0x1b53   :  { %3692 = vmatprep.subr.mxu0 %v5384_v63 }
0x1bfb   :  { %v1557_v62 = vpop.f32.mrf.mxu0 }
0x1bfc   :  { %v1558_v44 = vadd.f32 %v1557_v62, %v1391_v31 }
0x1bfd   :  { %v3653_v46 = vpop.f32.mrf.mxu0 }
0x1bfe   :  { %v1561_v48 = vadd.f32 %v4362_v52, %v1558_v44 }
0x1c00   :  { %3941 = vtanh.f32 %v1561_v48  ;;  %v4893_v48 = vld [vmem:[%s5358_s2 + $0x18] sm:$0xff] }
0x1c0d   :  { %v3942_v49 = vpop.eup %3941 }
0x1c0e   :  { %1567 = vrot.lane.b32.xlu0 %v3942_v49, %s4122_s14  ;;  %v1563_v14 = vmul.f32 0.5, %v3942_v49  ;;  %v4905_v49 = vld [vmem:[%s5358_s2 + $0x10] sm:$0xff] }
0x1c10   :  { %v1564_v55 = vadd.f32 0.5, %v1563_v14  ;;  %v4910_v14 = vld [vmem:[#allocation6 + $0x10] sm:$0xff] }
0x1c12   :  { %v1565_v6 = vmul.f32 %v1564_v55, %v4665_v18  ;;  %v4849_v18 = vld [vmem:[#allocation8 + $0x100] sm:$0xff] }
0x1c80   :  { %v1568_v4 = vpop.permute.xlu0 %1567 }
0x1c81   :  { %v1570_v5 = vmul.f32 %v1568_v4, %v1564_v55  ;;  %v4921_v4 = vld [vmem:[#allocation6 + $0x8] sm:$0xff] }
0x1c83   :  { %1572 = vrot.lane.b32.xlu1 %v1570_v5, %s4123_s15  ;;  %v4927_v5 = vld [vmem:[%s5358_s2] sm:$0xff] }
0x1cf5   :  { %v1573_v7 = vpop.permute.xlu1 %1572 }
0x1cf6   :  { %v4839_v8 = vadd.f32 %v1573_v7, %v1565_v6  ;;  %v4931_v6 = vld [vmem:[#allocation6] sm:$0xff] }
0x1cf8   :  { %3943 = vtanh.f32 %v4839_v8 }
0x1d05   :  { %v3944_v9 = vpop.eup %3943 }
0x1d06   :  { %1578 = vrot.lane.b32.xlu0 %v3944_v9, %s4122_s14 }
0x1d78   :  { %v1579_v52 = vpop.permute.xlu0 %1578 }
0x1d79   :  { %v1581_v10 = vmul.f32 %v1579_v52, %v1564_v55  ;;  %v4916_v55 = vld [vmem:[%s5358_s2 + $0x8] sm:$0xff] }
0x1d7b   :  { %1583 = vrot.lane.b32.xlu1 %v1581_v10, %s4123_s15 }
0x1ded   :  { %v1584_v12 = vpop.permute.xlu1 %1583 }
0x1dee   :  { %3663 = vmatmul.mubr.msk.f32.vlgmr.msra.gmra.mxu1 %vm383_vm1, %v1584_v12 }
0x1def   :  { %3666 = vmatpush3.msra.mxu1 %v4370_v2  ;;  %3689 = vmatprep.mubr.msk.f32.mxu1 %vm4124_vm0, %v5384_v63 }
0x1df0   :  { %3667 = vmatprep.subr.mxu1 %v5384_v63 }
0x1df1   :  { %3668 = vmatpush3.msra.mxu1 %v4849_v18 }
0x1df2   :  { %3669 = vmatprep.subr.mxu1 %v5384_v63 }
0x1df3   :  { %3670 = vmatpush3.msra.mxu1 %v4376_v30 }
0x1df4   :  { %3671 = vmatprep.subr.mxu1 %v5384_v63 }
0x1df5   :  { %3672 = vmatpush3.msra.mxu1 %v4380_v32 }
0x1df6   :  { %3673 = vmatprep.subr.mxu1 %v5384_v63 }
0x1df7   :  { %3674 = vmatpush3.msra.mxu1 %v4384_v33 }
0x1df8   :  { %3675 = vmatprep.subr.mxu1 %v5384_v63 }
0x1df9   :  { %3676 = vmatpush3.msra.mxu1 %v4388_v34 }
0x1dfa   :  { %3677 = vmatprep.subr.mxu1 %v5384_v63 }
0x1dfb   :  { %3678 = vmatpush3.msra.mxu1 %v4392_v36 }
0x1dfc   :  { %3679 = vmatprep.subr.mxu1 %v5384_v63 }
0x1dfd   :  { %3680 = vmatpush3.msra.mxu1 %v4397_v37 }
0x1dfe   :  { %3681 = vmatprep.subr.mxu1 %v5384_v63 }
0x1dff   :  { %3682 = vmatpush3.msra.mxu1 %v4401_v38 }
0x1e00   :  { %3683 = vmatprep.subr.mxu1 %v5384_v63 }
0x1e01   :  { %3684 = vmatpush3.msra.mxu1 %v4405_v39 }
0x1e02   :  { %3685 = vmatprep.subr.mxu1 %v5384_v63 }
0x1e03   :  { %3686 = vmatpush3.msra.mxu1 %v5389_v23 }
0x1e04   :  { %3687 = vmatprep.subr.mxu1 %v5384_v63 }
0x1e05   :  { %3688 = vmatpush3.msra.mxu1 %v5390_v24 }
0x1e06   :  { %3703 = vmatprep.subr.mxu1 %v5384_v63 }
0x1eae   :  { %v1653_v2 = vpop.f32.mrf.mxu1 }
0x1eaf   :  { %v1654_v30 = vadd.f32 %v1653_v2, %v4750_v51  ;;  %v4129_v51 = vmov 4  }
0x1eb0   :  { %v3664_v32 = vpop.f32.mrf.mxu1  ;;  %3896 = vset.pattern.permute.xlu1 %v4129_v51 }
0x1eb1   :  { %v1657_v33 = vadd.f32 %v4469_v58, %v1654_v30 }
0x1eb3   :  { %3945 = vtanh.f32 %v1657_v33 }
0x1ec0   :  { %v3946_v34 = vpop.eup %3945 }
0x1ec1   :  { %1663 = vrot.lane.b32.xlu0 %v3946_v34, %s4122_s14  ;;  %v1659_v36 = vmul.f32 0.5, %v3946_v34 }
0x1ec3   :  { %v1660_v37 = vadd.f32 0.5, %v1659_v36 }
0x1ec5   :  { %v1661_v23 = vmul.f32 %v1660_v37, %v4703_v1 }
0x1f33   :  { %v1664_v38 = vpop.permute.xlu0 %1663 }
0x1f34   :  { %v1666_v39 = vmul.f32 %v1664_v38, %v1660_v37 }
0x1f36   :  { %1668 = vrot.lane.b32.xlu1 %v1666_v39, %s4123_s15 }
0x1f3a   :  { %1679 = vrot.lane.b32.xlu1 %v1581_v10, %s4122_s14 }
0x1f3e   :  { %168 = vperm.xlu1 %3896, %v4707_v54  }
0x1fa8   :  { %v1669_v24 = vpop.permute.xlu1 %1668 }
0x1fa9   :  { %v4879_v13 = vadd.f32 %v1669_v24, %v1661_v23 }
0x1fab   :  { %3947 = vtanh.f32 %v4879_v13 }
0x1fac   :  { %v1680_v62 = vpop.permute.xlu1 %1679 }
0x1fad   :  { %v1686_v1 = vsel %vm383_vm1, %v4760_v16, %v1680_v62  ;;  %v4899_v16 = vld [vmem:[#allocation6 + $0x18] sm:$0xff] }
0x1fb8   :  { %v3948_v58 = vpop.eup %3947 }
0x1fb9   :  { %1674 = vrot.lane.b32.xlu0 %v3948_v58, %s4122_s14  ;;  %v169_v7 = vpop.permute.xlu1 %168 }
0x1fba   :  { %v171_v9 = vmul.f32 %v4741_v45, %v169_v7 }
0x1fbc   :  { %v172_v52 = vadd.f32 %v4747_v47, %v171_v9 }
0x202b   :  { %v1675_v15 = vpop.permute.xlu0 %1674 }
0x202c   :  { %v1677_v31 = vmul.f32 %v1675_v15, %v1660_v37 }
0x202e   :  { %1683 = vrot.lane.b32.xlu0 %v1677_v31, %s4126_s27 }
0x20a0   :  { %v1684_v44 = vpop.permute.xlu0 %1683 }
0x20a1   :  { %v1687_v46 = vsel %vm582_vm2, %v1686_v1, %v1684_v44  ;;  %v4982_v44 = vld [vmem:[%s5362_s6] ss:$0 sm:$0xff] }
0x20a2   :  { %3262 = vmatmul.mubr.msk.f32.vlgmr.msra.gmra.mxu0 %vm213_vm3, %v1687_v46  ;;  %3690 = vmatmul.mubr.msk.f32.vlgmr.msra.gmra.mxu1 %vm213_vm3, %v1687_v46 }
0x20a3   :  { %3693 = vmatpush3.msra.mxu0 %v4893_v48  ;;  %3700 = vmatprep.mubr.msk.f32.mxu0 %vm4124_vm0, %v5384_v63 }
0x20a4   :  { %3694 = vmatprep.subr.mxu0 %v5384_v63  ;;  %3704 = vmatpush3.msra.mxu1 %v4899_v16 }
0x20a5   :  { %3695 = vmatpush3.msra.mxu0 %v4905_v49  ;;  %3705 = vmatprep.subr.mxu1 %v5384_v63 }
0x20a6   :  { %3696 = vmatprep.subr.mxu0 %v5384_v63  ;;  %3706 = vmatpush3.msra.mxu1 %v4910_v14 }
0x20a7   :  { %3697 = vmatpush3.msra.mxu0 %v4916_v55  ;;  %3707 = vmatprep.subr.mxu1 %v5384_v63 }
0x20a8   :  { %3698 = vmatprep.subr.mxu0 %v5384_v63  ;;  %3708 = vmatpush3.msra.mxu1 %v4921_v4 }
0x20a9   :  { %3699 = vmatpush3.msra.mxu0 %v4927_v5  ;;  %3709 = vmatprep.subr.mxu1 %v5384_v63 }
0x20aa   :  { %3710 = vmatpush3.msra.mxu1 %v4931_v6  ;;  %3711 = vmatprep.mubr.msk.f32.mxu1 %vm4124_vm0, %v5384_v63 }
0x20ab   :  { %2067 = vmatprep.subr.mxu0 %v4734_v43  ;;  %3714 = vmatprep.subr.mxu1 %v5384_v63 }
0x2162   :  { %v1757_v10 = vpop.f32.mrf.mxu0  ;;  %v4940_v12 = vpop.f32.mrf.mxu1 }
0x2163   :  { %v1833_v2 = vadd.f32 %v1757_v10, %v172_v52 }
0x2164   :  { %v3691_v30 = vpop.f32.mrf.mxu1 }
0x2165   :  { %3949 = vtanh.f32 %v1833_v2 }
0x2172   :  { %v3950_v32 = vpop.eup %3949 }
0x2173   :  { %1839 = vrot.lane.b32.xlu0 %v3950_v32, %s4122_s14  ;;  %v1835_v33 = vmul.f32 0.5, %v3950_v32 }
0x2175   :  { %v1836_v34 = vadd.f32 0.5, %v1835_v33 }
0x2177   :  { %v1837_v38 = vmul.f32 %v1836_v34, %v4755_v11  ;;  %v1759_v11 = vpop.f32.mrf.mxu0 }
0x21e5   :  { %v1840_v36 = vpop.permute.xlu0 %1839 }
0x21e6   :  { %v1842_v37 = vmul.f32 %v1840_v36, %v1836_v34 }
0x21e8   :  { %1844 = vrot.lane.b32.xlu1 %v1842_v37, %s4123_s15 }
0x225a   :  { %v1845_v39 = vpop.permute.xlu1 %1844 }
0x225b   :  { %v4945_v23 = vadd.f32 %v1845_v39, %v1837_v38  ;;  %v4994_v39 = vld [vmem:[#allocation8 + $0x118] sm:$0xff] }
0x225d   :  { %3951 = vtanh.f32 %v4945_v23 }
0x226a   :  { %v3952_v24 = vpop.eup %3951 }
0x226b   :  { %1850 = vrot.lane.b32.xlu0 %v3952_v24, %s4122_s14  ;;  %v5006_v24 = vld [vmem:[#allocation8 + $0xd0] sm:$0xff] }
0x22dd   :  { %v1851_v58 = vpop.permute.xlu0 %1850 }
0x22de   :  { %v1853_v51 = vmul.f32 %v1851_v58, %v1836_v34  ;;  %v5010_v58 = vld [vmem:[#allocation8 + $0xb8] sm:$0xff] }
0x22e0   :  { %1855 = vrot.lane.b32.xlu1 %v1853_v51, %s4123_s15  ;;  %v5014_v51 = vld [vmem:[#allocation8 + $0xa0] sm:$0xff] }
0x2352   :  { %v4950_v15 = vpop.permute.xlu1 %1855 }
0x2353   :  { %3701 = vmatmul.mubr.msk.f32.vlgmr.msra.gmra.mxu0 %vm383_vm1, %v4950_v15 }
0x2354   :  { %2068 = vmatpush1.msra.mxu0 %v4764_v17  ;;  %2123 = vmatprep.mubr.f32.mxu0 %v5384_v63 }
0x2355   :  { %2069 = vmatprep.subr.mxu0 %v4768_v60 }
0x2356   :  { %2070 = vmatpush1.msra.mxu0 %v4771_v19 }
0x2357   :  { %2071 = vmatprep.subr.mxu0 %v4774_v20 }
0x2358   :  { %2072 = vmatpush1.msra.mxu0 %v4777_v21 }
0x2359   :  { %2073 = vmatprep.subr.mxu0 %v4780_v22 }
0x235a   :  { %2074 = vmatpush1.msra.mxu0 %v4783_v25 }
0x235b   :  { %2075 = vmatprep.subr.mxu0 %v4786_v26 }
0x235c   :  { %2076 = vmatpush1.msra.mxu0 %v4789_v27 }
0x235d   :  { %2077 = vmatprep.subr.mxu0 %v4792_v29 }
0x235e   :  { %2078 = vmatpush1.msra.mxu0 %v4795_v28 }
0x235f   :  { %2079 = vmatprep.subr.mxu0 %v4798_v35 }
0x2360   :  { %2080 = vmatpush1.msra.mxu0 %v4801_v53 }
0x2361   :  { %2081 = vmatprep.subr.mxu0 %v4804_v56 }
0x2362   :  { %2082 = vmatpush1.msra.mxu0 %v4807_v59 }
0x2363   :  { %2083 = vmatprep.subr.mxu0 %v4810_v61 }
0x2364   :  { %2084 = vmatpush1.msra.mxu0 %v4813_v57 }
0x2365   :  { %2085 = vmatprep.subr.mxu0 %v4816_v42 }
0x2366   :  { %2086 = vmatpush1.msra.mxu0 %v4819_v41 }
0x2367   :  { %2087 = vmatprep.subr.mxu0 %v4822_v3 }
0x2368   :  { %2088 = vmatpush1.msra.mxu0 %v4825_v50 }
0x2369   :  { %2089 = vmatprep.subr.mxu0 %v4828_v40 }
0x236a   :  { %2090 = vmatpush1.msra.mxu0 %v4831_v0 }
0x236b   :  { %3741 = vmatprep.subr.mxu0 %v5384_v63 }
0x2413   :  { %v1925_v31 = vpop.f32.mrf.mxu0 }
0x2414   :  { %v1926_v62 = vadd.f32 %v1925_v31, %v1759_v11  ;;  %v5018_v11 = vld [vmem:[#allocation8 + $0x88] sm:$0xff]  ;;  %v5022_v31 = vld [vmem:[#allocation8 + $0x70] sm:$0xff] }
0x2415   :  { %v3702_v1 = vpop.f32.mrf.mxu0 }
0x2416   :  { %v1929_v46 = vadd.f32 %v4982_v44, %v1926_v62  ;;  %v5026_v62 = vld [vmem:[#allocation8 + $0x58] sm:$0xff]  ;;  %v5030_v1 = vld [vmem:[#allocation8 + $0x40] sm:$0xff] }
0x2418   :  { %3953 = vtanh.f32 %v1929_v46  ;;  %v5034_v46 = vld [vmem:[#allocation8 + $0x28] sm:$0xff] }
0x2425   :  { %v3954_v7 = vpop.eup %3953 }
0x2426   :  { %1935 = vrot.lane.b32.xlu0 %v3954_v7, %s4122_s14  ;;  %v1931_v9 = vmul.f32 0.5, %v3954_v7  ;;  %v5038_v7 = vld [vmem:[#allocation8 + $0x10] sm:$0xff] }
0x2427   :  { %5394 = vst [vmem:[#allocation14_spill] sm:$0xff] %v5038_v7 }
0x2428   :  { %v1932_v52 = vadd.f32 0.5, %v1931_v9 }
0x242a   :  { %v1933_v30 = vmul.f32 %v1932_v52, %v4839_v8  ;;  %v5002_v8 = vld [vmem:[#allocation8 + $0xe8] sm:$0xff] }
0x2498   :  { %v1936_v10 = vpop.permute.xlu0 %1935 }
0x2499   :  { %v1938_v2 = vmul.f32 %v1936_v10, %v1932_v52 }
0x249b   :  { %1940 = vrot.lane.b32.xlu1 %v1938_v2, %s4123_s15  ;;  %v5046_v2 = vld [vmem:[%s5363_s7] ss:$0 sm:$0xff] }
0x250d   :  { %v1941_v32 = vpop.permute.xlu1 %1940 }
0x250e   :  { %v4988_v33 = vadd.f32 %v1941_v32, %v1933_v30 }
0x2510   :  { %3955 = vtanh.f32 %v4988_v33 }
0x251d   :  { %v3956_v34 = vpop.eup %3955 }
0x251e   :  { %1946 = vrot.lane.b32.xlu0 %v3956_v34, %s4122_s14 }
0x2590   :  { %v1947_v36 = vpop.permute.xlu0 %1946 }
0x2591   :  { %v1949_v37 = vmul.f32 %v1947_v36, %v1932_v52 }
0x2593   :  { %1951 = vrot.lane.b32.xlu1 %v1949_v37, %s4123_s15 }
0x2605   :  { %v1952_v38 = vpop.permute.xlu1 %1951 }
0x2606   :  { %3712 = vmatmul.mubr.msk.f32.vlgmr.msra.gmra.mxu1 %vm383_vm1, %v1952_v38 }
0x2607   :  { %3715 = vmatpush3.msra.mxu1 %v4994_v39  ;;  %3738 = vmatprep.mubr.msk.f32.mxu1 %vm4124_vm0, %v5384_v63 }
0x2608   :  { %3716 = vmatprep.subr.mxu1 %v5384_v63 }
0x2609   :  { %3717 = vmatpush3.msra.mxu1 %v4849_v18 }
0x260a   :  { %3718 = vmatprep.subr.mxu1 %v5384_v63 }
0x260b   :  { %3719 = vmatpush3.msra.mxu1 %v5002_v8 }
0x260c   :  { %3720 = vmatprep.subr.mxu1 %v5384_v63 }
0x260d   :  { %3721 = vmatpush3.msra.mxu1 %v5006_v24 }
0x260e   :  { %3722 = vmatprep.subr.mxu1 %v5384_v63 }
0x260f   :  { %3723 = vmatpush3.msra.mxu1 %v5010_v58 }
0x2610   :  { %3724 = vmatprep.subr.mxu1 %v5384_v63 }
0x2611   :  { %3725 = vmatpush3.msra.mxu1 %v5014_v51 }
0x2612   :  { %3726 = vmatprep.subr.mxu1 %v5384_v63 }
0x2613   :  { %3727 = vmatpush3.msra.mxu1 %v5018_v11 }
0x2614   :  { %3728 = vmatprep.subr.mxu1 %v5384_v63 }
0x2615   :  { %3729 = vmatpush3.msra.mxu1 %v5022_v31 }
0x2616   :  { %3730 = vmatprep.subr.mxu1 %v5384_v63 }
0x2617   :  { %3731 = vmatpush3.msra.mxu1 %v5026_v62 }
0x2618   :  { %3732 = vmatprep.subr.mxu1 %v5384_v63 }
0x2619   :  { %3733 = vmatpush3.msra.mxu1 %v5030_v1 }
0x261a   :  { %3734 = vmatprep.subr.mxu1 %v5384_v63 }
0x261b   :  { %3735 = vmatpush3.msra.mxu1 %v5034_v46 }
0x261c   :  { %3736 = vmatprep.subr.mxu1 %v5384_v63 }
0x261d   :  { %3737 = vmatpush3.msra.mxu1 %v5038_v7 }
0x261e   :  { %3752 = vmatprep.subr.mxu1 %v5384_v63 }
0x26c6   :  { %v2021_v9 = vpop.f32.mrf.mxu1 }
0x26c7   :  { %v2022_v52 = vadd.f32 %v2021_v9, %v4940_v12 }
0x26c8   :  { %v3713_v10 = vpop.f32.mrf.mxu1 }
0x26c9   :  { %v2025_v30 = vadd.f32 %v5046_v2, %v2022_v52 }
0x26cb   :  { %3957 = vtanh.f32 %v2025_v30  ;;  %v4130_v30 = vmov 5  }
0x26cc   :  { %3897 = vset.pattern.permute.xlu1 %v4130_v30 }
0x26d8   :  { %v3958_v32 = vpop.eup %3957 }
0x26d9   :  { %2031 = vrot.lane.b32.xlu0 %v3958_v32, %s4122_s14  ;;  %v2027_v34 = vmul.f32 0.5, %v3958_v32 }
0x26db   :  { %v2028_v36 = vadd.f32 0.5, %v2027_v34 }
0x26dd   :  { %v2029_v12 = vmul.f32 %v2028_v36, %v4879_v13 }
0x274b   :  { %v2032_v38 = vpop.permute.xlu0 %2031 }
0x274c   :  { %v2034_v7 = vmul.f32 %v2032_v38, %v2028_v36 }
0x274e   :  { %2036 = vrot.lane.b32.xlu1 %v2034_v7, %s4123_s15 }
0x2752   :  { %2047 = vrot.lane.b32.xlu1 %v1949_v37, %s4122_s14 }
0x2756   :  { %176 = vperm.xlu1 %3897, %v4707_v54  }
0x27c0   :  { %v2037_v9 = vpop.permute.xlu1 %2036 }
0x27c1   :  { %v5053_v10 = vadd.f32 %v2037_v9, %v2029_v12 }
0x27c3   :  { %3959 = vtanh.f32 %v5053_v10 }
0x27c4   :  { %v2048_v7 = vpop.permute.xlu1 %2047 }
0x27c5   :  { %v2054_v13 = vsel %vm383_vm1, %v4950_v15, %v2048_v7 }
0x27d0   :  { %v3960_v52 = vpop.eup %3959 }
0x27d1   :  { %2042 = vrot.lane.b32.xlu0 %v3960_v52, %s4122_s14  ;;  %v177_v15 = vpop.permute.xlu1 %176 }
0x2843   :  { %v2043_v32 = vpop.permute.xlu0 %2042 }
0x2844   :  { %v2045_v34 = vmul.f32 %v2043_v32, %v2028_v36  ;;  %v179_v36 = vmul.f32 %v4741_v45, %v177_v15 }
0x2846   :  { %2051 = vrot.lane.b32.xlu0 %v2045_v34, %s4126_s27  ;;  %v180_v12 = vadd.f32 %v4747_v47, %v179_v36 }
0x28b8   :  { %v2052_v37 = vpop.permute.xlu0 %2051 }
0x28b9   :  { %v2055_v38 = vsel %vm582_vm2, %v2054_v13, %v2052_v37 }
0x28ba   :  { %3266 = vmatmul.mubr.msk.f32.vlgmr.msra.gmra.mxu0 %vm213_vm3, %v2055_v38  ;;  %3739 = vmatmul.mubr.msk.f32.vlgmr.msra.gmra.mxu1 %vm213_vm3, %v2055_v38 }
0x28bb   :  { %3742 = vmatpush3.msra.mxu0 %v4893_v48  ;;  %3749 = vmatprep.mubr.msk.f32.mxu0 %vm4124_vm0, %v5384_v63 }
0x28bc   :  { %3743 = vmatprep.subr.mxu0 %v5384_v63  ;;  %3753 = vmatpush3.msra.mxu1 %v4899_v16 }
0x28bd   :  { %3744 = vmatpush3.msra.mxu0 %v4905_v49  ;;  %3754 = vmatprep.subr.mxu1 %v5384_v63 }
0x28be   :  { %3745 = vmatprep.subr.mxu0 %v5384_v63  ;;  %3755 = vmatpush3.msra.mxu1 %v4910_v14 }
0x28bf   :  { %3746 = vmatpush3.msra.mxu0 %v4916_v55  ;;  %3756 = vmatprep.subr.mxu1 %v5384_v63 }
0x28c0   :  { %3747 = vmatprep.subr.mxu0 %v5384_v63  ;;  %3757 = vmatpush3.msra.mxu1 %v4921_v4 }
0x28c1   :  { %3748 = vmatpush3.msra.mxu0 %v4927_v5  ;;  %3758 = vmatprep.subr.mxu1 %v5384_v63 }
0x28c2   :  { %3759 = vmatpush3.msra.mxu1 %v4931_v6  ;;  %3760 = vmatprep.mubr.msk.f32.mxu1 %vm4124_vm0, %v5384_v63 }
0x28c3   :  { %2435 = vmatprep.subr.mxu0 %v4734_v43  ;;  %3763 = vmatprep.subr.mxu1 %v5384_v63 }
0x297a   :  { %v2125_v9 = vpop.f32.mrf.mxu0  ;;  %v5086_v52 = vpop.f32.mrf.mxu1 }
0x297b   :  { %v2201_v30 = vadd.f32 %v2125_v9, %v180_v12 }
0x297c   :  { %v3740_v32 = vpop.f32.mrf.mxu1 }
0x297d   :  { %3961 = vtanh.f32 %v2201_v30 }
0x298a   :  { %v3962_v34 = vpop.eup %3961 }
0x298b   :  { %2207 = vrot.lane.b32.xlu0 %v3962_v34, %s4122_s14  ;;  %v2203_v7 = vmul.f32 0.5, %v3962_v34 }
0x298d   :  { %v2204_v13 = vadd.f32 0.5, %v2203_v7 }
0x298f   :  { %v2205_v43 = vmul.f32 %v2204_v13, %v4945_v23 }
0x29fd   :  { %v2208_v37 = vpop.permute.xlu0 %2207 }
0x29fe   :  { %v2210_v38 = vmul.f32 %v2208_v37, %v2204_v13 }
0x2a00   :  { %2212 = vrot.lane.b32.xlu1 %v2210_v38, %s4123_s15 }
0x2a72   :  { %v2213_v15 = vpop.permute.xlu1 %2212 }
0x2a73   :  { %v5091_v45 = vadd.f32 %v2213_v15, %v2205_v43  ;;  %v2127_v43 = vpop.f32.mrf.mxu0 }
0x2a75   :  { %3963 = vtanh.f32 %v5091_v45 }
0x2a82   :  { %v3964_v36 = vpop.eup %3963 }
0x2a83   :  { %2218 = vrot.lane.b32.xlu0 %v3964_v36, %s4122_s14 }
0x2af5   :  { %v2219_v12 = vpop.permute.xlu0 %2218 }
0x2af6   :  { %v2221_v9 = vmul.f32 %v2219_v12, %v2204_v13 }
0x2af8   :  { %2223 = vrot.lane.b32.xlu1 %v2221_v9, %s4123_s15 }
0x2b6a   :  { %v5096_v30 = vpop.permute.xlu1 %2223 }
0x2b6b   :  { %3750 = vmatmul.mubr.msk.f32.vlgmr.msra.gmra.mxu0 %vm383_vm1, %v5096_v30 }
0x2b6c   :  { %2436 = vmatpush1.msra.mxu0 %v4764_v17  ;;  %2491 = vmatprep.mubr.f32.mxu0 %v5384_v63 }
0x2b6d   :  { %2437 = vmatprep.subr.mxu0 %v4768_v60 }
0x2b6e   :  { %2438 = vmatpush1.msra.mxu0 %v4771_v19 }
0x2b6f   :  { %2439 = vmatprep.subr.mxu0 %v4774_v20 }
0x2b70   :  { %2440 = vmatpush1.msra.mxu0 %v4777_v21 }
0x2b71   :  { %2441 = vmatprep.subr.mxu0 %v4780_v22 }
0x2b72   :  { %2442 = vmatpush1.msra.mxu0 %v4783_v25 }
0x2b73   :  { %2443 = vmatprep.subr.mxu0 %v4786_v26 }
0x2b74   :  { %2444 = vmatpush1.msra.mxu0 %v4789_v27 }
0x2b75   :  { %2445 = vmatprep.subr.mxu0 %v4792_v29 }
0x2b76   :  { %2446 = vmatpush1.msra.mxu0 %v4795_v28 }
0x2b77   :  { %2447 = vmatprep.subr.mxu0 %v4798_v35 }
0x2b78   :  { %2448 = vmatpush1.msra.mxu0 %v4801_v53 }
0x2b79   :  { %2449 = vmatprep.subr.mxu0 %v4804_v56 }
0x2b7a   :  { %2450 = vmatpush1.msra.mxu0 %v4807_v59 }
0x2b7b   :  { %2451 = vmatprep.subr.mxu0 %v4810_v61 }
0x2b7c   :  { %2452 = vmatpush1.msra.mxu0 %v4813_v57 }
0x2b7d   :  { %2453 = vmatprep.subr.mxu0 %v4816_v42 }
0x2b7e   :  { %2454 = vmatpush1.msra.mxu0 %v4819_v41 }
0x2b7f   :  { %2455 = vmatprep.subr.mxu0 %v4822_v3 }
0x2b80   :  { %2456 = vmatpush1.msra.mxu0 %v4825_v50 }
0x2b81   :  { %2457 = vmatprep.subr.mxu0 %v4828_v40 }
0x2b82   :  { %2458 = vmatpush1.msra.mxu0 %v4831_v0 }
0x2b83   :  { %3790 = vmatprep.subr.mxu0 %v5384_v63 }
0x2c2b   :  { %v2293_v23 = vpop.f32.mrf.mxu0 }
0x2c2c   :  { %v2294_v32 = vadd.f32 %v2293_v23, %v2127_v43 }
0x2c2d   :  { %v3751_v34 = vpop.f32.mrf.mxu0 }
0x2c2e   :  { %v2297_v7 = vadd.f32 %v4982_v44, %v2294_v32 }
0x2c30   :  { %3965 = vtanh.f32 %v2297_v7 }
0x2c3d   :  { %v3966_v13 = vpop.eup %3965 }
0x2c3e   :  { %2303 = vrot.lane.b32.xlu0 %v3966_v13, %s4122_s14  ;;  %v2299_v37 = vmul.f32 0.5, %v3966_v13 }
0x2c40   :  { %v2300_v38 = vadd.f32 0.5, %v2299_v37 }
0x2c42   :  { %v2301_v12 = vmul.f32 %v2300_v38, %v4988_v33  ;;  %v5395_v33 = vld [vmem:[#allocation14_spill] sm:$0xff] }
0x2cb0   :  { %v2304_v15 = vpop.permute.xlu0 %2303 }
0x2cb1   :  { %v2306_v36 = vmul.f32 %v2304_v15, %v2300_v38 }
0x2cb3   :  { %2308 = vrot.lane.b32.xlu1 %v2306_v36, %s4123_s15 }
0x2d25   :  { %v2309_v9 = vpop.permute.xlu1 %2308 }
0x2d26   :  { %v5129_v0 = vadd.f32 %v2309_v9, %v2301_v12 }
0x2d28   :  { %3967 = vtanh.f32 %v5129_v0 }
0x2d35   :  { %v3968_v43 = vpop.eup %3967 }
0x2d36   :  { %2314 = vrot.lane.b32.xlu0 %v3968_v43, %s4122_s14 }
0x2da8   :  { %v2315_v23 = vpop.permute.xlu0 %2314 }
0x2da9   :  { %v2317_v32 = vmul.f32 %v2315_v23, %v2300_v38 }
0x2dab   :  { %2319 = vrot.lane.b32.xlu1 %v2317_v32, %s4123_s15 }
0x2e1d   :  { %v2320_v34 = vpop.permute.xlu1 %2319 }
0x2e1e   :  { %3761 = vmatmul.mubr.msk.f32.vlgmr.msra.gmra.mxu1 %vm383_vm1, %v2320_v34 }
0x2e1f   :  { %3764 = vmatpush3.msra.mxu1 %v4994_v39  ;;  %3787 = vmatprep.mubr.msk.f32.mxu1 %vm4124_vm0, %v5384_v63 }
0x2e20   :  { %3765 = vmatprep.subr.mxu1 %v5384_v63 }
0x2e21   :  { %3766 = vmatpush3.msra.mxu1 %v4849_v18 }
0x2e22   :  { %3767 = vmatprep.subr.mxu1 %v5384_v63 }
0x2e23   :  { %3768 = vmatpush3.msra.mxu1 %v5002_v8 }
0x2e24   :  { %3769 = vmatprep.subr.mxu1 %v5384_v63 }
0x2e25   :  { %3770 = vmatpush3.msra.mxu1 %v5006_v24 }
0x2e26   :  { %3771 = vmatprep.subr.mxu1 %v5384_v63 }
0x2e27   :  { %3772 = vmatpush3.msra.mxu1 %v5010_v58 }
0x2e28   :  { %3773 = vmatprep.subr.mxu1 %v5384_v63 }
0x2e29   :  { %3774 = vmatpush3.msra.mxu1 %v5014_v51 }
0x2e2a   :  { %3775 = vmatprep.subr.mxu1 %v5384_v63 }
0x2e2b   :  { %3776 = vmatpush3.msra.mxu1 %v5018_v11 }
0x2e2c   :  { %3777 = vmatprep.subr.mxu1 %v5384_v63 }
0x2e2d   :  { %3778 = vmatpush3.msra.mxu1 %v5022_v31 }
0x2e2e   :  { %3779 = vmatprep.subr.mxu1 %v5384_v63 }
0x2e2f   :  { %3780 = vmatpush3.msra.mxu1 %v5026_v62 }
0x2e30   :  { %3781 = vmatprep.subr.mxu1 %v5384_v63 }
0x2e31   :  { %3782 = vmatpush3.msra.mxu1 %v5030_v1 }
0x2e32   :  { %3783 = vmatprep.subr.mxu1 %v5384_v63 }
0x2e33   :  { %3784 = vmatpush3.msra.mxu1 %v5034_v46 }
0x2e34   :  { %3785 = vmatprep.subr.mxu1 %v5384_v63 }
0x2e35   :  { %3786 = vmatpush3.msra.mxu1 %v5395_v33 }
0x2e36   :  { %3801 = vmatprep.subr.mxu1 %v5384_v63 }
0x2ede   :  { %v2389_v7 = vpop.f32.mrf.mxu1 }
0x2edf   :  { %v2390_v13 = vadd.f32 %v2389_v7, %v5086_v52  ;;  %v4131_v7 = vmov 6  }
0x2ee0   :  { %v3762_v37 = vpop.f32.mrf.mxu1  ;;  %3898 = vset.pattern.permute.xlu1 %v4131_v7 }
0x2ee1   :  { %v2393_v38 = vadd.f32 %v5046_v2, %v2390_v13 }
0x2ee3   :  { %3969 = vtanh.f32 %v2393_v38 }
0x2ef0   :  { %v3970_v15 = vpop.eup %3969 }
0x2ef1   :  { %2399 = vrot.lane.b32.xlu0 %v3970_v15, %s4122_s14  ;;  %v2395_v36 = vmul.f32 0.5, %v3970_v15 }
0x2ef3   :  { %v2396_v12 = vadd.f32 0.5, %v2395_v36  ;;  %v5397_v36 = vld [vmem:[#allocation11_spill] sm:$0xff] }
0x2ef5   :  { %v2397_v23 = vmul.f32 %v2396_v12, %v5053_v10 }
0x2f63   :  { %v2400_v9 = vpop.permute.xlu0 %2399 }
0x2f64   :  { %v2402_v43 = vmul.f32 %v2400_v9, %v2396_v12 }
0x2f66   :  { %2404 = vrot.lane.b32.xlu1 %v2402_v43, %s4123_s15 }
0x2f6a   :  { %2415 = vrot.lane.b32.xlu1 %v2317_v32, %s4122_s14 }
0x2f6e   :  { %184 = vperm.xlu1 %3898, %v4707_v54   ;;  %v5396_v54 = vld [vmem:[#allocation12_spill] sm:$0xff] }
0x2fd8   :  { %v2405_v34 = vpop.permute.xlu1 %2404 }
0x2fd9   :  { %v5167_v33 = vadd.f32 %v2405_v34, %v2397_v23 }
0x2fdb   :  { %3971 = vtanh.f32 %v5167_v33 }
0x2fdc   :  { %v2416_v38 = vpop.permute.xlu1 %2415 }
0x2fdd   :  { %v2422_v10 = vsel %vm383_vm1, %v5096_v30, %v2416_v38 }
0x2fe8   :  { %v3972_v52 = vpop.eup %3971 }
0x2fe9   :  { %2410 = vrot.lane.b32.xlu0 %v3972_v52, %s4122_s14  ;;  %v185_v30 = vpop.permute.xlu1 %184 }
0x305b   :  { %v2411_v13 = vpop.permute.xlu0 %2410 }
0x305c   :  { %v2413_v37 = vmul.f32 %v2411_v13, %v2396_v12  ;;  %v187_v12 = vmul.f32 %v5397_v36, %v185_v30 }
0x305e   :  { %2419 = vrot.lane.b32.xlu0 %v2413_v37, %s4126_s27  ;;  %v188_v9 = vadd.f32 %v4747_v47, %v187_v12 }
0x30d0   :  { %v2420_v32 = vpop.permute.xlu0 %2419 }
0x30d1   :  { %v2423_v15 = vsel %vm582_vm2, %v2422_v10, %v2420_v32 }
0x30d2   :  { %3270 = vmatmul.mubr.msk.f32.vlgmr.msra.gmra.mxu0 %vm213_vm3, %v2423_v15  ;;  %3788 = vmatmul.mubr.msk.f32.vlgmr.msra.gmra.mxu1 %vm213_vm3, %v2423_v15 }
0x30d3   :  { %3791 = vmatpush3.msra.mxu0 %v4893_v48  ;;  %3798 = vmatprep.mubr.msk.f32.mxu0 %vm4124_vm0, %v5384_v63 }
0x30d4   :  { %3792 = vmatprep.subr.mxu0 %v5384_v63  ;;  %3802 = vmatpush3.msra.mxu1 %v4899_v16 }
0x30d5   :  { %3793 = vmatpush3.msra.mxu0 %v4905_v49  ;;  %3803 = vmatprep.subr.mxu1 %v5384_v63 }
0x30d6   :  { %3794 = vmatprep.subr.mxu0 %v5384_v63  ;;  %3804 = vmatpush3.msra.mxu1 %v4910_v14 }
0x30d7   :  { %3795 = vmatpush3.msra.mxu0 %v4916_v55  ;;  %3805 = vmatprep.subr.mxu1 %v5384_v63 }
0x30d8   :  { %3796 = vmatprep.subr.mxu0 %v5384_v63  ;;  %3806 = vmatpush3.msra.mxu1 %v4921_v4 }
0x30d9   :  { %3797 = vmatpush3.msra.mxu0 %v4927_v5  ;;  %3807 = vmatprep.subr.mxu1 %v5384_v63 }
0x30da   :  { %3808 = vmatpush3.msra.mxu1 %v4931_v6  ;;  %3809 = vmatprep.mubr.msk.f32.mxu1 %vm4124_vm0, %v5384_v63 }
0x30db   :  { %2803 = vmatprep.subr.mxu0 %v5396_v54  ;;  %3812 = vmatprep.subr.mxu1 %v5384_v63 }
0x3192   :  { %v2493_v43 = vpop.f32.mrf.mxu0  ;;  %v5200_v23 = vpop.f32.mrf.mxu1 }
0x3193   :  { %v2569_v34 = vadd.f32 %v2493_v43, %v188_v9 }
0x3194   :  { %v3789_v52 = vpop.f32.mrf.mxu1 }
0x3195   :  { %3973 = vtanh.f32 %v2569_v34 }
0x31a2   :  { %v3974_v7 = vpop.eup %3973 }
0x31a3   :  { %2575 = vrot.lane.b32.xlu0 %v3974_v7, %s4122_s14  ;;  %v2571_v13 = vmul.f32 0.5, %v3974_v7 }
0x31a5   :  { %v2572_v37 = vadd.f32 0.5, %v2571_v13 }
0x31a7   :  { %v2573_v32 = vmul.f32 %v2572_v37, %v5091_v45  ;;  %v5398_v45 = vld [vmem:[#allocation13_spill] sm:$0xff] }
0x3215   :  { %v2576_v38 = vpop.permute.xlu0 %2575 }
0x3216   :  { %v2578_v10 = vmul.f32 %v2576_v38, %v2572_v37 }
0x3218   :  { %2580 = vrot.lane.b32.xlu1 %v2578_v10, %s4123_s15 }
0x328a   :  { %v2581_v15 = vpop.permute.xlu1 %2580 }
0x328b   :  { %v5205_v54 = vadd.f32 %v2581_v15, %v2573_v32 }
0x328d   :  { %3975 = vtanh.f32 %v5205_v54 }
0x329a   :  { %v3976_v47 = vpop.eup %3975 }
0x329b   :  { %2586 = vrot.lane.b32.xlu0 %v3976_v47, %s4122_s14 }
0x330d   :  { %v2587_v30 = vpop.permute.xlu0 %2586 }
0x330e   :  { %v2589_v36 = vmul.f32 %v2587_v30, %v2572_v37 }
0x3310   :  { %2591 = vrot.lane.b32.xlu1 %v2589_v36, %s4123_s15 }
0x3382   :  { %v5210_v12 = vpop.permute.xlu1 %2591 }
0x3383   :  { %3799 = vmatmul.mubr.msk.f32.vlgmr.msra.gmra.mxu0 %vm383_vm1, %v5210_v12 }
0x3384   :  { %2804 = vmatpush1.msra.mxu0 %v4764_v17  ;;  %2859 = vmatprep.mubr.f32.mxu0 %v5384_v63  ;;  %v2495_v17 = vpop.f32.mrf.mxu0 }
0x3385   :  { %2805 = vmatprep.subr.mxu0 %v4768_v60 }
0x3386   :  { %2806 = vmatpush1.msra.mxu0 %v4771_v19 }
0x3387   :  { %2807 = vmatprep.subr.mxu0 %v4774_v20 }
0x3388   :  { %2808 = vmatpush1.msra.mxu0 %v4777_v21 }
0x3389   :  { %2809 = vmatprep.subr.mxu0 %v4780_v22 }
0x338a   :  { %2810 = vmatpush1.msra.mxu0 %v4783_v25 }
0x338b   :  { %2811 = vmatprep.subr.mxu0 %v4786_v26 }
0x338c   :  { %2812 = vmatpush1.msra.mxu0 %v4789_v27 }
0x338d   :  { %2813 = vmatprep.subr.mxu0 %v4792_v29 }
0x338e   :  { %2814 = vmatpush1.msra.mxu0 %v4795_v28 }
0x338f   :  { %2815 = vmatprep.subr.mxu0 %v4798_v35 }
0x3390   :  { %2816 = vmatpush1.msra.mxu0 %v4801_v53 }
0x3391   :  { %2817 = vmatprep.subr.mxu0 %v4804_v56 }
0x3392   :  { %2818 = vmatpush1.msra.mxu0 %v4807_v59 }
0x3393   :  { %2819 = vmatprep.subr.mxu0 %v4810_v61 }
0x3394   :  { %2820 = vmatpush1.msra.mxu0 %v4813_v57 }
0x3395   :  { %2821 = vmatprep.subr.mxu0 %v4816_v42  ;;  %v5399_v42 = vld [vmem:[#allocation14_spill] sm:$0xff] }
0x3396   :  { %2822 = vmatpush1.msra.mxu0 %v4819_v41 }
0x3397   :  { %2823 = vmatprep.subr.mxu0 %v4822_v3 }
0x3398   :  { %2824 = vmatpush1.msra.mxu0 %v4825_v50 }
0x3399   :  { %2825 = vmatprep.subr.mxu0 %v4828_v40 }
0x339a   :  { %2826 = vmatpush1.msra.mxu0 %v5398_v45 }
0x339b   :  { %3839 = vmatprep.subr.mxu0 %v5384_v63 }
0x3443   :  { %v2661_v60 = vpop.f32.mrf.mxu0 }
0x3444   :  { %v2662_v19 = vadd.f32 %v2661_v60, %v2495_v17 }
0x3445   :  { %v3800_v20 = vpop.f32.mrf.mxu0 }
0x3446   :  { %v2665_v21 = vadd.f32 %v4982_v44, %v2662_v19 }
0x3448   :  { %3977 = vtanh.f32 %v2665_v21 }
0x3455   :  { %v3978_v22 = vpop.eup %3977 }
0x3456   :  { %2671 = vrot.lane.b32.xlu0 %v3978_v22, %s4122_s14  ;;  %v2667_v25 = vmul.f32 0.5, %v3978_v22 }
0x3458   :  { %v2668_v26 = vadd.f32 0.5, %v2667_v25 }
0x345a   :  { %v2669_v28 = vmul.f32 %v2668_v26, %v5129_v0 }
0x34c8   :  { %v2672_v27 = vpop.permute.xlu0 %2671 }
0x34c9   :  { %v2674_v29 = vmul.f32 %v2672_v27, %v2668_v26 }
0x34cb   :  { %2676 = vrot.lane.b32.xlu1 %v2674_v29, %s4123_s15 }
0x353d   :  { %v2677_v35 = vpop.permute.xlu1 %2676 }
0x353e   :  { %v5243_v53 = vadd.f32 %v2677_v35, %v2669_v28 }
0x3540   :  { %3979 = vtanh.f32 %v5243_v53 }
0x354d   :  { %v3980_v56 = vpop.eup %3979 }
0x354e   :  { %2682 = vrot.lane.b32.xlu0 %v3980_v56, %s4122_s14 }
0x35c0   :  { %v2683_v59 = vpop.permute.xlu0 %2682 }
0x35c1   :  { %v2685_v61 = vmul.f32 %v2683_v59, %v2668_v26 }
0x35c3   :  { %2687 = vrot.lane.b32.xlu1 %v2685_v61, %s4123_s15 }
0x3635   :  { %v2688_v57 = vpop.permute.xlu1 %2687 }
0x3636   :  { %3810 = vmatmul.mubr.msk.f32.vlgmr.msra.gmra.mxu1 %vm383_vm1, %v2688_v57 }
0x3637   :  { %3813 = vmatpush3.msra.mxu1 %v4994_v39  ;;  %3836 = vmatprep.mubr.msk.f32.mxu1 %vm4124_vm0, %v5384_v63 }
0x3638   :  { %3814 = vmatprep.subr.mxu1 %v5384_v63 }
0x3639   :  { %3815 = vmatpush3.msra.mxu1 %v4849_v18 }
0x363a   :  { %3816 = vmatprep.subr.mxu1 %v5384_v63 }
0x363b   :  { %3817 = vmatpush3.msra.mxu1 %v5002_v8 }
0x363c   :  { %3818 = vmatprep.subr.mxu1 %v5384_v63 }
0x363d   :  { %3819 = vmatpush3.msra.mxu1 %v5006_v24 }
0x363e   :  { %3820 = vmatprep.subr.mxu1 %v5384_v63 }
0x363f   :  { %3821 = vmatpush3.msra.mxu1 %v5010_v58 }
0x3640   :  { %3822 = vmatprep.subr.mxu1 %v5384_v63 }
0x3641   :  { %3823 = vmatpush3.msra.mxu1 %v5014_v51 }
0x3642   :  { %3824 = vmatprep.subr.mxu1 %v5384_v63 }
0x3643   :  { %3825 = vmatpush3.msra.mxu1 %v5018_v11 }
0x3644   :  { %3826 = vmatprep.subr.mxu1 %v5384_v63 }
0x3645   :  { %3827 = vmatpush3.msra.mxu1 %v5022_v31 }
0x3646   :  { %3828 = vmatprep.subr.mxu1 %v5384_v63 }
0x3647   :  { %3829 = vmatpush3.msra.mxu1 %v5026_v62  ;;  %v4132_v62 = vmov 7  }
0x3648   :  { %3830 = vmatprep.subr.mxu1 %v5384_v63  ;;  %3899 = vset.pattern.permute.xlu1 %v4132_v62 }
0x3649   :  { %3831 = vmatpush3.msra.mxu1 %v5030_v1  ;;  %3900 = vset.pattern.permute.xlu0 %v4132_v62  ;;  %v4046_v1 = vld [vmem:[#allocation4] sm:$0xff] }
0x364a   :  { %3832 = vmatprep.subr.mxu1 %v5384_v63 }
0x364b   :  { %3833 = vmatpush3.msra.mxu1 %v5034_v46 }
0x364c   :  { %3834 = vmatprep.subr.mxu1 %v5384_v63 }
0x364d   :  { %3835 = vmatpush3.msra.mxu1 %v5399_v42 }
0x364e   :  { %3850 = vmatprep.subr.mxu1 %v5384_v63 }
0x36f6   :  { %v2757_v41 = vpop.f32.mrf.mxu1 }
0x36f7   :  { %v2758_v3 = vadd.f32 %v2757_v41, %v5200_v23 }
0x36f8   :  { %v3811_v50 = vpop.f32.mrf.mxu1 }
0x36f9   :  { %v2761_v40 = vadd.f32 %v5046_v2, %v2758_v3 }
0x36fb   :  { %3981 = vtanh.f32 %v2761_v40 }
0x3708   :  { %v3982_v0 = vpop.eup %3981 }
0x3709   :  { %2767 = vrot.lane.b32.xlu0 %v3982_v0, %s4122_s14  ;;  %v2763_v18 = vmul.f32 0.5, %v3982_v0 }
0x370b   :  { %v2764_v39 = vadd.f32 0.5, %v2763_v18 }
0x370d   :  { %v2765_v58 = vmul.f32 %v2764_v39, %v5167_v33 }
0x377b   :  { %v2768_v8 = vpop.permute.xlu0 %2767 }
0x377c   :  { %v2770_v24 = vmul.f32 %v2768_v8, %v2764_v39 }
0x377e   :  { %2772 = vrot.lane.b32.xlu1 %v2770_v24, %s4123_s15 }
0x3782   :  { %2783 = vrot.lane.b32.xlu1 %v2685_v61, %s4122_s14 }
0x3786   :  { %192 = vperm.xlu1 %3899, %v4046_v1  }
0x37f0   :  { %v2773_v51 = vpop.permute.xlu1 %2772 }
0x37f1   :  { %v5281_v11 = vadd.f32 %v2773_v51, %v2765_v58  ;;  %v3153_v58 = vld [vmem:[%s5364_s8 + $0x18] sm:$0xff]  ;;  %v3151_v51 = vld [vmem:[%s5364_s8 + $0x8] sm:$0xff] }
0x37f3   :  { %3983 = vtanh.f32 %v5281_v11 }
0x37f4   :  { %v2784_v43 = vpop.permute.xlu1 %2783 }
0x37f5   :  { %v2790_v33 = vsel %vm383_vm1, %v5210_v12, %v2784_v43 }
0x3800   :  { %v3984_v31 = vpop.eup %3983 }
0x3801   :  { %2778 = vrot.lane.b32.xlu0 %v3984_v31, %s4122_s14 }
0x3873   :  { %v2779_v46 = vpop.permute.xlu0 %2778 }
0x3874   :  { %v2781_v9 = vmul.f32 %v2779_v46, %v2764_v39 }
0x3876   :  { %2787 = vrot.lane.b32.xlu0 %v2781_v9, %s4126_s27  ;;  %v3278_v9 = vld [vmem:[#allocation3] ss:$0 sm:$0xff] }
0x38e8   :  { %v2788_v23 = vpop.permute.xlu0 %2787 }
0x38e9   :  { %v2791_v34 = vsel %vm582_vm2, %v2790_v33, %v2788_v23 }
0x38ea   :  { %3274 = vmatmul.mubr.msk.f32.vlgmr.msra.gmra.mxu0 %vm213_vm3, %v2791_v34  ;;  %3837 = vmatmul.mubr.msk.f32.vlgmr.msra.gmra.mxu1 %vm213_vm3, %v2791_v34 }
0x38eb   :  { %3840 = vmatpush3.msra.mxu0 %v4893_v48  ;;  %3847 = vmatprep.mubr.msk.f32.mxu0 %vm4124_vm0, %v5384_v63  ;;  %v193_v48 = vpop.permute.xlu1 %192 }
0x38ec   :  { %3841 = vmatprep.subr.mxu0 %v5384_v63  ;;  %3851 = vmatpush3.msra.mxu1 %v4899_v16  ;;  %v4047_v16 = vld [vmem:[%s5357_s1] ss:$0 sm:$0xff] }
0x38ed   :  { %3842 = vmatpush3.msra.mxu0 %v4905_v49  ;;  %3852 = vmatprep.subr.mxu1 %v5384_v63  ;;  %v195_v49 = vmul.f32 %v4047_v16, %v193_v48 }
0x38ee   :  { %3843 = vmatprep.subr.mxu0 %v5384_v63  ;;  %3853 = vmatpush3.msra.mxu1 %v4910_v14  ;;  %v4048_v14 = vld [vmem:[%s5361_s5] ss:$0 sm:$0xff] }
0x38ef   :  { %3844 = vmatpush3.msra.mxu0 %v4916_v55  ;;  %3854 = vmatprep.subr.mxu1 %v5384_v63  ;;  %v196_v55 = vadd.f32 %v4048_v14, %v195_v49 }
0x38f0   :  { %3845 = vmatprep.subr.mxu0 %v5384_v63  ;;  %3855 = vmatpush3.msra.mxu1 %v4921_v4 }
0x38f1   :  { %3846 = vmatpush3.msra.mxu0 %v4927_v5  ;;  %3856 = vmatprep.subr.mxu1 %v5384_v63 }
0x38f2   :  { %3857 = vmatpush3.msra.mxu1 %v4931_v6  ;;  %3858 = vmatprep.mubr.msk.f32.mxu1 %vm4124_vm0, %v5384_v63 }
0x38f3   :  { %3861 = vmatprep.subr.mxu0 %v5384_v63 }
0x39aa   :  { %v2861_v4 = vpop.f32.mrf.mxu0  ;;  %v2932_v5 = vpop.f32.mrf.mxu1 }
0x39ab   :  { %v2937_v52 = vadd.f32 %v2861_v4, %v196_v55 }
0x39ac   :  { %v3838_v6 = vpop.f32.mrf.mxu1  ;;  %v2863_v17 = vpop.f32.mrf.mxu0 }
0x39ad   :  { %3985 = vtanh.f32 %v2937_v52 }
0x39ba   :  { %v3986_v7 = vpop.eup %3985 }
0x39bb   :  { %2943 = vrot.lane.b32.xlu0 %v3986_v7, %s4122_s14  ;;  %v2939_v13 = vmul.f32 0.5, %v3986_v7 }
0x39bd   :  { %v2940_v37 = vadd.f32 0.5, %v2939_v13 }
0x39bf   :  { %v2941_v32 = vmul.f32 %v2940_v37, %v5205_v54 }
0x3a2d   :  { %v2944_v38 = vpop.permute.xlu0 %2943 }
0x3a2e   :  { %v2946_v10 = vmul.f32 %v2944_v38, %v2940_v37 }
0x3a30   :  { %2948 = vrot.lane.b32.xlu1 %v2946_v10, %s4123_s15 }
0x3aa2   :  { %v2949_v15 = vpop.permute.xlu1 %2948 }
0x3aa3   :  { %v2951_v47 = vadd.f32 %v2949_v15, %v2941_v32 }
0x3aa5   :  { %3987 = vtanh.f32 %v2951_v47 }
0x3ab2   :  { %v3988_v30 = vpop.eup %3987 }
0x3ab3   :  { %2954 = vrot.lane.b32.xlu0 %v3988_v30, %s4122_s14 }
0x3b25   :  { %v2955_v36 = vpop.permute.xlu0 %2954 }
0x3b26   :  { %v2957_v12 = vmul.f32 %v2955_v36, %v2940_v37 }
0x3b28   :  { %2959 = vrot.lane.b32.xlu1 %v2957_v12, %s4123_s15 }
0x3b9a   :  { %v2960_v45 = vpop.permute.xlu1 %2959 }
0x3b9b   :  { %3848 = vmatmul.mubr.msk.f32.vlgmr.msra.gmra.mxu0 %vm383_vm1, %v2960_v45 }
0x3b9c   :  { %3869 = vmatprep.mubr.msk.f32.mxu0 %vm4124_vm0, %v5384_v63  ;;  %3862 = vmatpush3.msra.mxu0 %v3153_v58 }
0x3b9d   :  { %3863 = vmatprep.subr.mxu0 %v5384_v63 }
0x3c5b   :  { %v3029_v60 = vpop.f32.mrf.mxu0 }
0x3c5c   :  { %v3030_v19 = vadd.f32 %v3029_v60, %v2863_v17 }
0x3c5d   :  { %v3849_v54 = vpop.f32.mrf.mxu0 }
0x3c5e   :  { %v3033_v20 = vadd.f32 %v4982_v44, %v3030_v19 }
0x3c60   :  { %3989 = vtanh.f32 %v3033_v20 }
0x3c6d   :  { %v3990_v21 = vpop.eup %3989 }
0x3c6e   :  { %3039 = vrot.lane.b32.xlu0 %v3990_v21, %s4122_s14  ;;  %v3035_v22 = vmul.f32 0.5, %v3990_v21 }
0x3c70   :  { %v3036_v25 = vadd.f32 0.5, %v3035_v22 }
0x3c72   :  { %v3037_v29 = vmul.f32 %v3036_v25, %v5243_v53 }
0x3ce0   :  { %v3040_v26 = vpop.permute.xlu0 %3039 }
0x3ce1   :  { %v3042_v27 = vmul.f32 %v3040_v26, %v3036_v25 }
0x3ce3   :  { %3044 = vrot.lane.b32.xlu1 %v3042_v27, %s4123_s15 }
0x3d55   :  { %v3045_v28 = vpop.permute.xlu1 %3044 }
0x3d56   :  { %v3047_v35 = vadd.f32 %v3045_v28, %v3037_v29 }
0x3d58   :  { %3991 = vtanh.f32 %v3047_v35 }
0x3d65   :  { %v3992_v56 = vpop.eup %3991 }
0x3d66   :  { %3050 = vrot.lane.b32.xlu0 %v3992_v56, %s4122_s14 }
0x3dd8   :  { %v3051_v59 = vpop.permute.xlu0 %3050 }
0x3dd9   :  { %v3053_v44 = vmul.f32 %v3051_v59, %v3036_v25 }
0x3ddb   :  { %3055 = vrot.lane.b32.xlu1 %v3053_v44, %s4123_s15 }
0x3e4d   :  { %v3056_v61 = vpop.permute.xlu1 %3055 }
0x3e4e   :  { %3859 = vmatmul.mubr.msk.f32.vlgmr.msra.gmra.mxu1 %vm383_vm1, %v3056_v61 }
0x3f0e   :  { %v3125_v57 = vpop.f32.mrf.mxu1 }
0x3f0f   :  { %v3126_v42 = vadd.f32 %v3125_v57, %v2932_v5 }
0x3f10   :  { %v3860_v41 = vpop.f32.mrf.mxu1 }
0x3f11   :  { %v3129_v3 = vadd.f32 %v5046_v2, %v3126_v42  ;;  %v3152_v2 = vld [vmem:[%s5364_s8 + $0x10] sm:$0xff] }
0x3f12   :  { %3864 = vmatpush3.msra.mxu0 %v3152_v2 }
0x3f13   :  { %3993 = vtanh.f32 %v3129_v3  ;;  %3865 = vmatprep.subr.mxu0 %v5384_v63 }
0x3f14   :  { %3866 = vmatpush3.msra.mxu0 %v3151_v51 }
0x3f15   :  { %3867 = vmatprep.subr.mxu0 %v5384_v63 }
0x3f20   :  { %v3994_v53 = vpop.eup %3993 }
0x3f21   :  { %3135 = vrot.lane.b32.xlu0 %v3994_v53, %s4122_s14  ;;  %v3131_v50 = vmul.f32 0.5, %v3994_v53 }
0x3f23   :  { %v3132_v40 = vadd.f32 0.5, %v3131_v50 }
0x3f25   :  { %v3133_v39 = vmul.f32 %v3132_v40, %v5281_v11  ;;  %v3150_v11 = vld [vmem:[%s5364_s8] sm:$0xff] }
0x3f26   :  { %3868 = vmatpush3.msra.mxu0 %v3150_v11 }
0x3f93   :  { %v3136_v0 = vpop.permute.xlu0 %3135 }
0x3f94   :  { %v3138_v18 = vmul.f32 %v3136_v0, %v3132_v40 }
0x3f96   :  { %3140 = vrot.lane.b32.xlu1 %v3138_v18, %s4123_s15 }
0x4008   :  { %v3141_v8 = vpop.permute.xlu1 %3140 }
0x4009   :  { %v3143_v24 = vadd.f32 %v3141_v8, %v3133_v39 }
0x400b   :  { %3995 = vtanh.f32 %v3143_v24 }
0x4018   :  { %v3996_v31 = vpop.eup %3995 }
0x4019   :  { %3146 = vrot.lane.b32.xlu0 %v3996_v31, %s4122_s14 }
0x408b   :  { %v3147_v62 = vpop.permute.xlu0 %3146 }
0x408c   :  { %v3149_v1 = vmul.f32 %v3147_v62, %v3132_v40 }
0x408e   :  { %3162 = vrot.lane.b32.xlu1 %v3149_v1, %s4123_s15 }
0x4100   :  { %v3163_v46 = vpop.permute.xlu1 %3162 }
0x4101   :  { %3870 = vmatmul.mubr.msk.f32.vlgmr.msra.gmra.mxu0 %vm383_vm1, %v3163_v46 }
0x41c1   :  { %v3232_v43 = vpop.f32.mrf.mxu0 }
0x41c2   :  { %v3233_v33 = vadd.f32 %v3278_v9, %v3232_v43 }
0x41c3   :  { %v3871_v23 = vpop.f32.mrf.mxu0 }
0x41c4   :  { %3237 = vst.msk [vmem:[%s5366_s10] sm:$0xff] %vm3236_vm4, %v3233_v33 }
0x41c5   :  { %3242 = vsyncpa [#allocation5], 1 }
0x41c6   :  { %3243 = vsyncpa [#allocation7], 1 }

</bundles_post_ra>
